<compile_context>
chip_gen: v6e
topology: v6e:2x2x1
jax: 0.10.0
libtpu: 0.0.40
codegen_flags: <defaults>
</compile_context>

<pallas_src>
import math

import jax
import jax.numpy as jnp
from jax import lax
from jax.experimental import pallas as pl
from jax.experimental.pallas import tpu as pltpu

# ---------------- config (small, matches module defaults) ----------------
B = 2            # batch
T = 16           # sequence length
HIDDEN = 32      # hidden_channels
FILTER = 64      # filter_channels
N_HEADS = 2
N_LAYERS = 2
WINDOW = 4       # window_size
KERNEL_SIZE = 1  # Encoder default; FFN convs are 1x1
DK = HIDDEN // N_HEADS
NREL = 2 * WINDOW + 1
BT = B * T
QKVR = 3 * HIDDEN + N_HEADS * NREL   # fused projection width (q|k|v|rel)
LN_EPS = 1e-5


# ---------------- kernel helpers ----------------
def _layer_norm(z, g, b):
    """Channel LayerNorm over the last axis (VITS LayerNorm, eps=1e-5)."""
    mu = jnp.mean(z, axis=-1, keepdims=True)
    var = jnp.mean(jnp.square(z - mu), axis=-1, keepdims=True)
    return (z - mu) * lax.rsqrt(var + LN_EPS) * g + b


# ---------------- kernel ----------------
def encoder_kernel(x_ref, mask_ref, amask_ref, diag_ref,
                   w_in_ref, wo_ref, w1_ref, w2_ref, small_ref,
                   out_ref):
    mask = mask_ref[...]              # [BT, 1]      (x_mask, rows)
    amask = amask_ref[...]            # [B*H, T, T]  (0/1 attention mask, b-major)
    diag = diag_ref[...]              # [NREL, T, T] one-hot diagonal masks

    x = x_ref[...] * mask             # x = x * x_mask

    for l in range(N_LAYERS):         # static unroll, weights resident in VMEM
        sm = small_ref[l]             # [17, 128] packed small params
        b_in = sm[0:1, :QKVR]         # [1, 3C + H*NREL]
        bo   = sm[1:2, :HIDDEN]
        g1   = sm[2:3, :HIDDEN]
        b1   = sm[3:4, :HIDDEN]
        bf1  = sm[4:5, :FILTER]
        bf2  = sm[5:6, :HIDDEN]
        g2   = sm[6:7, :HIDDEN]
        b2   = sm[7:8, :HIDDEN]
        rv   = sm[8:8 + NREL, :DK]    # [NREL, DK]  (emb_rel_v)

        # ---- fused projection: [q/sqrt(dk) | k | v | rel_logits] (one MXU push) ----
        qkvr = jnp.dot(x, w_in_ref[l], preferred_element_type=jnp.float32) + b_in

        # ---- per-(batch, head) 2D score matmuls, then stack over B*H ----
        score_l, v_l, rl_l = [], [], []
        for b in range(B):
            r0 = b * T
            for h in range(N_HEADS):
                c0 = h * DK
                q_bh = qkvr[r0:r0 + T, c0:c0 + DK]                      # pre-scaled q
                k_bh = qkvr[r0:r0 + T, HIDDEN + c0:HIDDEN + c0 + DK]
                v_l.append(qkvr[r0:r0 + T,
                                2 * HIDDEN + c0:2 * HIDDEN + c0 + DK])
                rl_l.append(qkvr[r0:r0 + T,
                                 3 * HIDDEN + h * NREL:3 * HIDDEN + (h + 1) * NREL])
                score_l.append(lax.dot_general(
                    q_bh, k_bh, (((1,), (1,)), ((), ())),
                    preferred_element_type=jnp.float32))                # q @ k^T
        scores = jnp.stack(score_l, axis=0)       # [B*H, T, T]
        rl_all = jnp.stack(rl_l, axis=0)          # [B*H, T, NREL]

        # ---- relative-key bias: single pass over the NREL diagonals ----
        for d in range(NREL):
            scores = scores + rl_all[:, :, d:d + 1] * diag[d]

        # ---- padding mask (masked_fill semantics, applied once) + softmax ----
        scores = jnp.where(amask > 0.5, scores, -1e4)
        m = jnp.max(scores, axis=-1, keepdims=True)
        e = jnp.exp(scores - m)
        p = e / jnp.sum(e, axis=-1, keepdims=True)     # exact division (f32 parity)

        # ---- relative-value contribution: single pass over the NREL diagonals ----
        o_rel = jnp.sum(p * diag[0], axis=-1, keepdims=True) * rv[0:1, :]
        for d in range(1, NREL):
            o_rel = o_rel + jnp.sum(p * diag[d], axis=-1, keepdims=True) * rv[d:d + 1, :]
        # o_rel: [B*H, T, DK]

        # ---- attention output + per-head output projection (no VMEM scratch) ----
        wo_l = wo_ref[l]                               # [C, C]
        y_rows = []
        for b in range(B):
            acc = None
            for h in range(N_HEADS):
                i = b * N_HEADS + h
                o_bh = jnp.dot(p[i], v_l[i], preferred_element_type=jnp.float32) + o_rel[i]
                c = jnp.dot(o_bh, wo_l[h * DK:(h + 1) * DK, :],
                            preferred_element_type=jnp.float32)
                acc = c if acc is None else acc + c
            y_rows.append(acc)
        y = jnp.concatenate(y_rows, axis=0) + bo       # [BT, C]

        x = _layer_norm(x + y, g1, b1)                 # residual + LN 1

        # ---- FFN (kernel_size=1 -> 1x1 conv channel matmuls), relu ----
        h1 = jnp.dot(x * mask, w1_ref[l], preferred_element_type=jnp.float32) + bf1
        h1 = jnp.maximum(h1, 0.0)                      # activation=None -> relu
        y = jnp.dot(h1 * mask, w2_ref[l], preferred_element_type=jnp.float32) + bf2
        y = y * mask
        x = _layer_norm(x + y, g2, b2)                 # residual + LN 2

    out_ref[...] = x * mask                            # final x = x * x_mask


# ---------------- pallas_call wrapper ----------------
def encoder_forward(x, x_mask, params):
    """x: [B, T, C], x_mask: [B, T] -> [B, T, C]."""
    # layer-independent constants, precomputed once in plain JAX
    attn_mask = x_mask[:, :, None] * x_mask[:, None, :]          # [B, T, T]
    amask_all = jnp.repeat(attn_mask, N_HEADS, axis=0)           # [B*H, T, T] (b-major)
    idx = jnp.arange(T)
    diffm = idx[None, :] - idx[:, None]                          # j - i
    diag = jnp.stack([(diffm == (d - WINDOW)).astype(jnp.float32)
                      for d in range(NREL)], axis=0)             # [NREL, T, T]

    x_flat = x.reshape(BT, HIDDEN)
    mask_flat = x_mask.reshape(BT, 1)

    vspec = pl.BlockSpec(memory_space=pltpu.MemorySpace.VMEM)
    out = pl.pallas_call(
        encoder_kernel,
        out_shape=jax.ShapeDtypeStruct((BT, HIDDEN), jnp.float32),
        in_specs=[vspec] * 9,          # whole arrays resident in VMEM, no grid
        out_specs=vspec,
    )(x_flat, mask_flat, amask_all, diag,
      params["w_in"], params["wo"], params["w1"], params["w2"], params["small"])
    return out.reshape(B, T, HIDDEN)


# ---------------- parameter setup (deterministic, in-script) ----------------
def _xavier_uniform(key, shape):
    fan_out, fan_in = shape
    lim = math.sqrt(6.0 / (fan_in + fan_out))
    return jax.random.uniform(key, shape, jnp.float32, -lim, lim)


def init_params(key):
    scale = 1.0 / math.sqrt(DK)
    C = HIDDEN
    w_in_l, wo_l, w1_l, w2_l, small_l = [], [], [], [], []
    for layer in range(N_LAYERS):
        lk = jax.random.fold_in(key, layer)
        ks = jax.random.split(lk, 16)
        # attention 1x1 convs (weights [out, in], bias [1, out])
        wq = _xavier_uniform(ks[0], (C, C))
        bq = 0.01 * jax.random.normal(ks[1], (1, C), jnp.float32)
        wk = _xavier_uniform(ks[2], (C, C))
        bk = 0.01 * jax.random.normal(ks[3], (1, C), jnp.float32)
        wv = _xavier_uniform(ks[4], (C, C))
        bv = 0.01 * jax.random.normal(ks[5], (1, C), jnp.float32)
        wo = 0.05 * jax.random.normal(ks[6], (C, C), jnp.float32)
        bo = 0.01 * jax.random.normal(ks[7], (1, C), jnp.float32)
        # FFN (kernel_size=1)
        w1 = 0.05 * jax.random.normal(ks[8], (FILTER, C), jnp.float32)
        b1f = 0.01 * jax.random.normal(ks[9], (1, FILTER), jnp.float32)
        w2 = 0.05 * jax.random.normal(ks[10], (C, FILTER), jnp.float32)
        b2f = 0.01 * jax.random.normal(ks[11], (1, C), jnp.float32)
        # relative position embeddings (heads_share=True -> [2W+1, DK])
        emb_rel_k = jax.random.normal(ks[12], (NREL, DK), jnp.float32) * DK ** -0.5
        emb_rel_v = jax.random.normal(ks[13], (NREL, DK), jnp.float32) * DK ** -0.5

        # pre-transpose convs to [in, out]; fold 1/sqrt(dk) into W_q / b_q and
        # fold the rel-key projection into the fused input projection columns.
        wq_t = (wq * scale).T                         # [C, C]
        bq_s = bq * scale                             # [1, C]
        rk_t = emb_rel_k.T                            # [DK, NREL]
        wrel = jnp.concatenate(
            [wq_t[:, h * DK:(h + 1) * DK] @ rk_t for h in range(N_HEADS)], axis=1)
        brel = jnp.concatenate(
            [bq_s[:, h * DK:(h + 1) * DK] @ rk_t for h in range(N_HEADS)], axis=1)
        w_in = jnp.concatenate([wq_t, wk.T, wv.T, wrel], axis=1)   # [C, 3C + H*NREL]
        b_in = jnp.concatenate([bq_s, bk, bv, brel], axis=1)       # [1, 3C + H*NREL]

        # pack all tiny per-layer tensors into one [17, 128] slab (one DMA)
        sm = jnp.zeros((8 + NREL, 128), jnp.float32)
        sm = sm.at[0, :QKVR].set(b_in[0])
        sm = sm.at[1, :C].set(bo[0])
        sm = sm.at[2, :C].set(jnp.ones((C,), jnp.float32))    # LN1 gamma
        sm = sm.at[3, :C].set(jnp.zeros((C,), jnp.float32))   # LN1 beta
        sm = sm.at[4, :FILTER].set(b1f[0])
        sm = sm.at[5, :C].set(b2f[0])
        sm = sm.at[6, :C].set(jnp.ones((C,), jnp.float32))    # LN2 gamma
        sm = sm.at[7, :C].set(jnp.zeros((C,), jnp.float32))   # LN2 beta
        sm = sm.at[8:8 + NREL, :DK].set(emb_rel_v)

        w_in_l.append(w_in)
        wo_l.append(wo.T)                                      # [C, C]
        w1_l.append(w1.T)                                      # [C, F]
        w2_l.append(w2.T)                                      # [F, C]
        small_l.append(sm)

    return {"w_in": jnp.stack(w_in_l, axis=0),
            "wo": jnp.stack(wo_l, axis=0),
            "w1": jnp.stack(w1_l, axis=0),
            "w2": jnp.stack(w2_l, axis=0),
            "small": jnp.stack(small_l, axis=0)}


if __name__ == "__main__":
    key = jax.random.PRNGKey(0)
    k_x, k_p = jax.random.split(key)

    x = jax.random.normal(k_x, (B, T, HIDDEN), jnp.float32)     # [B, T, C]
    # batch 0 fully valid, batch 1 has the last 4 positions padded
    x_mask = jnp.stack([
        jnp.ones((T,), jnp.float32),
        jnp.concatenate([jnp.ones((T - 4,), jnp.float32),
                         jnp.zeros((4,), jnp.float32)]),
    ], axis=0)                                                  # [B, T]

    params = init_params(k_p)

    out = encoder_forward(x, x_mask, params)
    out = jax.block_until_ready(out)
    assert out.shape == (B, T, HIDDEN)
    assert bool(jnp.all(jnp.isfinite(out)))
    # padded positions must be exactly zero
    assert bool(jnp.all(out[1, T - 4:, :] == 0.0))
    print("KERNEL_OK")
</pallas_src>

<mosaic_0001>
module attributes {stable_mosaic.version = 11 : i64} {
  func.func @encoder_kernel(%arg0: memref<32x32xf32, #tpu.memory_space<vmem>>, %arg1: memref<32x1xf32, #tpu.memory_space<vmem>>, %arg2: memref<4x16x16xf32, #tpu.memory_space<vmem>>, %arg3: memref<9x16x16xf32, #tpu.memory_space<vmem>>, %arg4: memref<2x32x114xf32, #tpu.memory_space<vmem>>, %arg5: memref<2x32x32xf32, #tpu.memory_space<vmem>>, %arg6: memref<2x32x64xf32, #tpu.memory_space<vmem>>, %arg7: memref<2x64x32xf32, #tpu.memory_space<vmem>>, %arg8: memref<2x17x128xf32, #tpu.memory_space<vmem>>, %arg9: memref<32x32xf32, #tpu.memory_space<vmem>>) attributes {dimension_semantics = [], scalar_prefetch = 0 : i64, scratch_operands = 0 : i64, tpu.core_type = #tpu.core_type<tc>} {
    %c0 = arith.constant 0 : index
    %c0_0 = arith.constant 0 : index
    %0 = vector.load %arg1[%c0, %c0_0] : memref<32x1xf32, #tpu.memory_space<vmem>>, vector<32x1xf32>
    %c0_1 = arith.constant 0 : index
    %c0_2 = arith.constant 0 : index
    %c0_3 = arith.constant 0 : index
    %1 = vector.load %arg2[%c0_1, %c0_2, %c0_3] : memref<4x16x16xf32, #tpu.memory_space<vmem>>, vector<4x16x16xf32>
    %c0_4 = arith.constant 0 : index
    %c0_5 = arith.constant 0 : index
    %c0_6 = arith.constant 0 : index
    %2 = vector.load %arg3[%c0_4, %c0_5, %c0_6] : memref<9x16x16xf32, #tpu.memory_space<vmem>>, vector<9x16x16xf32>
    %c0_7 = arith.constant 0 : index
    %c0_8 = arith.constant 0 : index
    %3 = vector.load %arg0[%c0_7, %c0_8] : memref<32x32xf32, #tpu.memory_space<vmem>>, vector<32x32xf32>
    %4 = vector.broadcast %0 : vector<32x1xf32> to vector<32x32xf32>
    %5 = arith.mulf %3, %4 : vector<32x32xf32>
    %c0_9 = arith.constant 0 : index
    %c0_10 = arith.constant 0 : index
    %c0_11 = arith.constant 0 : index
    %6 = vector.load %arg8[%c0_9, %c0_10, %c0_11] : memref<2x17x128xf32, #tpu.memory_space<vmem>>, vector<1x17x128xf32>
    %7 = vector.shape_cast %6 : vector<1x17x128xf32> to vector<17x128xf32>
    %8 = vector.extract_strided_slice %7 {offsets = [0, 0], sizes = [1, 114], strides = [1, 1]} : vector<17x128xf32> to vector<1x114xf32>
    %9 = vector.extract_strided_slice %7 {offsets = [1, 0], sizes = [1, 32], strides = [1, 1]} : vector<17x128xf32> to vector<1x32xf32>
    %10 = vector.extract_strided_slice %7 {offsets = [2, 0], sizes = [1, 32], strides = [1, 1]} : vector<17x128xf32> to vector<1x32xf32>
    %11 = vector.extract_strided_slice %7 {offsets = [3, 0], sizes = [1, 32], strides = [1, 1]} : vector<17x128xf32> to vector<1x32xf32>
    %12 = vector.extract_strided_slice %7 {offsets = [4, 0], sizes = [1, 64], strides = [1, 1]} : vector<17x128xf32> to vector<1x64xf32>
    %13 = vector.extract_strided_slice %7 {offsets = [5, 0], sizes = [1, 32], strides = [1, 1]} : vector<17x128xf32> to vector<1x32xf32>
    %14 = vector.extract_strided_slice %7 {offsets = [6, 0], sizes = [1, 32], strides = [1, 1]} : vector<17x128xf32> to vector<1x32xf32>
    %15 = vector.extract_strided_slice %7 {offsets = [7, 0], sizes = [1, 32], strides = [1, 1]} : vector<17x128xf32> to vector<1x32xf32>
    %16 = vector.extract_strided_slice %7 {offsets = [8, 0], sizes = [9, 16], strides = [1, 1]} : vector<17x128xf32> to vector<9x16xf32>
    %c0_12 = arith.constant 0 : index
    %c0_13 = arith.constant 0 : index
    %c0_14 = arith.constant 0 : index
    %17 = vector.load %arg4[%c0_12, %c0_13, %c0_14] : memref<2x32x114xf32, #tpu.memory_space<vmem>>, vector<1x32x114xf32>
    %18 = vector.shape_cast %17 : vector<1x32x114xf32> to vector<32x114xf32>
    %cst = arith.constant dense<0.000000e+00> : vector<32x114xf32>
    %19 = tpu.matmul %5, %18, %cst {dimension_numbers = #tpu.dot_dimension_numbers<[1], [0], [0], [1], [0, 0, 1, 1], [], []>} : vector<32x32xf32>, vector<32x114xf32>, vector<32x114xf32> -> vector<32x114xf32>
    %20 = vector.broadcast %8 : vector<1x114xf32> to vector<32x114xf32>
    %21 = arith.addf %19, %20 : vector<32x114xf32>
    %22 = vector.extract_strided_slice %21 {offsets = [0, 0], sizes = [16, 16], strides = [1, 1]} : vector<32x114xf32> to vector<16x16xf32>
    %23 = vector.extract_strided_slice %21 {offsets = [0, 32], sizes = [16, 16], strides = [1, 1]} : vector<32x114xf32> to vector<16x16xf32>
    %24 = vector.extract_strided_slice %21 {offsets = [0, 64], sizes = [16, 16], strides = [1, 1]} : vector<32x114xf32> to vector<16x16xf32>
    %25 = vector.extract_strided_slice %21 {offsets = [0, 96], sizes = [16, 9], strides = [1, 1]} : vector<32x114xf32> to vector<16x9xf32>
    %cst_15 = arith.constant dense<0.000000e+00> : vector<16x16xf32>
    %26 = tpu.matmul %22, %23, %cst_15 {dimension_numbers = #tpu.dot_dimension_numbers<[1], [1], [0], [0], [0, 0, 1, 0], [], []>} : vector<16x16xf32>, vector<16x16xf32>, vector<16x16xf32> -> vector<16x16xf32>
    %27 = vector.extract_strided_slice %21 {offsets = [0, 16], sizes = [16, 16], strides = [1, 1]} : vector<32x114xf32> to vector<16x16xf32>
    %28 = vector.extract_strided_slice %21 {offsets = [0, 48], sizes = [16, 16], strides = [1, 1]} : vector<32x114xf32> to vector<16x16xf32>
    %29 = vector.extract_strided_slice %21 {offsets = [0, 80], sizes = [16, 16], strides = [1, 1]} : vector<32x114xf32> to vector<16x16xf32>
    %30 = vector.extract_strided_slice %21 {offsets = [0, 105], sizes = [16, 9], strides = [1, 1]} : vector<32x114xf32> to vector<16x9xf32>
    %cst_16 = arith.constant dense<0.000000e+00> : vector<16x16xf32>
    %31 = tpu.matmul %27, %28, %cst_16 {dimension_numbers = #tpu.dot_dimension_numbers<[1], [1], [0], [0], [0, 0, 1, 0], [], []>} : vector<16x16xf32>, vector<16x16xf32>, vector<16x16xf32> -> vector<16x16xf32>
    %32 = vector.extract_strided_slice %21 {offsets = [16, 0], sizes = [16, 16], strides = [1, 1]} : vector<32x114xf32> to vector<16x16xf32>
    %33 = vector.extract_strided_slice %21 {offsets = [16, 32], sizes = [16, 16], strides = [1, 1]} : vector<32x114xf32> to vector<16x16xf32>
    %34 = vector.extract_strided_slice %21 {offsets = [16, 64], sizes = [16, 16], strides = [1, 1]} : vector<32x114xf32> to vector<16x16xf32>
    %35 = vector.extract_strided_slice %21 {offsets = [16, 96], sizes = [16, 9], strides = [1, 1]} : vector<32x114xf32> to vector<16x9xf32>
    %cst_17 = arith.constant dense<0.000000e+00> : vector<16x16xf32>
    %36 = tpu.matmul %32, %33, %cst_17 {dimension_numbers = #tpu.dot_dimension_numbers<[1], [1], [0], [0], [0, 0, 1, 0], [], []>} : vector<16x16xf32>, vector<16x16xf32>, vector<16x16xf32> -> vector<16x16xf32>
    %37 = vector.extract_strided_slice %21 {offsets = [16, 16], sizes = [16, 16], strides = [1, 1]} : vector<32x114xf32> to vector<16x16xf32>
    %38 = vector.extract_strided_slice %21 {offsets = [16, 48], sizes = [16, 16], strides = [1, 1]} : vector<32x114xf32> to vector<16x16xf32>
    %39 = vector.extract_strided_slice %21 {offsets = [16, 80], sizes = [16, 16], strides = [1, 1]} : vector<32x114xf32> to vector<16x16xf32>
    %40 = vector.extract_strided_slice %21 {offsets = [16, 105], sizes = [16, 9], strides = [1, 1]} : vector<32x114xf32> to vector<16x9xf32>
    %cst_18 = arith.constant dense<0.000000e+00> : vector<16x16xf32>
    %41 = tpu.matmul %37, %38, %cst_18 {dimension_numbers = #tpu.dot_dimension_numbers<[1], [1], [0], [0], [0, 0, 1, 0], [], []>} : vector<16x16xf32>, vector<16x16xf32>, vector<16x16xf32> -> vector<16x16xf32>
    %42 = vector.shape_cast %26 : vector<16x16xf32> to vector<1x16x16xf32>
    %43 = vector.shape_cast %31 : vector<16x16xf32> to vector<1x16x16xf32>
    %44 = vector.shape_cast %36 : vector<16x16xf32> to vector<1x16x16xf32>
    %45 = vector.shape_cast %41 : vector<16x16xf32> to vector<1x16x16xf32>
    %46 = tpu.concatenate %42, %43, %44, %45 in 0 : vector<1x16x16xf32>, vector<1x16x16xf32>, vector<1x16x16xf32>, vector<1x16x16xf32> -> vector<4x16x16xf32>
    %47 = vector.shape_cast %25 : vector<16x9xf32> to vector<1x16x9xf32>
    %48 = vector.shape_cast %30 : vector<16x9xf32> to vector<1x16x9xf32>
    %49 = vector.shape_cast %35 : vector<16x9xf32> to vector<1x16x9xf32>
    %50 = vector.shape_cast %40 : vector<16x9xf32> to vector<1x16x9xf32>
    %51 = tpu.concatenate %47, %48, %49, %50 in 0 : vector<1x16x9xf32>, vector<1x16x9xf32>, vector<1x16x9xf32>, vector<1x16x9xf32> -> vector<4x16x9xf32>
    %52 = vector.extract_strided_slice %51 {offsets = [0, 0, 0], sizes = [4, 16, 1], strides = [1, 1, 1]} : vector<4x16x9xf32> to vector<4x16x1xf32>
    %53 = vector.extract_strided_slice %2 {offsets = [0, 0, 0], sizes = [1, 16, 16], strides = [1, 1, 1]} : vector<9x16x16xf32> to vector<1x16x16xf32>
    %54 = vector.shape_cast %53 : vector<1x16x16xf32> to vector<16x16xf32>
    %55 = vector.shape_cast %54 : vector<16x16xf32> to vector<1x16x16xf32>
    %56 = vector.broadcast %52 : vector<4x16x1xf32> to vector<4x16x16xf32>
    %57 = vector.broadcast %55 : vector<1x16x16xf32> to vector<4x16x16xf32>
    %58 = arith.mulf %56, %57 : vector<4x16x16xf32>
    %59 = arith.addf %46, %58 : vector<4x16x16xf32>
    %60 = vector.extract_strided_slice %51 {offsets = [0, 0, 1], sizes = [4, 16, 1], strides = [1, 1, 1]} : vector<4x16x9xf32> to vector<4x16x1xf32>
    %61 = vector.extract_strided_slice %2 {offsets = [1, 0, 0], sizes = [1, 16, 16], strides = [1, 1, 1]} : vector<9x16x16xf32> to vector<1x16x16xf32>
    %62 = vector.shape_cast %61 : vector<1x16x16xf32> to vector<16x16xf32>
    %63 = vector.shape_cast %62 : vector<16x16xf32> to vector<1x16x16xf32>
    %64 = vector.broadcast %60 : vector<4x16x1xf32> to vector<4x16x16xf32>
    %65 = vector.broadcast %63 : vector<1x16x16xf32> to vector<4x16x16xf32>
    %66 = arith.mulf %64, %65 : vector<4x16x16xf32>
    %67 = arith.addf %59, %66 : vector<4x16x16xf32>
    %68 = vector.extract_strided_slice %51 {offsets = [0, 0, 2], sizes = [4, 16, 1], strides = [1, 1, 1]} : vector<4x16x9xf32> to vector<4x16x1xf32>
    %69 = vector.extract_strided_slice %2 {offsets = [2, 0, 0], sizes = [1, 16, 16], strides = [1, 1, 1]} : vector<9x16x16xf32> to vector<1x16x16xf32>
    %70 = vector.shape_cast %69 : vector<1x16x16xf32> to vector<16x16xf32>
    %71 = vector.shape_cast %70 : vector<16x16xf32> to vector<1x16x16xf32>
    %72 = vector.broadcast %68 : vector<4x16x1xf32> to vector<4x16x16xf32>
    %73 = vector.broadcast %71 : vector<1x16x16xf32> to vector<4x16x16xf32>
    %74 = arith.mulf %72, %73 : vector<4x16x16xf32>
    %75 = arith.addf %67, %74 : vector<4x16x16xf32>
    %76 = vector.extract_strided_slice %51 {offsets = [0, 0, 3], sizes = [4, 16, 1], strides = [1, 1, 1]} : vector<4x16x9xf32> to vector<4x16x1xf32>
    %77 = vector.extract_strided_slice %2 {offsets = [3, 0, 0], sizes = [1, 16, 16], strides = [1, 1, 1]} : vector<9x16x16xf32> to vector<1x16x16xf32>
    %78 = vector.shape_cast %77 : vector<1x16x16xf32> to vector<16x16xf32>
    %79 = vector.shape_cast %78 : vector<16x16xf32> to vector<1x16x16xf32>
    %80 = vector.broadcast %76 : vector<4x16x1xf32> to vector<4x16x16xf32>
    %81 = vector.broadcast %79 : vector<1x16x16xf32> to vector<4x16x16xf32>
    %82 = arith.mulf %80, %81 : vector<4x16x16xf32>
    %83 = arith.addf %75, %82 : vector<4x16x16xf32>
    %84 = vector.extract_strided_slice %51 {offsets = [0, 0, 4], sizes = [4, 16, 1], strides = [1, 1, 1]} : vector<4x16x9xf32> to vector<4x16x1xf32>
    %85 = vector.extract_strided_slice %2 {offsets = [4, 0, 0], sizes = [1, 16, 16], strides = [1, 1, 1]} : vector<9x16x16xf32> to vector<1x16x16xf32>
    %86 = vector.shape_cast %85 : vector<1x16x16xf32> to vector<16x16xf32>
    %87 = vector.shape_cast %86 : vector<16x16xf32> to vector<1x16x16xf32>
    %88 = vector.broadcast %84 : vector<4x16x1xf32> to vector<4x16x16xf32>
    %89 = vector.broadcast %87 : vector<1x16x16xf32> to vector<4x16x16xf32>
    %90 = arith.mulf %88, %89 : vector<4x16x16xf32>
    %91 = arith.addf %83, %90 : vector<4x16x16xf32>
    %92 = vector.extract_strided_slice %51 {offsets = [0, 0, 5], sizes = [4, 16, 1], strides = [1, 1, 1]} : vector<4x16x9xf32> to vector<4x16x1xf32>
    %93 = vector.extract_strided_slice %2 {offsets = [5, 0, 0], sizes = [1, 16, 16], strides = [1, 1, 1]} : vector<9x16x16xf32> to vector<1x16x16xf32>
    %94 = vector.shape_cast %93 : vector<1x16x16xf32> to vector<16x16xf32>
    %95 = vector.shape_cast %94 : vector<16x16xf32> to vector<1x16x16xf32>
    %96 = vector.broadcast %92 : vector<4x16x1xf32> to vector<4x16x16xf32>
    %97 = vector.broadcast %95 : vector<1x16x16xf32> to vector<4x16x16xf32>
    %98 = arith.mulf %96, %97 : vector<4x16x16xf32>
    %99 = arith.addf %91, %98 : vector<4x16x16xf32>
    %100 = vector.extract_strided_slice %51 {offsets = [0, 0, 6], sizes = [4, 16, 1], strides = [1, 1, 1]} : vector<4x16x9xf32> to vector<4x16x1xf32>
    %101 = vector.extract_strided_slice %2 {offsets = [6, 0, 0], sizes = [1, 16, 16], strides = [1, 1, 1]} : vector<9x16x16xf32> to vector<1x16x16xf32>
    %102 = vector.shape_cast %101 : vector<1x16x16xf32> to vector<16x16xf32>
    %103 = vector.shape_cast %102 : vector<16x16xf32> to vector<1x16x16xf32>
    %104 = vector.broadcast %100 : vector<4x16x1xf32> to vector<4x16x16xf32>
    %105 = vector.broadcast %103 : vector<1x16x16xf32> to vector<4x16x16xf32>
    %106 = arith.mulf %104, %105 : vector<4x16x16xf32>
    %107 = arith.addf %99, %106 : vector<4x16x16xf32>
    %108 = vector.extract_strided_slice %51 {offsets = [0, 0, 7], sizes = [4, 16, 1], strides = [1, 1, 1]} : vector<4x16x9xf32> to vector<4x16x1xf32>
    %109 = vector.extract_strided_slice %2 {offsets = [7, 0, 0], sizes = [1, 16, 16], strides = [1, 1, 1]} : vector<9x16x16xf32> to vector<1x16x16xf32>
    %110 = vector.shape_cast %109 : vector<1x16x16xf32> to vector<16x16xf32>
    %111 = vector.shape_cast %110 : vector<16x16xf32> to vector<1x16x16xf32>
    %112 = vector.broadcast %108 : vector<4x16x1xf32> to vector<4x16x16xf32>
    %113 = vector.broadcast %111 : vector<1x16x16xf32> to vector<4x16x16xf32>
    %114 = arith.mulf %112, %113 : vector<4x16x16xf32>
    %115 = arith.addf %107, %114 : vector<4x16x16xf32>
    %116 = vector.extract_strided_slice %51 {offsets = [0, 0, 8], sizes = [4, 16, 1], strides = [1, 1, 1]} : vector<4x16x9xf32> to vector<4x16x1xf32>
    %117 = vector.extract_strided_slice %2 {offsets = [8, 0, 0], sizes = [1, 16, 16], strides = [1, 1, 1]} : vector<9x16x16xf32> to vector<1x16x16xf32>
    %118 = vector.shape_cast %117 : vector<1x16x16xf32> to vector<16x16xf32>
    %119 = vector.shape_cast %118 : vector<16x16xf32> to vector<1x16x16xf32>
    %120 = vector.broadcast %116 : vector<4x16x1xf32> to vector<4x16x16xf32>
    %121 = vector.broadcast %119 : vector<1x16x16xf32> to vector<4x16x16xf32>
    %122 = arith.mulf %120, %121 : vector<4x16x16xf32>
    %123 = arith.addf %115, %122 : vector<4x16x16xf32>
    %cst_19 = arith.constant 5.000000e-01 : f32
    %124 = vector.broadcast %cst_19 : f32 to vector<4x16x16xf32>
    %125 = arith.cmpf ogt, %1, %124 : vector<4x16x16xf32>
    %cst_20 = arith.constant -1.000000e+04 : f32
    %126 = vector.broadcast %cst_20 : f32 to vector<4x16x16xf32>
    %127 = arith.select %125, %123, %126 : vector<4x16x16xi1>, vector<4x16x16xf32>
    %cst_21 = arith.constant dense<0xFF800000> : vector<4x16xf32>
    %128 = vector.multi_reduction <maximumf>, %127, %cst_21 [2] : vector<4x16x16xf32> to vector<4x16xf32>
    %129 = vector.shape_cast %128 : vector<4x16xf32> to vector<4x16x1xf32>
    %130 = vector.broadcast %129 : vector<4x16x1xf32> to vector<4x16x16xf32>
    %131 = arith.subf %127, %130 : vector<4x16x16xf32>
    %132 = math.exp %131 : vector<4x16x16xf32>
    %cst_22 = arith.constant dense<0.000000e+00> : vector<4x16xf32>
    %133 = vector.multi_reduction <add>, %132, %cst_22 [2] : vector<4x16x16xf32> to vector<4x16xf32>
    %134 = vector.shape_cast %133 : vector<4x16xf32> to vector<4x16x1xf32>
    %135 = vector.broadcast %134 : vector<4x16x1xf32> to vector<4x16x16xf32>
    %136 = arith.divf %132, %135 : vector<4x16x16xf32>
    %137 = vector.extract_strided_slice %2 {offsets = [0, 0, 0], sizes = [1, 16, 16], strides = [1, 1, 1]} : vector<9x16x16xf32> to vector<1x16x16xf32>
    %138 = vector.shape_cast %137 : vector<1x16x16xf32> to vector<16x16xf32>
    %139 = vector.shape_cast %138 : vector<16x16xf32> to vector<1x16x16xf32>
    %140 = vector.broadcast %139 : vector<1x16x16xf32> to vector<4x16x16xf32>
    %141 = arith.mulf %136, %140 : vector<4x16x16xf32>
    %cst_23 = arith.constant dense<0.000000e+00> : vector<4x16xf32>
    %142 = vector.multi_reduction <add>, %141, %cst_23 [2] : vector<4x16x16xf32> to vector<4x16xf32>
    %143 = vector.shape_cast %142 : vector<4x16xf32> to vector<4x16x1xf32>
    %144 = vector.extract_strided_slice %16 {offsets = [0, 0], sizes = [1, 16], strides = [1, 1]} : vector<9x16xf32> to vector<1x16xf32>
    %145 = vector.shape_cast %144 : vector<1x16xf32> to vector<1x1x16xf32>
    %146 = vector.broadcast %143 : vector<4x16x1xf32> to vector<4x16x16xf32>
    %147 = vector.broadcast %145 : vector<1x1x16xf32> to vector<4x16x16xf32>
    %148 = arith.mulf %146, %147 : vector<4x16x16xf32>
    %149 = vector.extract_strided_slice %2 {offsets = [1, 0, 0], sizes = [1, 16, 16], strides = [1, 1, 1]} : vector<9x16x16xf32> to vector<1x16x16xf32>
    %150 = vector.shape_cast %149 : vector<1x16x16xf32> to vector<16x16xf32>
    %151 = vector.shape_cast %150 : vector<16x16xf32> to vector<1x16x16xf32>
    %152 = vector.broadcast %151 : vector<1x16x16xf32> to vector<4x16x16xf32>
    %153 = arith.mulf %136, %152 : vector<4x16x16xf32>
    %cst_24 = arith.constant dense<0.000000e+00> : vector<4x16xf32>
    %154 = vector.multi_reduction <add>, %153, %cst_24 [2] : vector<4x16x16xf32> to vector<4x16xf32>
    %155 = vector.shape_cast %154 : vector<4x16xf32> to vector<4x16x1xf32>
    %156 = vector.extract_strided_slice %16 {offsets = [1, 0], sizes = [1, 16], strides = [1, 1]} : vector<9x16xf32> to vector<1x16xf32>
    %157 = vector.shape_cast %156 : vector<1x16xf32> to vector<1x1x16xf32>
    %158 = vector.broadcast %155 : vector<4x16x1xf32> to vector<4x16x16xf32>
    %159 = vector.broadcast %157 : vector<1x1x16xf32> to vector<4x16x16xf32>
    %160 = arith.mulf %158, %159 : vector<4x16x16xf32>
    %161 = arith.addf %148, %160 : vector<4x16x16xf32>
    %162 = vector.extract_strided_slice %2 {offsets = [2, 0, 0], sizes = [1, 16, 16], strides = [1, 1, 1]} : vector<9x16x16xf32> to vector<1x16x16xf32>
    %163 = vector.shape_cast %162 : vector<1x16x16xf32> to vector<16x16xf32>
    %164 = vector.shape_cast %163 : vector<16x16xf32> to vector<1x16x16xf32>
    %165 = vector.broadcast %164 : vector<1x16x16xf32> to vector<4x16x16xf32>
    %166 = arith.mulf %136, %165 : vector<4x16x16xf32>
    %cst_25 = arith.constant dense<0.000000e+00> : vector<4x16xf32>
    %167 = vector.multi_reduction <add>, %166, %cst_25 [2] : vector<4x16x16xf32> to vector<4x16xf32>
    %168 = vector.shape_cast %167 : vector<4x16xf32> to vector<4x16x1xf32>
    %169 = vector.extract_strided_slice %16 {offsets = [2, 0], sizes = [1, 16], strides = [1, 1]} : vector<9x16xf32> to vector<1x16xf32>
    %170 = vector.shape_cast %169 : vector<1x16xf32> to vector<1x1x16xf32>
    %171 = vector.broadcast %168 : vector<4x16x1xf32> to vector<4x16x16xf32>
    %172 = vector.broadcast %170 : vector<1x1x16xf32> to vector<4x16x16xf32>
    %173 = arith.mulf %171, %172 : vector<4x16x16xf32>
    %174 = arith.addf %161, %173 : vector<4x16x16xf32>
    %175 = vector.extract_strided_slice %2 {offsets = [3, 0, 0], sizes = [1, 16, 16], strides = [1, 1, 1]} : vector<9x16x16xf32> to vector<1x16x16xf32>
    %176 = vector.shape_cast %175 : vector<1x16x16xf32> to vector<16x16xf32>
    %177 = vector.shape_cast %176 : vector<16x16xf32> to vector<1x16x16xf32>
    %178 = vector.broadcast %177 : vector<1x16x16xf32> to vector<4x16x16xf32>
    %179 = arith.mulf %136, %178 : vector<4x16x16xf32>
    %cst_26 = arith.constant dense<0.000000e+00> : vector<4x16xf32>
    %180 = vector.multi_reduction <add>, %179, %cst_26 [2] : vector<4x16x16xf32> to vector<4x16xf32>
    %181 = vector.shape_cast %180 : vector<4x16xf32> to vector<4x16x1xf32>
    %182 = vector.extract_strided_slice %16 {offsets = [3, 0], sizes = [1, 16], strides = [1, 1]} : vector<9x16xf32> to vector<1x16xf32>
    %183 = vector.shape_cast %182 : vector<1x16xf32> to vector<1x1x16xf32>
    %184 = vector.broadcast %181 : vector<4x16x1xf32> to vector<4x16x16xf32>
    %185 = vector.broadcast %183 : vector<1x1x16xf32> to vector<4x16x16xf32>
    %186 = arith.mulf %184, %185 : vector<4x16x16xf32>
    %187 = arith.addf %174, %186 : vector<4x16x16xf32>
    %188 = vector.extract_strided_slice %2 {offsets = [4, 0, 0], sizes = [1, 16, 16], strides = [1, 1, 1]} : vector<9x16x16xf32> to vector<1x16x16xf32>
    %189 = vector.shape_cast %188 : vector<1x16x16xf32> to vector<16x16xf32>
    %190 = vector.shape_cast %189 : vector<16x16xf32> to vector<1x16x16xf32>
    %191 = vector.broadcast %190 : vector<1x16x16xf32> to vector<4x16x16xf32>
    %192 = arith.mulf %136, %191 : vector<4x16x16xf32>
    %cst_27 = arith.constant dense<0.000000e+00> : vector<4x16xf32>
    %193 = vector.multi_reduction <add>, %192, %cst_27 [2] : vector<4x16x16xf32> to vector<4x16xf32>
    %194 = vector.shape_cast %193 : vector<4x16xf32> to vector<4x16x1xf32>
    %195 = vector.extract_strided_slice %16 {offsets = [4, 0], sizes = [1, 16], strides = [1, 1]} : vector<9x16xf32> to vector<1x16xf32>
    %196 = vector.shape_cast %195 : vector<1x16xf32> to vector<1x1x16xf32>
    %197 = vector.broadcast %194 : vector<4x16x1xf32> to vector<4x16x16xf32>
    %198 = vector.broadcast %196 : vector<1x1x16xf32> to vector<4x16x16xf32>
    %199 = arith.mulf %197, %198 : vector<4x16x16xf32>
    %200 = arith.addf %187, %199 : vector<4x16x16xf32>
    %201 = vector.extract_strided_slice %2 {offsets = [5, 0, 0], sizes = [1, 16, 16], strides = [1, 1, 1]} : vector<9x16x16xf32> to vector<1x16x16xf32>
    %202 = vector.shape_cast %201 : vector<1x16x16xf32> to vector<16x16xf32>
    %203 = vector.shape_cast %202 : vector<16x16xf32> to vector<1x16x16xf32>
    %204 = vector.broadcast %203 : vector<1x16x16xf32> to vector<4x16x16xf32>
    %205 = arith.mulf %136, %204 : vector<4x16x16xf32>
    %cst_28 = arith.constant dense<0.000000e+00> : vector<4x16xf32>
    %206 = vector.multi_reduction <add>, %205, %cst_28 [2] : vector<4x16x16xf32> to vector<4x16xf32>
    %207 = vector.shape_cast %206 : vector<4x16xf32> to vector<4x16x1xf32>
    %208 = vector.extract_strided_slice %16 {offsets = [5, 0], sizes = [1, 16], strides = [1, 1]} : vector<9x16xf32> to vector<1x16xf32>
    %209 = vector.shape_cast %208 : vector<1x16xf32> to vector<1x1x16xf32>
    %210 = vector.broadcast %207 : vector<4x16x1xf32> to vector<4x16x16xf32>
    %211 = vector.broadcast %209 : vector<1x1x16xf32> to vector<4x16x16xf32>
    %212 = arith.mulf %210, %211 : vector<4x16x16xf32>
    %213 = arith.addf %200, %212 : vector<4x16x16xf32>
    %214 = vector.extract_strided_slice %2 {offsets = [6, 0, 0], sizes = [1, 16, 16], strides = [1, 1, 1]} : vector<9x16x16xf32> to vector<1x16x16xf32>
    %215 = vector.shape_cast %214 : vector<1x16x16xf32> to vector<16x16xf32>
    %216 = vector.shape_cast %215 : vector<16x16xf32> to vector<1x16x16xf32>
    %217 = vector.broadcast %216 : vector<1x16x16xf32> to vector<4x16x16xf32>
    %218 = arith.mulf %136, %217 : vector<4x16x16xf32>
    %cst_29 = arith.constant dense<0.000000e+00> : vector<4x16xf32>
    %219 = vector.multi_reduction <add>, %218, %cst_29 [2] : vector<4x16x16xf32> to vector<4x16xf32>
    %220 = vector.shape_cast %219 : vector<4x16xf32> to vector<4x16x1xf32>
    %221 = vector.extract_strided_slice %16 {offsets = [6, 0], sizes = [1, 16], strides = [1, 1]} : vector<9x16xf32> to vector<1x16xf32>
    %222 = vector.shape_cast %221 : vector<1x16xf32> to vector<1x1x16xf32>
    %223 = vector.broadcast %220 : vector<4x16x1xf32> to vector<4x16x16xf32>
    %224 = vector.broadcast %222 : vector<1x1x16xf32> to vector<4x16x16xf32>
    %225 = arith.mulf %223, %224 : vector<4x16x16xf32>
    %226 = arith.addf %213, %225 : vector<4x16x16xf32>
    %227 = vector.extract_strided_slice %2 {offsets = [7, 0, 0], sizes = [1, 16, 16], strides = [1, 1, 1]} : vector<9x16x16xf32> to vector<1x16x16xf32>
    %228 = vector.shape_cast %227 : vector<1x16x16xf32> to vector<16x16xf32>
    %229 = vector.shape_cast %228 : vector<16x16xf32> to vector<1x16x16xf32>
    %230 = vector.broadcast %229 : vector<1x16x16xf32> to vector<4x16x16xf32>
    %231 = arith.mulf %136, %230 : vector<4x16x16xf32>
    %cst_30 = arith.constant dense<0.000000e+00> : vector<4x16xf32>
    %232 = vector.multi_reduction <add>, %231, %cst_30 [2] : vector<4x16x16xf32> to vector<4x16xf32>
    %233 = vector.shape_cast %232 : vector<4x16xf32> to vector<4x16x1xf32>
    %234 = vector.extract_strided_slice %16 {offsets = [7, 0], sizes = [1, 16], strides = [1, 1]} : vector<9x16xf32> to vector<1x16xf32>
    %235 = vector.shape_cast %234 : vector<1x16xf32> to vector<1x1x16xf32>
    %236 = vector.broadcast %233 : vector<4x16x1xf32> to vector<4x16x16xf32>
    %237 = vector.broadcast %235 : vector<1x1x16xf32> to vector<4x16x16xf32>
    %238 = arith.mulf %236, %237 : vector<4x16x16xf32>
    %239 = arith.addf %226, %238 : vector<4x16x16xf32>
    %240 = vector.extract_strided_slice %2 {offsets = [8, 0, 0], sizes = [1, 16, 16], strides = [1, 1, 1]} : vector<9x16x16xf32> to vector<1x16x16xf32>
    %241 = vector.shape_cast %240 : vector<1x16x16xf32> to vector<16x16xf32>
    %242 = vector.shape_cast %241 : vector<16x16xf32> to vector<1x16x16xf32>
    %243 = vector.broadcast %242 : vector<1x16x16xf32> to vector<4x16x16xf32>
    %244 = arith.mulf %136, %243 : vector<4x16x16xf32>
    %cst_31 = arith.constant dense<0.000000e+00> : vector<4x16xf32>
    %245 = vector.multi_reduction <add>, %244, %cst_31 [2] : vector<4x16x16xf32> to vector<4x16xf32>
    %246 = vector.shape_cast %245 : vector<4x16xf32> to vector<4x16x1xf32>
    %247 = vector.extract_strided_slice %16 {offsets = [8, 0], sizes = [1, 16], strides = [1, 1]} : vector<9x16xf32> to vector<1x16xf32>
    %248 = vector.shape_cast %247 : vector<1x16xf32> to vector<1x1x16xf32>
    %249 = vector.broadcast %246 : vector<4x16x1xf32> to vector<4x16x16xf32>
    %250 = vector.broadcast %248 : vector<1x1x16xf32> to vector<4x16x16xf32>
    %251 = arith.mulf %249, %250 : vector<4x16x16xf32>
    %252 = arith.addf %239, %251 : vector<4x16x16xf32>
    %c0_32 = arith.constant 0 : index
    %c0_33 = arith.constant 0 : index
    %c0_34 = arith.constant 0 : index
    %253 = vector.load %arg5[%c0_32, %c0_33, %c0_34] : memref<2x32x32xf32, #tpu.memory_space<vmem>>, vector<1x32x32xf32>
    %254 = vector.shape_cast %253 : vector<1x32x32xf32> to vector<32x32xf32>
    %255 = vector.extract_strided_slice %136 {offsets = [0, 0, 0], sizes = [1, 16, 16], strides = [1, 1, 1]} : vector<4x16x16xf32> to vector<1x16x16xf32>
    %256 = vector.shape_cast %255 : vector<1x16x16xf32> to vector<16x16xf32>
    %cst_35 = arith.constant dense<0.000000e+00> : vector<16x16xf32>
    %257 = tpu.matmul %256, %24, %cst_35 {dimension_numbers = #tpu.dot_dimension_numbers<[1], [0], [0], [1], [0, 0, 1, 1], [], []>} : vector<16x16xf32>, vector<16x16xf32>, vector<16x16xf32> -> vector<16x16xf32>
    %258 = vector.extract_strided_slice %252 {offsets = [0, 0, 0], sizes = [1, 16, 16], strides = [1, 1, 1]} : vector<4x16x16xf32> to vector<1x16x16xf32>
    %259 = vector.shape_cast %258 : vector<1x16x16xf32> to vector<16x16xf32>
    %260 = arith.addf %257, %259 : vector<16x16xf32>
    %261 = vector.extract_strided_slice %254 {offsets = [0, 0], sizes = [16, 32], strides = [1, 1]} : vector<32x32xf32> to vector<16x32xf32>
    %cst_36 = arith.constant dense<0.000000e+00> : vector<16x32xf32>
    %262 = tpu.matmul %260, %261, %cst_36 {dimension_numbers = #tpu.dot_dimension_numbers<[1], [0], [0], [1], [0, 0, 1, 1], [], []>} : vector<16x16xf32>, vector<16x32xf32>, vector<16x32xf32> -> vector<16x32xf32>
    %263 = vector.extract_strided_slice %136 {offsets = [1, 0, 0], sizes = [1, 16, 16], strides = [1, 1, 1]} : vector<4x16x16xf32> to vector<1x16x16xf32>
    %264 = vector.shape_cast %263 : vector<1x16x16xf32> to vector<16x16xf32>
    %cst_37 = arith.constant dense<0.000000e+00> : vector<16x16xf32>
    %265 = tpu.matmul %264, %29, %cst_37 {dimension_numbers = #tpu.dot_dimension_numbers<[1], [0], [0], [1], [0, 0, 1, 1], [], []>} : vector<16x16xf32>, vector<16x16xf32>, vector<16x16xf32> -> vector<16x16xf32>
    %266 = vector.extract_strided_slice %252 {offsets = [1, 0, 0], sizes = [1, 16, 16], strides = [1, 1, 1]} : vector<4x16x16xf32> to vector<1x16x16xf32>
    %267 = vector.shape_cast %266 : vector<1x16x16xf32> to vector<16x16xf32>
    %268 = arith.addf %265, %267 : vector<16x16xf32>
    %269 = vector.extract_strided_slice %254 {offsets = [16, 0], sizes = [16, 32], strides = [1, 1]} : vector<32x32xf32> to vector<16x32xf32>
    %cst_38 = arith.constant dense<0.000000e+00> : vector<16x32xf32>
    %270 = tpu.matmul %268, %269, %cst_38 {dimension_numbers = #tpu.dot_dimension_numbers<[1], [0], [0], [1], [0, 0, 1, 1], [], []>} : vector<16x16xf32>, vector<16x32xf32>, vector<16x32xf32> -> vector<16x32xf32>
    %271 = arith.addf %262, %270 : vector<16x32xf32>
    %272 = vector.extract_strided_slice %136 {offsets = [2, 0, 0], sizes = [1, 16, 16], strides = [1, 1, 1]} : vector<4x16x16xf32> to vector<1x16x16xf32>
    %273 = vector.shape_cast %272 : vector<1x16x16xf32> to vector<16x16xf32>
    %cst_39 = arith.constant dense<0.000000e+00> : vector<16x16xf32>
    %274 = tpu.matmul %273, %34, %cst_39 {dimension_numbers = #tpu.dot_dimension_numbers<[1], [0], [0], [1], [0, 0, 1, 1], [], []>} : vector<16x16xf32>, vector<16x16xf32>, vector<16x16xf32> -> vector<16x16xf32>
    %275 = vector.extract_strided_slice %252 {offsets = [2, 0, 0], sizes = [1, 16, 16], strides = [1, 1, 1]} : vector<4x16x16xf32> to vector<1x16x16xf32>
    %276 = vector.shape_cast %275 : vector<1x16x16xf32> to vector<16x16xf32>
    %277 = arith.addf %274, %276 : vector<16x16xf32>
    %278 = vector.extract_strided_slice %254 {offsets = [0, 0], sizes = [16, 32], strides = [1, 1]} : vector<32x32xf32> to vector<16x32xf32>
    %cst_40 = arith.constant dense<0.000000e+00> : vector<16x32xf32>
    %279 = tpu.matmul %277, %278, %cst_40 {dimension_numbers = #tpu.dot_dimension_numbers<[1], [0], [0], [1], [0, 0, 1, 1], [], []>} : vector<16x16xf32>, vector<16x32xf32>, vector<16x32xf32> -> vector<16x32xf32>
    %280 = vector.extract_strided_slice %136 {offsets = [3, 0, 0], sizes = [1, 16, 16], strides = [1, 1, 1]} : vector<4x16x16xf32> to vector<1x16x16xf32>
    %281 = vector.shape_cast %280 : vector<1x16x16xf32> to vector<16x16xf32>
    %cst_41 = arith.constant dense<0.000000e+00> : vector<16x16xf32>
    %282 = tpu.matmul %281, %39, %cst_41 {dimension_numbers = #tpu.dot_dimension_numbers<[1], [0], [0], [1], [0, 0, 1, 1], [], []>} : vector<16x16xf32>, vector<16x16xf32>, vector<16x16xf32> -> vector<16x16xf32>
    %283 = vector.extract_strided_slice %252 {offsets = [3, 0, 0], sizes = [1, 16, 16], strides = [1, 1, 1]} : vector<4x16x16xf32> to vector<1x16x16xf32>
    %284 = vector.shape_cast %283 : vector<1x16x16xf32> to vector<16x16xf32>
    %285 = arith.addf %282, %284 : vector<16x16xf32>
    %286 = vector.extract_strided_slice %254 {offsets = [16, 0], sizes = [16, 32], strides = [1, 1]} : vector<32x32xf32> to vector<16x32xf32>
    %cst_42 = arith.constant dense<0.000000e+00> : vector<16x32xf32>
    %287 = tpu.matmul %285, %286, %cst_42 {dimension_numbers = #tpu.dot_dimension_numbers<[1], [0], [0], [1], [0, 0, 1, 1], [], []>} : vector<16x16xf32>, vector<16x32xf32>, vector<16x32xf32> -> vector<16x32xf32>
    %288 = arith.addf %279, %287 : vector<16x32xf32>
    %289 = tpu.concatenate %271, %288 in 0 : vector<16x32xf32>, vector<16x32xf32> -> vector<32x32xf32>
    %290 = vector.broadcast %9 : vector<1x32xf32> to vector<32x32xf32>
    %291 = arith.addf %289, %290 : vector<32x32xf32>
    %292 = arith.addf %5, %291 : vector<32x32xf32>
    %cst_43 = arith.constant dense<0.000000e+00> : vector<32xf32>
    %293 = vector.multi_reduction <add>, %292, %cst_43 [1] : vector<32x32xf32> to vector<32xf32>
    %294 = vector.shape_cast %293 : vector<32xf32> to vector<32x1xf32>
    %cst_44 = arith.constant 3.200000e+01 : f32
    %295 = vector.broadcast %cst_44 : f32 to vector<32x1xf32>
    %296 = arith.divf %294, %295 : vector<32x1xf32>
    %297 = vector.broadcast %296 : vector<32x1xf32> to vector<32x32xf32>
    %298 = arith.subf %292, %297 : vector<32x32xf32>
    %299 = arith.mulf %298, %298 : vector<32x32xf32>
    %cst_45 = arith.constant dense<0.000000e+00> : vector<32xf32>
    %300 = vector.multi_reduction <add>, %299, %cst_45 [1] : vector<32x32xf32> to vector<32xf32>
    %301 = vector.shape_cast %300 : vector<32xf32> to vector<32x1xf32>
    %cst_46 = arith.constant 3.200000e+01 : f32
    %302 = vector.broadcast %cst_46 : f32 to vector<32x1xf32>
    %303 = arith.divf %301, %302 : vector<32x1xf32>
    %304 = vector.broadcast %296 : vector<32x1xf32> to vector<32x32xf32>
    %305 = arith.subf %292, %304 : vector<32x32xf32>
    %cst_47 = arith.constant 9.99999974E-6 : f32
    %306 = vector.broadcast %cst_47 : f32 to vector<32x1xf32>
    %307 = arith.addf %303, %306 : vector<32x1xf32>
    %308 = math.rsqrt %307 : vector<32x1xf32>
    %309 = vector.broadcast %308 : vector<32x1xf32> to vector<32x32xf32>
    %310 = arith.mulf %305, %309 : vector<32x32xf32>
    %311 = vector.broadcast %10 : vector<1x32xf32> to vector<32x32xf32>
    %312 = arith.mulf %310, %311 : vector<32x32xf32>
    %313 = vector.broadcast %11 : vector<1x32xf32> to vector<32x32xf32>
    %314 = arith.addf %312, %313 : vector<32x32xf32>
    %315 = vector.broadcast %0 : vector<32x1xf32> to vector<32x32xf32>
    %316 = arith.mulf %314, %315 : vector<32x32xf32>
    %c0_48 = arith.constant 0 : index
    %c0_49 = arith.constant 0 : index
    %c0_50 = arith.constant 0 : index
    %317 = vector.load %arg6[%c0_48, %c0_49, %c0_50] : memref<2x32x64xf32, #tpu.memory_space<vmem>>, vector<1x32x64xf32>
    %318 = vector.shape_cast %317 : vector<1x32x64xf32> to vector<32x64xf32>
    %cst_51 = arith.constant dense<0.000000e+00> : vector<32x64xf32>
    %319 = tpu.matmul %316, %318, %cst_51 {dimension_numbers = #tpu.dot_dimension_numbers<[1], [0], [0], [1], [0, 0, 1, 1], [], []>} : vector<32x32xf32>, vector<32x64xf32>, vector<32x64xf32> -> vector<32x64xf32>
    %320 = vector.broadcast %12 : vector<1x64xf32> to vector<32x64xf32>
    %321 = arith.addf %319, %320 : vector<32x64xf32>
    %cst_52 = arith.constant 0.000000e+00 : f32
    %322 = vector.broadcast %cst_52 : f32 to vector<32x64xf32>
    %323 = arith.maximumf %321, %322 : vector<32x64xf32>
    %324 = vector.broadcast %0 : vector<32x1xf32> to vector<32x64xf32>
    %325 = arith.mulf %323, %324 : vector<32x64xf32>
    %c0_53 = arith.constant 0 : index
    %c0_54 = arith.constant 0 : index
    %c0_55 = arith.constant 0 : index
    %326 = vector.load %arg7[%c0_53, %c0_54, %c0_55] : memref<2x64x32xf32, #tpu.memory_space<vmem>>, vector<1x64x32xf32>
    %327 = vector.shape_cast %326 : vector<1x64x32xf32> to vector<64x32xf32>
    %cst_56 = arith.constant dense<0.000000e+00> : vector<32x32xf32>
    %328 = tpu.matmul %325, %327, %cst_56 {dimension_numbers = #tpu.dot_dimension_numbers<[1], [0], [0], [1], [0, 0, 1, 1], [], []>} : vector<32x64xf32>, vector<64x32xf32>, vector<32x32xf32> -> vector<32x32xf32>
    %329 = vector.broadcast %13 : vector<1x32xf32> to vector<32x32xf32>
    %330 = arith.addf %328, %329 : vector<32x32xf32>
    %331 = vector.broadcast %0 : vector<32x1xf32> to vector<32x32xf32>
    %332 = arith.mulf %330, %331 : vector<32x32xf32>
    %333 = arith.addf %314, %332 : vector<32x32xf32>
    %cst_57 = arith.constant dense<0.000000e+00> : vector<32xf32>
    %334 = vector.multi_reduction <add>, %333, %cst_57 [1] : vector<32x32xf32> to vector<32xf32>
    %335 = vector.shape_cast %334 : vector<32xf32> to vector<32x1xf32>
    %cst_58 = arith.constant 3.200000e+01 : f32
    %336 = vector.broadcast %cst_58 : f32 to vector<32x1xf32>
    %337 = arith.divf %335, %336 : vector<32x1xf32>
    %338 = vector.broadcast %337 : vector<32x1xf32> to vector<32x32xf32>
    %339 = arith.subf %333, %338 : vector<32x32xf32>
    %340 = arith.mulf %339, %339 : vector<32x32xf32>
    %cst_59 = arith.constant dense<0.000000e+00> : vector<32xf32>
    %341 = vector.multi_reduction <add>, %340, %cst_59 [1] : vector<32x32xf32> to vector<32xf32>
    %342 = vector.shape_cast %341 : vector<32xf32> to vector<32x1xf32>
    %cst_60 = arith.constant 3.200000e+01 : f32
    %343 = vector.broadcast %cst_60 : f32 to vector<32x1xf32>
    %344 = arith.divf %342, %343 : vector<32x1xf32>
    %345 = vector.broadcast %337 : vector<32x1xf32> to vector<32x32xf32>
    %346 = arith.subf %333, %345 : vector<32x32xf32>
    %cst_61 = arith.constant 9.99999974E-6 : f32
    %347 = vector.broadcast %cst_61 : f32 to vector<32x1xf32>
    %348 = arith.addf %344, %347 : vector<32x1xf32>
    %349 = math.rsqrt %348 : vector<32x1xf32>
    %350 = vector.broadcast %349 : vector<32x1xf32> to vector<32x32xf32>
    %351 = arith.mulf %346, %350 : vector<32x32xf32>
    %352 = vector.broadcast %14 : vector<1x32xf32> to vector<32x32xf32>
    %353 = arith.mulf %351, %352 : vector<32x32xf32>
    %354 = vector.broadcast %15 : vector<1x32xf32> to vector<32x32xf32>
    %355 = arith.addf %353, %354 : vector<32x32xf32>
    %c1 = arith.constant 1 : index
    %c0_62 = arith.constant 0 : index
    %c0_63 = arith.constant 0 : index
    %356 = vector.load %arg8[%c1, %c0_62, %c0_63] : memref<2x17x128xf32, #tpu.memory_space<vmem>>, vector<1x17x128xf32>
    %357 = vector.shape_cast %356 : vector<1x17x128xf32> to vector<17x128xf32>
    %358 = vector.extract_strided_slice %357 {offsets = [0, 0], sizes = [1, 114], strides = [1, 1]} : vector<17x128xf32> to vector<1x114xf32>
    %359 = vector.extract_strided_slice %357 {offsets = [1, 0], sizes = [1, 32], strides = [1, 1]} : vector<17x128xf32> to vector<1x32xf32>
    %360 = vector.extract_strided_slice %357 {offsets = [2, 0], sizes = [1, 32], strides = [1, 1]} : vector<17x128xf32> to vector<1x32xf32>
    %361 = vector.extract_strided_slice %357 {offsets = [3, 0], sizes = [1, 32], strides = [1, 1]} : vector<17x128xf32> to vector<1x32xf32>
    %362 = vector.extract_strided_slice %357 {offsets = [4, 0], sizes = [1, 64], strides = [1, 1]} : vector<17x128xf32> to vector<1x64xf32>
    %363 = vector.extract_strided_slice %357 {offsets = [5, 0], sizes = [1, 32], strides = [1, 1]} : vector<17x128xf32> to vector<1x32xf32>
    %364 = vector.extract_strided_slice %357 {offsets = [6, 0], sizes = [1, 32], strides = [1, 1]} : vector<17x128xf32> to vector<1x32xf32>
    %365 = vector.extract_strided_slice %357 {offsets = [7, 0], sizes = [1, 32], strides = [1, 1]} : vector<17x128xf32> to vector<1x32xf32>
    %366 = vector.extract_strided_slice %357 {offsets = [8, 0], sizes = [9, 16], strides = [1, 1]} : vector<17x128xf32> to vector<9x16xf32>
    %c1_64 = arith.constant 1 : index
    %c0_65 = arith.constant 0 : index
    %c0_66 = arith.constant 0 : index
    %367 = vector.load %arg4[%c1_64, %c0_65, %c0_66] : memref<2x32x114xf32, #tpu.memory_space<vmem>>, vector<1x32x114xf32>
    %368 = vector.shape_cast %367 : vector<1x32x114xf32> to vector<32x114xf32>
    %cst_67 = arith.constant dense<0.000000e+00> : vector<32x114xf32>
    %369 = tpu.matmul %355, %368, %cst_67 {dimension_numbers = #tpu.dot_dimension_numbers<[1], [0], [0], [1], [0, 0, 1, 1], [], []>} : vector<32x32xf32>, vector<32x114xf32>, vector<32x114xf32> -> vector<32x114xf32>
    %370 = vector.broadcast %358 : vector<1x114xf32> to vector<32x114xf32>
    %371 = arith.addf %369, %370 : vector<32x114xf32>
    %372 = vector.extract_strided_slice %371 {offsets = [0, 0], sizes = [16, 16], strides = [1, 1]} : vector<32x114xf32> to vector<16x16xf32>
    %373 = vector.extract_strided_slice %371 {offsets = [0, 32], sizes = [16, 16], strides = [1, 1]} : vector<32x114xf32> to vector<16x16xf32>
    %374 = vector.extract_strided_slice %371 {offsets = [0, 64], sizes = [16, 16], strides = [1, 1]} : vector<32x114xf32> to vector<16x16xf32>
    %375 = vector.extract_strided_slice %371 {offsets = [0, 96], sizes = [16, 9], strides = [1, 1]} : vector<32x114xf32> to vector<16x9xf32>
    %cst_68 = arith.constant dense<0.000000e+00> : vector<16x16xf32>
    %376 = tpu.matmul %372, %373, %cst_68 {dimension_numbers = #tpu.dot_dimension_numbers<[1], [1], [0], [0], [0, 0, 1, 0], [], []>} : vector<16x16xf32>, vector<16x16xf32>, vector<16x16xf32> -> vector<16x16xf32>
    %377 = vector.extract_strided_slice %371 {offsets = [0, 16], sizes = [16, 16], strides = [1, 1]} : vector<32x114xf32> to vector<16x16xf32>
    %378 = vector.extract_strided_slice %371 {offsets = [0, 48], sizes = [16, 16], strides = [1, 1]} : vector<32x114xf32> to vector<16x16xf32>
    %379 = vector.extract_strided_slice %371 {offsets = [0, 80], sizes = [16, 16], strides = [1, 1]} : vector<32x114xf32> to vector<16x16xf32>
    %380 = vector.extract_strided_slice %371 {offsets = [0, 105], sizes = [16, 9], strides = [1, 1]} : vector<32x114xf32> to vector<16x9xf32>
    %cst_69 = arith.constant dense<0.000000e+00> : vector<16x16xf32>
    %381 = tpu.matmul %377, %378, %cst_69 {dimension_numbers = #tpu.dot_dimension_numbers<[1], [1], [0], [0], [0, 0, 1, 0], [], []>} : vector<16x16xf32>, vector<16x16xf32>, vector<16x16xf32> -> vector<16x16xf32>
    %382 = vector.extract_strided_slice %371 {offsets = [16, 0], sizes = [16, 16], strides = [1, 1]} : vector<32x114xf32> to vector<16x16xf32>
    %383 = vector.extract_strided_slice %371 {offsets = [16, 32], sizes = [16, 16], strides = [1, 1]} : vector<32x114xf32> to vector<16x16xf32>
    %384 = vector.extract_strided_slice %371 {offsets = [16, 64], sizes = [16, 16], strides = [1, 1]} : vector<32x114xf32> to vector<16x16xf32>
    %385 = vector.extract_strided_slice %371 {offsets = [16, 96], sizes = [16, 9], strides = [1, 1]} : vector<32x114xf32> to vector<16x9xf32>
    %cst_70 = arith.constant dense<0.000000e+00> : vector<16x16xf32>
    %386 = tpu.matmul %382, %383, %cst_70 {dimension_numbers = #tpu.dot_dimension_numbers<[1], [1], [0], [0], [0, 0, 1, 0], [], []>} : vector<16x16xf32>, vector<16x16xf32>, vector<16x16xf32> -> vector<16x16xf32>
    %387 = vector.extract_strided_slice %371 {offsets = [16, 16], sizes = [16, 16], strides = [1, 1]} : vector<32x114xf32> to vector<16x16xf32>
    %388 = vector.extract_strided_slice %371 {offsets = [16, 48], sizes = [16, 16], strides = [1, 1]} : vector<32x114xf32> to vector<16x16xf32>
    %389 = vector.extract_strided_slice %371 {offsets = [16, 80], sizes = [16, 16], strides = [1, 1]} : vector<32x114xf32> to vector<16x16xf32>
    %390 = vector.extract_strided_slice %371 {offsets = [16, 105], sizes = [16, 9], strides = [1, 1]} : vector<32x114xf32> to vector<16x9xf32>
    %cst_71 = arith.constant dense<0.000000e+00> : vector<16x16xf32>
    %391 = tpu.matmul %387, %388, %cst_71 {dimension_numbers = #tpu.dot_dimension_numbers<[1], [1], [0], [0], [0, 0, 1, 0], [], []>} : vector<16x16xf32>, vector<16x16xf32>, vector<16x16xf32> -> vector<16x16xf32>
    %392 = vector.shape_cast %376 : vector<16x16xf32> to vector<1x16x16xf32>
    %393 = vector.shape_cast %381 : vector<16x16xf32> to vector<1x16x16xf32>
    %394 = vector.shape_cast %386 : vector<16x16xf32> to vector<1x16x16xf32>
    %395 = vector.shape_cast %391 : vector<16x16xf32> to vector<1x16x16xf32>
    %396 = tpu.concatenate %392, %393, %394, %395 in 0 : vector<1x16x16xf32>, vector<1x16x16xf32>, vector<1x16x16xf32>, vector<1x16x16xf32> -> vector<4x16x16xf32>
    %397 = vector.shape_cast %375 : vector<16x9xf32> to vector<1x16x9xf32>
    %398 = vector.shape_cast %380 : vector<16x9xf32> to vector<1x16x9xf32>
    %399 = vector.shape_cast %385 : vector<16x9xf32> to vector<1x16x9xf32>
    %400 = vector.shape_cast %390 : vector<16x9xf32> to vector<1x16x9xf32>
    %401 = tpu.concatenate %397, %398, %399, %400 in 0 : vector<1x16x9xf32>, vector<1x16x9xf32>, vector<1x16x9xf32>, vector<1x16x9xf32> -> vector<4x16x9xf32>
    %402 = vector.extract_strided_slice %401 {offsets = [0, 0, 0], sizes = [4, 16, 1], strides = [1, 1, 1]} : vector<4x16x9xf32> to vector<4x16x1xf32>
    %403 = vector.extract_strided_slice %2 {offsets = [0, 0, 0], sizes = [1, 16, 16], strides = [1, 1, 1]} : vector<9x16x16xf32> to vector<1x16x16xf32>
    %404 = vector.shape_cast %403 : vector<1x16x16xf32> to vector<16x16xf32>
    %405 = vector.shape_cast %404 : vector<16x16xf32> to vector<1x16x16xf32>
    %406 = vector.broadcast %402 : vector<4x16x1xf32> to vector<4x16x16xf32>
    %407 = vector.broadcast %405 : vector<1x16x16xf32> to vector<4x16x16xf32>
    %408 = arith.mulf %406, %407 : vector<4x16x16xf32>
    %409 = arith.addf %396, %408 : vector<4x16x16xf32>
    %410 = vector.extract_strided_slice %401 {offsets = [0, 0, 1], sizes = [4, 16, 1], strides = [1, 1, 1]} : vector<4x16x9xf32> to vector<4x16x1xf32>
    %411 = vector.extract_strided_slice %2 {offsets = [1, 0, 0], sizes = [1, 16, 16], strides = [1, 1, 1]} : vector<9x16x16xf32> to vector<1x16x16xf32>
    %412 = vector.shape_cast %411 : vector<1x16x16xf32> to vector<16x16xf32>
    %413 = vector.shape_cast %412 : vector<16x16xf32> to vector<1x16x16xf32>
    %414 = vector.broadcast %410 : vector<4x16x1xf32> to vector<4x16x16xf32>
    %415 = vector.broadcast %413 : vector<1x16x16xf32> to vector<4x16x16xf32>
    %416 = arith.mulf %414, %415 : vector<4x16x16xf32>
    %417 = arith.addf %409, %416 : vector<4x16x16xf32>
    %418 = vector.extract_strided_slice %401 {offsets = [0, 0, 2], sizes = [4, 16, 1], strides = [1, 1, 1]} : vector<4x16x9xf32> to vector<4x16x1xf32>
    %419 = vector.extract_strided_slice %2 {offsets = [2, 0, 0], sizes = [1, 16, 16], strides = [1, 1, 1]} : vector<9x16x16xf32> to vector<1x16x16xf32>
    %420 = vector.shape_cast %419 : vector<1x16x16xf32> to vector<16x16xf32>
    %421 = vector.shape_cast %420 : vector<16x16xf32> to vector<1x16x16xf32>
    %422 = vector.broadcast %418 : vector<4x16x1xf32> to vector<4x16x16xf32>
    %423 = vector.broadcast %421 : vector<1x16x16xf32> to vector<4x16x16xf32>
    %424 = arith.mulf %422, %423 : vector<4x16x16xf32>
    %425 = arith.addf %417, %424 : vector<4x16x16xf32>
    %426 = vector.extract_strided_slice %401 {offsets = [0, 0, 3], sizes = [4, 16, 1], strides = [1, 1, 1]} : vector<4x16x9xf32> to vector<4x16x1xf32>
    %427 = vector.extract_strided_slice %2 {offsets = [3, 0, 0], sizes = [1, 16, 16], strides = [1, 1, 1]} : vector<9x16x16xf32> to vector<1x16x16xf32>
    %428 = vector.shape_cast %427 : vector<1x16x16xf32> to vector<16x16xf32>
    %429 = vector.shape_cast %428 : vector<16x16xf32> to vector<1x16x16xf32>
    %430 = vector.broadcast %426 : vector<4x16x1xf32> to vector<4x16x16xf32>
    %431 = vector.broadcast %429 : vector<1x16x16xf32> to vector<4x16x16xf32>
    %432 = arith.mulf %430, %431 : vector<4x16x16xf32>
    %433 = arith.addf %425, %432 : vector<4x16x16xf32>
    %434 = vector.extract_strided_slice %401 {offsets = [0, 0, 4], sizes = [4, 16, 1], strides = [1, 1, 1]} : vector<4x16x9xf32> to vector<4x16x1xf32>
    %435 = vector.extract_strided_slice %2 {offsets = [4, 0, 0], sizes = [1, 16, 16], strides = [1, 1, 1]} : vector<9x16x16xf32> to vector<1x16x16xf32>
    %436 = vector.shape_cast %435 : vector<1x16x16xf32> to vector<16x16xf32>
    %437 = vector.shape_cast %436 : vector<16x16xf32> to vector<1x16x16xf32>
    %438 = vector.broadcast %434 : vector<4x16x1xf32> to vector<4x16x16xf32>
    %439 = vector.broadcast %437 : vector<1x16x16xf32> to vector<4x16x16xf32>
    %440 = arith.mulf %438, %439 : vector<4x16x16xf32>
    %441 = arith.addf %433, %440 : vector<4x16x16xf32>
    %442 = vector.extract_strided_slice %401 {offsets = [0, 0, 5], sizes = [4, 16, 1], strides = [1, 1, 1]} : vector<4x16x9xf32> to vector<4x16x1xf32>
    %443 = vector.extract_strided_slice %2 {offsets = [5, 0, 0], sizes = [1, 16, 16], strides = [1, 1, 1]} : vector<9x16x16xf32> to vector<1x16x16xf32>
    %444 = vector.shape_cast %443 : vector<1x16x16xf32> to vector<16x16xf32>
    %445 = vector.shape_cast %444 : vector<16x16xf32> to vector<1x16x16xf32>
    %446 = vector.broadcast %442 : vector<4x16x1xf32> to vector<4x16x16xf32>
    %447 = vector.broadcast %445 : vector<1x16x16xf32> to vector<4x16x16xf32>
    %448 = arith.mulf %446, %447 : vector<4x16x16xf32>
    %449 = arith.addf %441, %448 : vector<4x16x16xf32>
    %450 = vector.extract_strided_slice %401 {offsets = [0, 0, 6], sizes = [4, 16, 1], strides = [1, 1, 1]} : vector<4x16x9xf32> to vector<4x16x1xf32>
    %451 = vector.extract_strided_slice %2 {offsets = [6, 0, 0], sizes = [1, 16, 16], strides = [1, 1, 1]} : vector<9x16x16xf32> to vector<1x16x16xf32>
    %452 = vector.shape_cast %451 : vector<1x16x16xf32> to vector<16x16xf32>
    %453 = vector.shape_cast %452 : vector<16x16xf32> to vector<1x16x16xf32>
    %454 = vector.broadcast %450 : vector<4x16x1xf32> to vector<4x16x16xf32>
    %455 = vector.broadcast %453 : vector<1x16x16xf32> to vector<4x16x16xf32>
    %456 = arith.mulf %454, %455 : vector<4x16x16xf32>
    %457 = arith.addf %449, %456 : vector<4x16x16xf32>
    %458 = vector.extract_strided_slice %401 {offsets = [0, 0, 7], sizes = [4, 16, 1], strides = [1, 1, 1]} : vector<4x16x9xf32> to vector<4x16x1xf32>
    %459 = vector.extract_strided_slice %2 {offsets = [7, 0, 0], sizes = [1, 16, 16], strides = [1, 1, 1]} : vector<9x16x16xf32> to vector<1x16x16xf32>
    %460 = vector.shape_cast %459 : vector<1x16x16xf32> to vector<16x16xf32>
    %461 = vector.shape_cast %460 : vector<16x16xf32> to vector<1x16x16xf32>
    %462 = vector.broadcast %458 : vector<4x16x1xf32> to vector<4x16x16xf32>
    %463 = vector.broadcast %461 : vector<1x16x16xf32> to vector<4x16x16xf32>
    %464 = arith.mulf %462, %463 : vector<4x16x16xf32>
    %465 = arith.addf %457, %464 : vector<4x16x16xf32>
    %466 = vector.extract_strided_slice %401 {offsets = [0, 0, 8], sizes = [4, 16, 1], strides = [1, 1, 1]} : vector<4x16x9xf32> to vector<4x16x1xf32>
    %467 = vector.extract_strided_slice %2 {offsets = [8, 0, 0], sizes = [1, 16, 16], strides = [1, 1, 1]} : vector<9x16x16xf32> to vector<1x16x16xf32>
    %468 = vector.shape_cast %467 : vector<1x16x16xf32> to vector<16x16xf32>
    %469 = vector.shape_cast %468 : vector<16x16xf32> to vector<1x16x16xf32>
    %470 = vector.broadcast %466 : vector<4x16x1xf32> to vector<4x16x16xf32>
    %471 = vector.broadcast %469 : vector<1x16x16xf32> to vector<4x16x16xf32>
    %472 = arith.mulf %470, %471 : vector<4x16x16xf32>
    %473 = arith.addf %465, %472 : vector<4x16x16xf32>
    %cst_72 = arith.constant 5.000000e-01 : f32
    %474 = vector.broadcast %cst_72 : f32 to vector<4x16x16xf32>
    %475 = arith.cmpf ogt, %1, %474 : vector<4x16x16xf32>
    %cst_73 = arith.constant -1.000000e+04 : f32
    %476 = vector.broadcast %cst_73 : f32 to vector<4x16x16xf32>
    %477 = arith.select %475, %473, %476 : vector<4x16x16xi1>, vector<4x16x16xf32>
    %cst_74 = arith.constant dense<0xFF800000> : vector<4x16xf32>
    %478 = vector.multi_reduction <maximumf>, %477, %cst_74 [2] : vector<4x16x16xf32> to vector<4x16xf32>
    %479 = vector.shape_cast %478 : vector<4x16xf32> to vector<4x16x1xf32>
    %480 = vector.broadcast %479 : vector<4x16x1xf32> to vector<4x16x16xf32>
    %481 = arith.subf %477, %480 : vector<4x16x16xf32>
    %482 = math.exp %481 : vector<4x16x16xf32>
    %cst_75 = arith.constant dense<0.000000e+00> : vector<4x16xf32>
    %483 = vector.multi_reduction <add>, %482, %cst_75 [2] : vector<4x16x16xf32> to vector<4x16xf32>
    %484 = vector.shape_cast %483 : vector<4x16xf32> to vector<4x16x1xf32>
    %485 = vector.broadcast %484 : vector<4x16x1xf32> to vector<4x16x16xf32>
    %486 = arith.divf %482, %485 : vector<4x16x16xf32>
    %487 = vector.extract_strided_slice %2 {offsets = [0, 0, 0], sizes = [1, 16, 16], strides = [1, 1, 1]} : vector<9x16x16xf32> to vector<1x16x16xf32>
    %488 = vector.shape_cast %487 : vector<1x16x16xf32> to vector<16x16xf32>
    %489 = vector.shape_cast %488 : vector<16x16xf32> to vector<1x16x16xf32>
    %490 = vector.broadcast %489 : vector<1x16x16xf32> to vector<4x16x16xf32>
    %491 = arith.mulf %486, %490 : vector<4x16x16xf32>
    %cst_76 = arith.constant dense<0.000000e+00> : vector<4x16xf32>
    %492 = vector.multi_reduction <add>, %491, %cst_76 [2] : vector<4x16x16xf32> to vector<4x16xf32>
    %493 = vector.shape_cast %492 : vector<4x16xf32> to vector<4x16x1xf32>
    %494 = vector.extract_strided_slice %366 {offsets = [0, 0], sizes = [1, 16], strides = [1, 1]} : vector<9x16xf32> to vector<1x16xf32>
    %495 = vector.shape_cast %494 : vector<1x16xf32> to vector<1x1x16xf32>
    %496 = vector.broadcast %493 : vector<4x16x1xf32> to vector<4x16x16xf32>
    %497 = vector.broadcast %495 : vector<1x1x16xf32> to vector<4x16x16xf32>
    %498 = arith.mulf %496, %497 : vector<4x16x16xf32>
    %499 = vector.extract_strided_slice %2 {offsets = [1, 0, 0], sizes = [1, 16, 16], strides = [1, 1, 1]} : vector<9x16x16xf32> to vector<1x16x16xf32>
    %500 = vector.shape_cast %499 : vector<1x16x16xf32> to vector<16x16xf32>
    %501 = vector.shape_cast %500 : vector<16x16xf32> to vector<1x16x16xf32>
    %502 = vector.broadcast %501 : vector<1x16x16xf32> to vector<4x16x16xf32>
    %503 = arith.mulf %486, %502 : vector<4x16x16xf32>
    %cst_77 = arith.constant dense<0.000000e+00> : vector<4x16xf32>
    %504 = vector.multi_reduction <add>, %503, %cst_77 [2] : vector<4x16x16xf32> to vector<4x16xf32>
    %505 = vector.shape_cast %504 : vector<4x16xf32> to vector<4x16x1xf32>
    %506 = vector.extract_strided_slice %366 {offsets = [1, 0], sizes = [1, 16], strides = [1, 1]} : vector<9x16xf32> to vector<1x16xf32>
    %507 = vector.shape_cast %506 : vector<1x16xf32> to vector<1x1x16xf32>
    %508 = vector.broadcast %505 : vector<4x16x1xf32> to vector<4x16x16xf32>
    %509 = vector.broadcast %507 : vector<1x1x16xf32> to vector<4x16x16xf32>
    %510 = arith.mulf %508, %509 : vector<4x16x16xf32>
    %511 = arith.addf %498, %510 : vector<4x16x16xf32>
    %512 = vector.extract_strided_slice %2 {offsets = [2, 0, 0], sizes = [1, 16, 16], strides = [1, 1, 1]} : vector<9x16x16xf32> to vector<1x16x16xf32>
    %513 = vector.shape_cast %512 : vector<1x16x16xf32> to vector<16x16xf32>
    %514 = vector.shape_cast %513 : vector<16x16xf32> to vector<1x16x16xf32>
    %515 = vector.broadcast %514 : vector<1x16x16xf32> to vector<4x16x16xf32>
    %516 = arith.mulf %486, %515 : vector<4x16x16xf32>
    %cst_78 = arith.constant dense<0.000000e+00> : vector<4x16xf32>
    %517 = vector.multi_reduction <add>, %516, %cst_78 [2] : vector<4x16x16xf32> to vector<4x16xf32>
    %518 = vector.shape_cast %517 : vector<4x16xf32> to vector<4x16x1xf32>
    %519 = vector.extract_strided_slice %366 {offsets = [2, 0], sizes = [1, 16], strides = [1, 1]} : vector<9x16xf32> to vector<1x16xf32>
    %520 = vector.shape_cast %519 : vector<1x16xf32> to vector<1x1x16xf32>
    %521 = vector.broadcast %518 : vector<4x16x1xf32> to vector<4x16x16xf32>
    %522 = vector.broadcast %520 : vector<1x1x16xf32> to vector<4x16x16xf32>
    %523 = arith.mulf %521, %522 : vector<4x16x16xf32>
    %524 = arith.addf %511, %523 : vector<4x16x16xf32>
    %525 = vector.extract_strided_slice %2 {offsets = [3, 0, 0], sizes = [1, 16, 16], strides = [1, 1, 1]} : vector<9x16x16xf32> to vector<1x16x16xf32>
    %526 = vector.shape_cast %525 : vector<1x16x16xf32> to vector<16x16xf32>
    %527 = vector.shape_cast %526 : vector<16x16xf32> to vector<1x16x16xf32>
    %528 = vector.broadcast %527 : vector<1x16x16xf32> to vector<4x16x16xf32>
    %529 = arith.mulf %486, %528 : vector<4x16x16xf32>
    %cst_79 = arith.constant dense<0.000000e+00> : vector<4x16xf32>
    %530 = vector.multi_reduction <add>, %529, %cst_79 [2] : vector<4x16x16xf32> to vector<4x16xf32>
    %531 = vector.shape_cast %530 : vector<4x16xf32> to vector<4x16x1xf32>
    %532 = vector.extract_strided_slice %366 {offsets = [3, 0], sizes = [1, 16], strides = [1, 1]} : vector<9x16xf32> to vector<1x16xf32>
    %533 = vector.shape_cast %532 : vector<1x16xf32> to vector<1x1x16xf32>
    %534 = vector.broadcast %531 : vector<4x16x1xf32> to vector<4x16x16xf32>
    %535 = vector.broadcast %533 : vector<1x1x16xf32> to vector<4x16x16xf32>
    %536 = arith.mulf %534, %535 : vector<4x16x16xf32>
    %537 = arith.addf %524, %536 : vector<4x16x16xf32>
    %538 = vector.extract_strided_slice %2 {offsets = [4, 0, 0], sizes = [1, 16, 16], strides = [1, 1, 1]} : vector<9x16x16xf32> to vector<1x16x16xf32>
    %539 = vector.shape_cast %538 : vector<1x16x16xf32> to vector<16x16xf32>
    %540 = vector.shape_cast %539 : vector<16x16xf32> to vector<1x16x16xf32>
    %541 = vector.broadcast %540 : vector<1x16x16xf32> to vector<4x16x16xf32>
    %542 = arith.mulf %486, %541 : vector<4x16x16xf32>
    %cst_80 = arith.constant dense<0.000000e+00> : vector<4x16xf32>
    %543 = vector.multi_reduction <add>, %542, %cst_80 [2] : vector<4x16x16xf32> to vector<4x16xf32>
    %544 = vector.shape_cast %543 : vector<4x16xf32> to vector<4x16x1xf32>
    %545 = vector.extract_strided_slice %366 {offsets = [4, 0], sizes = [1, 16], strides = [1, 1]} : vector<9x16xf32> to vector<1x16xf32>
    %546 = vector.shape_cast %545 : vector<1x16xf32> to vector<1x1x16xf32>
    %547 = vector.broadcast %544 : vector<4x16x1xf32> to vector<4x16x16xf32>
    %548 = vector.broadcast %546 : vector<1x1x16xf32> to vector<4x16x16xf32>
    %549 = arith.mulf %547, %548 : vector<4x16x16xf32>
    %550 = arith.addf %537, %549 : vector<4x16x16xf32>
    %551 = vector.extract_strided_slice %2 {offsets = [5, 0, 0], sizes = [1, 16, 16], strides = [1, 1, 1]} : vector<9x16x16xf32> to vector<1x16x16xf32>
    %552 = vector.shape_cast %551 : vector<1x16x16xf32> to vector<16x16xf32>
    %553 = vector.shape_cast %552 : vector<16x16xf32> to vector<1x16x16xf32>
    %554 = vector.broadcast %553 : vector<1x16x16xf32> to vector<4x16x16xf32>
    %555 = arith.mulf %486, %554 : vector<4x16x16xf32>
    %cst_81 = arith.constant dense<0.000000e+00> : vector<4x16xf32>
    %556 = vector.multi_reduction <add>, %555, %cst_81 [2] : vector<4x16x16xf32> to vector<4x16xf32>
    %557 = vector.shape_cast %556 : vector<4x16xf32> to vector<4x16x1xf32>
    %558 = vector.extract_strided_slice %366 {offsets = [5, 0], sizes = [1, 16], strides = [1, 1]} : vector<9x16xf32> to vector<1x16xf32>
    %559 = vector.shape_cast %558 : vector<1x16xf32> to vector<1x1x16xf32>
    %560 = vector.broadcast %557 : vector<4x16x1xf32> to vector<4x16x16xf32>
    %561 = vector.broadcast %559 : vector<1x1x16xf32> to vector<4x16x16xf32>
    %562 = arith.mulf %560, %561 : vector<4x16x16xf32>
    %563 = arith.addf %550, %562 : vector<4x16x16xf32>
    %564 = vector.extract_strided_slice %2 {offsets = [6, 0, 0], sizes = [1, 16, 16], strides = [1, 1, 1]} : vector<9x16x16xf32> to vector<1x16x16xf32>
    %565 = vector.shape_cast %564 : vector<1x16x16xf32> to vector<16x16xf32>
    %566 = vector.shape_cast %565 : vector<16x16xf32> to vector<1x16x16xf32>
    %567 = vector.broadcast %566 : vector<1x16x16xf32> to vector<4x16x16xf32>
    %568 = arith.mulf %486, %567 : vector<4x16x16xf32>
    %cst_82 = arith.constant dense<0.000000e+00> : vector<4x16xf32>
    %569 = vector.multi_reduction <add>, %568, %cst_82 [2] : vector<4x16x16xf32> to vector<4x16xf32>
    %570 = vector.shape_cast %569 : vector<4x16xf32> to vector<4x16x1xf32>
    %571 = vector.extract_strided_slice %366 {offsets = [6, 0], sizes = [1, 16], strides = [1, 1]} : vector<9x16xf32> to vector<1x16xf32>
    %572 = vector.shape_cast %571 : vector<1x16xf32> to vector<1x1x16xf32>
    %573 = vector.broadcast %570 : vector<4x16x1xf32> to vector<4x16x16xf32>
    %574 = vector.broadcast %572 : vector<1x1x16xf32> to vector<4x16x16xf32>
    %575 = arith.mulf %573, %574 : vector<4x16x16xf32>
    %576 = arith.addf %563, %575 : vector<4x16x16xf32>
    %577 = vector.extract_strided_slice %2 {offsets = [7, 0, 0], sizes = [1, 16, 16], strides = [1, 1, 1]} : vector<9x16x16xf32> to vector<1x16x16xf32>
    %578 = vector.shape_cast %577 : vector<1x16x16xf32> to vector<16x16xf32>
    %579 = vector.shape_cast %578 : vector<16x16xf32> to vector<1x16x16xf32>
    %580 = vector.broadcast %579 : vector<1x16x16xf32> to vector<4x16x16xf32>
    %581 = arith.mulf %486, %580 : vector<4x16x16xf32>
    %cst_83 = arith.constant dense<0.000000e+00> : vector<4x16xf32>
    %582 = vector.multi_reduction <add>, %581, %cst_83 [2] : vector<4x16x16xf32> to vector<4x16xf32>
    %583 = vector.shape_cast %582 : vector<4x16xf32> to vector<4x16x1xf32>
    %584 = vector.extract_strided_slice %366 {offsets = [7, 0], sizes = [1, 16], strides = [1, 1]} : vector<9x16xf32> to vector<1x16xf32>
    %585 = vector.shape_cast %584 : vector<1x16xf32> to vector<1x1x16xf32>
    %586 = vector.broadcast %583 : vector<4x16x1xf32> to vector<4x16x16xf32>
    %587 = vector.broadcast %585 : vector<1x1x16xf32> to vector<4x16x16xf32>
    %588 = arith.mulf %586, %587 : vector<4x16x16xf32>
    %589 = arith.addf %576, %588 : vector<4x16x16xf32>
    %590 = vector.extract_strided_slice %2 {offsets = [8, 0, 0], sizes = [1, 16, 16], strides = [1, 1, 1]} : vector<9x16x16xf32> to vector<1x16x16xf32>
    %591 = vector.shape_cast %590 : vector<1x16x16xf32> to vector<16x16xf32>
    %592 = vector.shape_cast %591 : vector<16x16xf32> to vector<1x16x16xf32>
    %593 = vector.broadcast %592 : vector<1x16x16xf32> to vector<4x16x16xf32>
    %594 = arith.mulf %486, %593 : vector<4x16x16xf32>
    %cst_84 = arith.constant dense<0.000000e+00> : vector<4x16xf32>
    %595 = vector.multi_reduction <add>, %594, %cst_84 [2] : vector<4x16x16xf32> to vector<4x16xf32>
    %596 = vector.shape_cast %595 : vector<4x16xf32> to vector<4x16x1xf32>
    %597 = vector.extract_strided_slice %366 {offsets = [8, 0], sizes = [1, 16], strides = [1, 1]} : vector<9x16xf32> to vector<1x16xf32>
    %598 = vector.shape_cast %597 : vector<1x16xf32> to vector<1x1x16xf32>
    %599 = vector.broadcast %596 : vector<4x16x1xf32> to vector<4x16x16xf32>
    %600 = vector.broadcast %598 : vector<1x1x16xf32> to vector<4x16x16xf32>
    %601 = arith.mulf %599, %600 : vector<4x16x16xf32>
    %602 = arith.addf %589, %601 : vector<4x16x16xf32>
    %c1_85 = arith.constant 1 : index
    %c0_86 = arith.constant 0 : index
    %c0_87 = arith.constant 0 : index
    %603 = vector.load %arg5[%c1_85, %c0_86, %c0_87] : memref<2x32x32xf32, #tpu.memory_space<vmem>>, vector<1x32x32xf32>
    %604 = vector.shape_cast %603 : vector<1x32x32xf32> to vector<32x32xf32>
    %605 = vector.extract_strided_slice %486 {offsets = [0, 0, 0], sizes = [1, 16, 16], strides = [1, 1, 1]} : vector<4x16x16xf32> to vector<1x16x16xf32>
    %606 = vector.shape_cast %605 : vector<1x16x16xf32> to vector<16x16xf32>
    %cst_88 = arith.constant dense<0.000000e+00> : vector<16x16xf32>
    %607 = tpu.matmul %606, %374, %cst_88 {dimension_numbers = #tpu.dot_dimension_numbers<[1], [0], [0], [1], [0, 0, 1, 1], [], []>} : vector<16x16xf32>, vector<16x16xf32>, vector<16x16xf32> -> vector<16x16xf32>
    %608 = vector.extract_strided_slice %602 {offsets = [0, 0, 0], sizes = [1, 16, 16], strides = [1, 1, 1]} : vector<4x16x16xf32> to vector<1x16x16xf32>
    %609 = vector.shape_cast %608 : vector<1x16x16xf32> to vector<16x16xf32>
    %610 = arith.addf %607, %609 : vector<16x16xf32>
    %611 = vector.extract_strided_slice %604 {offsets = [0, 0], sizes = [16, 32], strides = [1, 1]} : vector<32x32xf32> to vector<16x32xf32>
    %cst_89 = arith.constant dense<0.000000e+00> : vector<16x32xf32>
    %612 = tpu.matmul %610, %611, %cst_89 {dimension_numbers = #tpu.dot_dimension_numbers<[1], [0], [0], [1], [0, 0, 1, 1], [], []>} : vector<16x16xf32>, vector<16x32xf32>, vector<16x32xf32> -> vector<16x32xf32>
    %613 = vector.extract_strided_slice %486 {offsets = [1, 0, 0], sizes = [1, 16, 16], strides = [1, 1, 1]} : vector<4x16x16xf32> to vector<1x16x16xf32>
    %614 = vector.shape_cast %613 : vector<1x16x16xf32> to vector<16x16xf32>
    %cst_90 = arith.constant dense<0.000000e+00> : vector<16x16xf32>
    %615 = tpu.matmul %614, %379, %cst_90 {dimension_numbers = #tpu.dot_dimension_numbers<[1], [0], [0], [1], [0, 0, 1, 1], [], []>} : vector<16x16xf32>, vector<16x16xf32>, vector<16x16xf32> -> vector<16x16xf32>
    %616 = vector.extract_strided_slice %602 {offsets = [1, 0, 0], sizes = [1, 16, 16], strides = [1, 1, 1]} : vector<4x16x16xf32> to vector<1x16x16xf32>
    %617 = vector.shape_cast %616 : vector<1x16x16xf32> to vector<16x16xf32>
    %618 = arith.addf %615, %617 : vector<16x16xf32>
    %619 = vector.extract_strided_slice %604 {offsets = [16, 0], sizes = [16, 32], strides = [1, 1]} : vector<32x32xf32> to vector<16x32xf32>
    %cst_91 = arith.constant dense<0.000000e+00> : vector<16x32xf32>
    %620 = tpu.matmul %618, %619, %cst_91 {dimension_numbers = #tpu.dot_dimension_numbers<[1], [0], [0], [1], [0, 0, 1, 1], [], []>} : vector<16x16xf32>, vector<16x32xf32>, vector<16x32xf32> -> vector<16x32xf32>
    %621 = arith.addf %612, %620 : vector<16x32xf32>
    %622 = vector.extract_strided_slice %486 {offsets = [2, 0, 0], sizes = [1, 16, 16], strides = [1, 1, 1]} : vector<4x16x16xf32> to vector<1x16x16xf32>
    %623 = vector.shape_cast %622 : vector<1x16x16xf32> to vector<16x16xf32>
    %cst_92 = arith.constant dense<0.000000e+00> : vector<16x16xf32>
    %624 = tpu.matmul %623, %384, %cst_92 {dimension_numbers = #tpu.dot_dimension_numbers<[1], [0], [0], [1], [0, 0, 1, 1], [], []>} : vector<16x16xf32>, vector<16x16xf32>, vector<16x16xf32> -> vector<16x16xf32>
    %625 = vector.extract_strided_slice %602 {offsets = [2, 0, 0], sizes = [1, 16, 16], strides = [1, 1, 1]} : vector<4x16x16xf32> to vector<1x16x16xf32>
    %626 = vector.shape_cast %625 : vector<1x16x16xf32> to vector<16x16xf32>
    %627 = arith.addf %624, %626 : vector<16x16xf32>
    %628 = vector.extract_strided_slice %604 {offsets = [0, 0], sizes = [16, 32], strides = [1, 1]} : vector<32x32xf32> to vector<16x32xf32>
    %cst_93 = arith.constant dense<0.000000e+00> : vector<16x32xf32>
    %629 = tpu.matmul %627, %628, %cst_93 {dimension_numbers = #tpu.dot_dimension_numbers<[1], [0], [0], [1], [0, 0, 1, 1], [], []>} : vector<16x16xf32>, vector<16x32xf32>, vector<16x32xf32> -> vector<16x32xf32>
    %630 = vector.extract_strided_slice %486 {offsets = [3, 0, 0], sizes = [1, 16, 16], strides = [1, 1, 1]} : vector<4x16x16xf32> to vector<1x16x16xf32>
    %631 = vector.shape_cast %630 : vector<1x16x16xf32> to vector<16x16xf32>
    %cst_94 = arith.constant dense<0.000000e+00> : vector<16x16xf32>
    %632 = tpu.matmul %631, %389, %cst_94 {dimension_numbers = #tpu.dot_dimension_numbers<[1], [0], [0], [1], [0, 0, 1, 1], [], []>} : vector<16x16xf32>, vector<16x16xf32>, vector<16x16xf32> -> vector<16x16xf32>
    %633 = vector.extract_strided_slice %602 {offsets = [3, 0, 0], sizes = [1, 16, 16], strides = [1, 1, 1]} : vector<4x16x16xf32> to vector<1x16x16xf32>
    %634 = vector.shape_cast %633 : vector<1x16x16xf32> to vector<16x16xf32>
    %635 = arith.addf %632, %634 : vector<16x16xf32>
    %636 = vector.extract_strided_slice %604 {offsets = [16, 0], sizes = [16, 32], strides = [1, 1]} : vector<32x32xf32> to vector<16x32xf32>
    %cst_95 = arith.constant dense<0.000000e+00> : vector<16x32xf32>
    %637 = tpu.matmul %635, %636, %cst_95 {dimension_numbers = #tpu.dot_dimension_numbers<[1], [0], [0], [1], [0, 0, 1, 1], [], []>} : vector<16x16xf32>, vector<16x32xf32>, vector<16x32xf32> -> vector<16x32xf32>
    %638 = arith.addf %629, %637 : vector<16x32xf32>
    %639 = tpu.concatenate %621, %638 in 0 : vector<16x32xf32>, vector<16x32xf32> -> vector<32x32xf32>
    %640 = vector.broadcast %359 : vector<1x32xf32> to vector<32x32xf32>
    %641 = arith.addf %639, %640 : vector<32x32xf32>
    %642 = arith.addf %355, %641 : vector<32x32xf32>
    %cst_96 = arith.constant dense<0.000000e+00> : vector<32xf32>
    %643 = vector.multi_reduction <add>, %642, %cst_96 [1] : vector<32x32xf32> to vector<32xf32>
    %644 = vector.shape_cast %643 : vector<32xf32> to vector<32x1xf32>
    %cst_97 = arith.constant 3.200000e+01 : f32
    %645 = vector.broadcast %cst_97 : f32 to vector<32x1xf32>
    %646 = arith.divf %644, %645 : vector<32x1xf32>
    %647 = vector.broadcast %646 : vector<32x1xf32> to vector<32x32xf32>
    %648 = arith.subf %642, %647 : vector<32x32xf32>
    %649 = arith.mulf %648, %648 : vector<32x32xf32>
    %cst_98 = arith.constant dense<0.000000e+00> : vector<32xf32>
    %650 = vector.multi_reduction <add>, %649, %cst_98 [1] : vector<32x32xf32> to vector<32xf32>
    %651 = vector.shape_cast %650 : vector<32xf32> to vector<32x1xf32>
    %cst_99 = arith.constant 3.200000e+01 : f32
    %652 = vector.broadcast %cst_99 : f32 to vector<32x1xf32>
    %653 = arith.divf %651, %652 : vector<32x1xf32>
    %654 = vector.broadcast %646 : vector<32x1xf32> to vector<32x32xf32>
    %655 = arith.subf %642, %654 : vector<32x32xf32>
    %cst_100 = arith.constant 9.99999974E-6 : f32
    %656 = vector.broadcast %cst_100 : f32 to vector<32x1xf32>
    %657 = arith.addf %653, %656 : vector<32x1xf32>
    %658 = math.rsqrt %657 : vector<32x1xf32>
    %659 = vector.broadcast %658 : vector<32x1xf32> to vector<32x32xf32>
    %660 = arith.mulf %655, %659 : vector<32x32xf32>
    %661 = vector.broadcast %360 : vector<1x32xf32> to vector<32x32xf32>
    %662 = arith.mulf %660, %661 : vector<32x32xf32>
    %663 = vector.broadcast %361 : vector<1x32xf32> to vector<32x32xf32>
    %664 = arith.addf %662, %663 : vector<32x32xf32>
    %665 = vector.broadcast %0 : vector<32x1xf32> to vector<32x32xf32>
    %666 = arith.mulf %664, %665 : vector<32x32xf32>
    %c1_101 = arith.constant 1 : index
    %c0_102 = arith.constant 0 : index
    %c0_103 = arith.constant 0 : index
    %667 = vector.load %arg6[%c1_101, %c0_102, %c0_103] : memref<2x32x64xf32, #tpu.memory_space<vmem>>, vector<1x32x64xf32>
    %668 = vector.shape_cast %667 : vector<1x32x64xf32> to vector<32x64xf32>
    %cst_104 = arith.constant dense<0.000000e+00> : vector<32x64xf32>
    %669 = tpu.matmul %666, %668, %cst_104 {dimension_numbers = #tpu.dot_dimension_numbers<[1], [0], [0], [1], [0, 0, 1, 1], [], []>} : vector<32x32xf32>, vector<32x64xf32>, vector<32x64xf32> -> vector<32x64xf32>
    %670 = vector.broadcast %362 : vector<1x64xf32> to vector<32x64xf32>
    %671 = arith.addf %669, %670 : vector<32x64xf32>
    %cst_105 = arith.constant 0.000000e+00 : f32
    %672 = vector.broadcast %cst_105 : f32 to vector<32x64xf32>
    %673 = arith.maximumf %671, %672 : vector<32x64xf32>
    %674 = vector.broadcast %0 : vector<32x1xf32> to vector<32x64xf32>
    %675 = arith.mulf %673, %674 : vector<32x64xf32>
    %c1_106 = arith.constant 1 : index
    %c0_107 = arith.constant 0 : index
    %c0_108 = arith.constant 0 : index
    %676 = vector.load %arg7[%c1_106, %c0_107, %c0_108] : memref<2x64x32xf32, #tpu.memory_space<vmem>>, vector<1x64x32xf32>
    %677 = vector.shape_cast %676 : vector<1x64x32xf32> to vector<64x32xf32>
    %cst_109 = arith.constant dense<0.000000e+00> : vector<32x32xf32>
    %678 = tpu.matmul %675, %677, %cst_109 {dimension_numbers = #tpu.dot_dimension_numbers<[1], [0], [0], [1], [0, 0, 1, 1], [], []>} : vector<32x64xf32>, vector<64x32xf32>, vector<32x32xf32> -> vector<32x32xf32>
    %679 = vector.broadcast %363 : vector<1x32xf32> to vector<32x32xf32>
    %680 = arith.addf %678, %679 : vector<32x32xf32>
    %681 = vector.broadcast %0 : vector<32x1xf32> to vector<32x32xf32>
    %682 = arith.mulf %680, %681 : vector<32x32xf32>
    %683 = arith.addf %664, %682 : vector<32x32xf32>
    %cst_110 = arith.constant dense<0.000000e+00> : vector<32xf32>
    %684 = vector.multi_reduction <add>, %683, %cst_110 [1] : vector<32x32xf32> to vector<32xf32>
    %685 = vector.shape_cast %684 : vector<32xf32> to vector<32x1xf32>
    %cst_111 = arith.constant 3.200000e+01 : f32
    %686 = vector.broadcast %cst_111 : f32 to vector<32x1xf32>
    %687 = arith.divf %685, %686 : vector<32x1xf32>
    %688 = vector.broadcast %687 : vector<32x1xf32> to vector<32x32xf32>
    %689 = arith.subf %683, %688 : vector<32x32xf32>
    %690 = arith.mulf %689, %689 : vector<32x32xf32>
    %cst_112 = arith.constant dense<0.000000e+00> : vector<32xf32>
    %691 = vector.multi_reduction <add>, %690, %cst_112 [1] : vector<32x32xf32> to vector<32xf32>
    %692 = vector.shape_cast %691 : vector<32xf32> to vector<32x1xf32>
    %cst_113 = arith.constant 3.200000e+01 : f32
    %693 = vector.broadcast %cst_113 : f32 to vector<32x1xf32>
    %694 = arith.divf %692, %693 : vector<32x1xf32>
    %695 = vector.broadcast %687 : vector<32x1xf32> to vector<32x32xf32>
    %696 = arith.subf %683, %695 : vector<32x32xf32>
    %cst_114 = arith.constant 9.99999974E-6 : f32
    %697 = vector.broadcast %cst_114 : f32 to vector<32x1xf32>
    %698 = arith.addf %694, %697 : vector<32x1xf32>
    %699 = math.rsqrt %698 : vector<32x1xf32>
    %700 = vector.broadcast %699 : vector<32x1xf32> to vector<32x32xf32>
    %701 = arith.mulf %696, %700 : vector<32x32xf32>
    %702 = vector.broadcast %364 : vector<1x32xf32> to vector<32x32xf32>
    %703 = arith.mulf %701, %702 : vector<32x32xf32>
    %704 = vector.broadcast %365 : vector<1x32xf32> to vector<32x32xf32>
    %705 = arith.addf %703, %704 : vector<32x32xf32>
    %706 = vector.broadcast %0 : vector<32x1xf32> to vector<32x32xf32>
    %707 = arith.mulf %705, %706 : vector<32x32xf32>
    %c0_115 = arith.constant 0 : index
    %c0_116 = arith.constant 0 : index
    %708 = vector.load %arg9[%c0_115, %c0_116] : memref<32x32xf32, #tpu.memory_space<vmem>>, vector<32x32xf32>
    tpu.vector_store %arg9[%c0_115, %c0_116], %707 {strides = array<i32>} : memref<32x32xf32, #tpu.memory_space<vmem>>, vector<32x32xf32>,
    return
  }
}

</mosaic_0001>

<bundles_post_ra>
// kernel: tpu_custom_call.1
= control target key start
LH: loop header
LB: loop body
LE: loop exit
PB: predicated region body
PF: predicated region fallthrough
CT: control target
= control target key end

     0   :  { %14 = vsyncpa [#allocation3], 0  ;;  %s8823_s0 = inlined_call_operand.hbm [shape: f32[32,32], index: 0, kind: input, shape index: {}]   ;;  %s8824_s1 = inlined_call_operand.vmem [shape: f32[32,1], index: 1, kind: input, shape index: {}]   ;;  %s8825_s2 = inlined_call_operand.vmem [shape: f32[4,16,16], index: 2, kind: input, shape index: {}]   ;;  %s8826_s3 = inlined_call_operand.vmem [shape: f32[9,16,16], index: 3, kind: input, shape index: {}]   ;;  %s8827_s4 = inlined_call_operand.vmem [shape: f32[2,32,114], index: 4, kind: input, shape index: {}]   ;;  %s8828_s5 = inlined_call_operand.hbm [shape: f32[2,32,32], index: 5, kind: input, shape index: {}]   ;;  %s8829_s6 = inlined_call_operand.hbm [shape: f32[2,32,64], index: 6, kind: input, shape index: {}]   ;;  %s8830_s7 = inlined_call_operand.vmem [shape: f32[2,64,32], index: 7, kind: input, shape index: {}]   ;;  %s8831_s8 = inlined_call_operand.vmem [shape: f32[2,17,128], index: 8, kind: input, shape index: {}]   ;;  %s8832_s9 = inlined_call_operand.hbm [shape: f32[32,32], index: 9, kind: output, shape index: {}]  }
   0x1   :  { %15 = vsyncpa [#allocation6], 0 }
   0x2   :  { %16 = vsyncpa [#allocation4], 0  ;;  %s6120_s30 = smov [#allocation5]   ;;  %s6121_s11 = smov [#allocation2]  }
   0x3   :  { %s42_s10 = sshll.u32 %s6120_s30, 4  ;;  %s22_s12 = sshll.u32 %s6121_s11, 4  ;;  %s43_s10 = int_to_ptr.vmem [resolvable:$true] %s42_s10  ;;  %s23_s12 = int_to_ptr.vmem [resolvable:$true] %s22_s12 }
   0x4   :  { %s6042_s13 = scalar_lea.vmem %s43_s10, 1024  ;;  %p6047_p1 = scmp.lt.s32.totalorder %s43_s10, %s43_s10 }
   0x5   :  { %p6043_p0 = scmp.ne.s32.totalorder %s43_s10, %s6042_s13  ;;  %p6048_p2 = scmp.lt.s32.totalorder %s6042_s13, %s6042_s13 }
   0x7   :  { %p6049_p3 = por %p6048_p2, %p6047_p1 }
   0x9   :  { %p6050_p4 = pnand %p6049_p3, %p6043_p0 }
   0xb   :  { %6053 = shalt.err (!%p6050_p4)
}
   0xc   :  { %s6122_s14 = smov 128   ;;  %s6123_s15 = smov 8  }
   0xd   :  { %48 = dma.hbm_to_vmem [thread:$0]  %s8828_s5, 1024, %s43_s10, [#allocation6], %s6122_s14, %s6122_s14, %s6123_s15  }
   0xe   :  { %s6062_s18 = scalar_lea.vmem %s23_s12, 512  ;;  %p6067_p6 = scmp.lt.s32.totalorder %s23_s12, %s23_s12 }
   0xf   :  { %p6063_p5 = scmp.ne.s32.totalorder %s23_s12, %s6062_s18  ;;  %p6068_p7 = scmp.lt.s32.totalorder %s6062_s18, %s6062_s18 }
  0x11   :  { %p6069_p8 = por %p6068_p7, %p6067_p6 }
  0x13   :  { %p6070_p9 = pnand %p6069_p8, %p6063_p5 }
  0x15   :  { %6073 = shalt.err (!%p6070_p9)
}
  0x16   :  { %28 = dma.hbm_to_vmem [thread:$0]  %s8823_s0, 512, %s23_s12, [#allocation3], %s6122_s14, %s6122_s14, %s6123_s15  }
  0x17   :  { %s6124_s21 = smov [#allocation7]  }
  0x18   :  { %s54_s22 = sshll.u32 %s6124_s21, 4  ;;  %s55_s22 = int_to_ptr.vmem [resolvable:$true] %s54_s22 }
  0x19   :  { %s6082_s23 = scalar_lea.vmem %s55_s22, 1024  ;;  %p6087_p11 = scmp.lt.s32.totalorder %s55_s22, %s55_s22 }
  0x1a   :  { %p6083_p10 = scmp.ne.s32.totalorder %s55_s22, %s6082_s23  ;;  %p6088_p12 = scmp.lt.s32.totalorder %s6082_s23, %s6082_s23 }
  0x1c   :  { %p6089_p13 = por %p6088_p12, %p6087_p11 }
  0x1e   :  { %p6090_p0 = pnand %p6089_p13, %p6083_p10 }
  0x20   :  { %6093 = shalt.err (!%p6090_p0)
}
  0x21   :  { %60 = dma.hbm_to_vmem [thread:$0]  %s8829_s6, 1024, %s55_s22, [#allocation6], %s6122_s14, %s6122_s14, %s6123_s15  }
  0x22   :  { %6114 = dma.done.wait [#allocation3], 512  }
  0x23   :  { %6115 = vsyncadd [#allocation3], 4294966784 }
  0x24   :  { %6116 = dma.done.wait [#allocation6], 2048  }
  0x25   :  { %6117 = vsyncadd [#allocation6], 4294965248  ;;  %v6125_v0 = vmov 0   ;;  %v74_v1 = vld [vmem:[%s8824_s1] sm:$0xff]  ;;  %v76_v2 = vld [vmem:[%s8824_s1 + $0x10] sm:$0xff]  ;;  %vm143_vm0 = vcmask 261120   ;;  %v139_v23 = vlaneseq }
  0x26   :  { %5766 = vset.pattern.permute.xlu0 %v6125_v0  ;;  %5767 = vset.pattern.permute.xlu1 %v6125_v0  ;;  %v138_v3 = vld [vmem:[%s8827_s4 + $0x18] sm:$0xff]  ;;  %v137_v4 = vld [vmem:[%s8827_s4 + $0x10] sm:$0xff]  ;;  %v75_v5 = vld [vmem:[%s8824_s1 + $0x8] sm:$0xff]  ;;  %v8847_v21 = vmov 102   ;;  %v8841_v22 = vmov 96   ;;  %vm247_vm1 = vcmask 130048  }
  0x27   :  { %110 = vperm.xlu0 %5766, %v74_v1   ;;  %120 = vperm.xlu1 %5767, %v76_v2   ;;  %v77_v6 = vld [vmem:[%s8824_s1 + $0x18] sm:$0xff]  ;;  %v136_v7 = vld [vmem:[%s8827_s4 + $0x8] sm:$0xff]  ;;  %v135_v8 = vld [vmem:[%s8827_s4] sm:$0xff]  ;;  %v6264_v24 = vshrl.u32 %v139_v23, 7  ;;  %s6128_s21 = smov 80   ;;  %s6129_s22 = smov 96  }
  0x28   :  { %5476 = vmatprep.subr.mxu0 %v138_v3  ;;  %v104_v9 = vld [vmem:[#allocation2] sm:$0xff]  ;;  %v106_v13 = vld [vmem:[#allocation2 + $0x10] sm:$0xff]  ;;  %v105_v14 = vld [vmem:[#allocation2 + $0x8] sm:$0xff]  ;;  %s6130_s23 = smov 112   ;;  %s6131_s5 = smov 119   ;;  %v8839_v32 = vmov 97  }
  0x29   :  { %5477 = vmatpush3.msra.mxu0 %v138_v3  ;;  %v107_v18 = vld [vmem:[#allocation2 + $0x18] sm:$0xff]  ;;  %8912 = vst [vmem:[#allocation20_spill] sm:$0xff] %v6264_v24  ;;  %v6267_v25 = vsub.s32 0, %v6264_v24  ;;  %v132_v26 = vld [vmem:[%s8831_s8] sm:$0xff]  ;;  %s6132_s24 = smov 64   ;;  %v8837_v33 = vmov 98  }
  0x2a   :  { %5478 = vmatprep.subr.mxu0 %v137_v4  ;;  %v8833_v34 = vmov 99   ;;  %v8835_v35 = vmov 100   ;;  %v8849_v36 = vmov 101   ;;  %v8843_v38 = vmov 104   ;;  %s6140_s0 = smov 48  }
  0x2b   :  { %115 = vperm.xlu0 %5766, %v75_v5   ;;  %125 = vperm.xlu1 %5767, %v77_v6   ;;  %8913 = vst [vmem:[#allocation21_spill] sm:$0xff] %v6267_v25  ;;  %v142_v27 = vrot.slane %v132_v26, %v6267_v25  ;;  %v8845_v40 = vmov 103   ;;  %vm2492_vm10 = vcmask 523264  }
  0x2c   :  { %5479 = vmatpush3.msra.mxu0 %v137_v4 }
  0x2d   :  { %5480 = vmatprep.subr.mxu0 %v136_v7 }
  0x2e   :  { %5481 = vmatpush3.msra.mxu0 %v136_v7 }
  0x2f   :  { %5482 = vmatprep.subr.mxu0 %v135_v8  ;;  %5774 = vset.pattern.permute.xlu0 %v8847_v21 }
  0x30   :  { %5483 = vmatpush3.msra.mxu0 %v135_v8  ;;  %5768 = vset.pattern.permute.xlu1 %v8841_v22 }
  0xa2   :  { %v6234_v10 = vpop.permute.xlu0 %110  ;;  %v6236_v11 = vpop.permute.xlu1 %120 }
  0xa3   :  { %8904 = vst [vmem:[#allocation12_spill] sm:$0xff] %v6234_v10  ;;  %8905 = vst [vmem:[#allocation13_spill] sm:$0xff] %v6236_v11  ;;  %v6239_v12 = vmul.f32 %v6234_v10, %v104_v9  ;;  %v6248_v17 = vmul.f32 %v6236_v11, %v106_v13 }
  0xa5   :  { %8906 = vst [vmem:[#allocation14_spill] sm:$0xff] %v6239_v12  ;;  %5484 = vmatprep.mubr.msk.f32.mxu0 %vm143_vm0, %v6239_v12  ;;  %8909 = vst [vmem:[#allocation17_spill] sm:$0xff] %v6248_v17 }
  0xa6   :  { %v6243_v15 = vpop.permute.xlu0 %115  ;;  %v6245_v16 = vpop.permute.xlu1 %125 }
  0xa7   :  { %8907 = vst [vmem:[#allocation15_spill] sm:$0xff] %v6243_v15  ;;  %8908 = vst [vmem:[#allocation16_spill] sm:$0xff] %v6245_v16  ;;  %v6251_v19 = vmul.f32 %v6243_v15, %v105_v14  ;;  %v6256_v20 = vmul.f32 %v6245_v16, %v107_v18  ;;  %v6545_v16 = vld [vmem:[%s8826_s3 + $0x20] sm:$0xff] }
  0xa9   :  { %8910 = vst [vmem:[#allocation18_spill] sm:$0xff] %v6251_v19  ;;  %5485 = vmatmul.mubr.msk.f32.vlgmr.msra.gmra.mxu0 %vm143_vm0, %v6251_v19  ;;  %8911 = vst [vmem:[#allocation19_spill] sm:$0xff] %v6256_v20 }
  0xaa   :  { %5487 = vmatprep.mubr.msk.f32.mxu0 %vm143_vm0, %v6248_v17 }
  0xad   :  { %5488 = vmatmul.mubr.msk.f32.gmra.mxu0 %vm143_vm0, %v6256_v20  ;;  %v6561_v20 = vld [vmem:[%s8826_s3 + $0x48] sm:$0xff] }
 0x169   :  { %v5486_v28 = vpop.f32.mrf.mxu0 }
 0x16a   :  { %v6273_v29 = vadd.f32 %v5486_v28, %v142_v27 }
 0x16b   :  { %v222_v30 = vpop.f32.mrf.mxu0 }
 0x16c   :  { %v6275_v31 = vadd.f32 %v222_v30, %v142_v27  ;;  %337 = vrot.lane.b32.xlu1 %v6273_v29, %s6128_s21  ;;  %245 = vrot.lane.b32.xlu0 %v6273_v29, %s6129_s22 }
 0x16d   :  { %v5489_v37 = vpop.f32.mrf.mxu0 }
 0x16e   :  { %5494 = vmatprep.mubr.msk.f32.mxu1 %vm247_vm1, %v6275_v31  ;;  %v6319_v39 = vadd.f32 %v5489_v37, %v142_v27 }
 0x16f   :  { %v232_v41 = vpop.f32.mrf.mxu0 }
 0x170   :  { %335 = vrot.lane.b32.xlu1 %v6275_v31, %s6128_s21  ;;  %243 = vrot.lane.b32.xlu0 %v6275_v31, %s6129_s22  ;;  %v6330_v42 = vadd.f32 %v232_v41, %v142_v27 }
 0x172   :  { %8914 = vst [vmem:[#allocation22_spill] sm:$0xff] %v6330_v42 }
 0x174   :  { %333 = vrot.lane.b32.xlu1 %v6273_v29, %s6130_s23  ;;  %331 = vrot.lane.b32.xlu0 %v6275_v31, %s6130_s23 }
 0x178   :  { %604 = vrot.lane.b32.xlu1 %v6273_v29, %s6131_s5  ;;  %903 = vperm.xlu0 %5774, %v6273_v29  }
 0x17c   :  { %615 = vperm.xlu1 %5768, %v6273_v29   ;;  %1612 = vrot.lane.b32.xlu0 %v6273_v29, %s6132_s24 }
 0x17d   :  { %5777 = vset.pattern.permute.xlu0 %v8841_v22 }
 0x180   :  { %5769 = vset.pattern.permute.xlu1 %v8839_v32  ;;  %602 = vrot.lane.b32.xlu0 %v6275_v31, %s6131_s5 }
 0x181   :  { %663 = vperm.xlu1 %5769, %v6273_v29  }
 0x184   :  { %611 = vperm.xlu0 %5777, %v6275_v31  }
 0x185   :  { %5770 = vset.pattern.permute.xlu1 %v8837_v33 }
 0x186   :  { %711 = vperm.xlu1 %5770, %v6273_v29  }
 0x188   :  { %5779 = vset.pattern.permute.xlu0 %v8837_v33 }
 0x189   :  { %707 = vperm.xlu0 %5779, %v6275_v31  }
 0x18a   :  { %5771 = vset.pattern.permute.xlu1 %v8833_v34 }
 0x18b   :  { %759 = vperm.xlu1 %5771, %v6273_v29  }
 0x18d   :  { %5781 = vset.pattern.permute.xlu0 %v8835_v35 }
 0x18e   :  { %803 = vperm.xlu0 %5781, %v6275_v31  }
 0x18f   :  { %5772 = vset.pattern.permute.xlu1 %v8835_v35 }
 0x190   :  { %807 = vperm.xlu1 %5772, %v6273_v29  }
 0x192   :  { %5783 = vset.pattern.permute.xlu0 %v8847_v21 }
 0x193   :  { %899 = vperm.xlu0 %5783, %v6275_v31  }
 0x194   :  { %5773 = vset.pattern.permute.xlu1 %v8849_v36 }
 0x195   :  { %855 = vperm.xlu1 %5773, %v6273_v29  }
 0x197   :  { %5785 = vset.pattern.permute.xlu0 %v8843_v38 }
 0x198   :  { %995 = vperm.xlu0 %5785, %v6275_v31  }
 0x199   :  { %5775 = vset.pattern.permute.xlu1 %v8845_v40 }
 0x19a   :  { %951 = vperm.xlu1 %5775, %v6273_v29  }
 0x19c   :  { %517 = vrot.lane.b32.xlu0 %v6319_v39, %s6128_s21 }
 0x19d   :  { %5786 = vset.pattern.permute.xlu0 %v8841_v22 }
 0x19e   :  { %5776 = vset.pattern.permute.xlu1 %v8843_v38 }
 0x19f   :  { %999 = vperm.xlu1 %5776, %v6273_v29  }
 0x1a0   :  { %513 = vrot.lane.b32.xlu0 %v6319_v39, %s6130_s23 }
 0x1a3   :  { %1699 = vrot.lane.b32.xlu1 %v6273_v29, %s6140_s0 }
 0x1a4   :  { %5778 = vset.pattern.permute.xlu1 %v8839_v32  ;;  %515 = vrot.lane.b32.xlu0 %v6330_v42, %s6128_s21 }
 0x1a7   :  { %659 = vperm.xlu1 %5778, %v6275_v31  }
 0x1a8   :  { %606 = vrot.lane.b32.xlu0 %v6330_v42, %s6131_s5 }
 0x1ab   :  { %5780 = vset.pattern.permute.xlu1 %v8833_v34 }
 0x1ac   :  { %755 = vperm.xlu1 %5780, %v6275_v31  }
 0x1b0   :  { %5782 = vset.pattern.permute.xlu1 %v8849_v36 }
 0x1b1   :  { %851 = vperm.xlu1 %5782, %v6275_v31  }
 0x1b5   :  { %5784 = vset.pattern.permute.xlu1 %v8845_v40 }
 0x1b6   :  { %947 = vperm.xlu1 %5784, %v6275_v31  }
 0x1ba   :  { %426 = vrot.lane.b32.xlu1 %v6319_v39, %s6129_s22 }
 0x1bb   :  { %5787 = vset.pattern.permute.xlu1 %v8839_v32 }
 0x1be   :  { %608 = vrot.lane.b32.xlu1 %v6319_v39, %s6131_s5 }
 0x1c2   :  { %424 = vrot.lane.b32.xlu1 %v6330_v42, %s6129_s22 }
 0x1c6   :  { %511 = vrot.lane.b32.xlu1 %v6330_v42, %s6130_s23 }
 0x1de   :  { %v338_v43 = vpop.permute.xlu1 %337  ;;  %v246_v44 = vpop.permute.xlu0 %245 }
 0x1df   :  { %5490 = vmatprep.subr.msk.mxu1 %vm247_vm1, %v246_v44  ;;  %5497 = vmatprep.subr.msk.mxu0 %vm247_vm1, %v338_v43 }
 0x1e0   :  { %5491 = vmatpush3.xpose.msk.msra.mxu1 %vm247_vm1, %v246_v44  ;;  %5498 = vmatpush3.xpose.msk.msra.mxu0 %vm247_vm1, %v338_v43 }
 0x1e2   :  { %v336_v45 = vpop.permute.xlu1 %335  ;;  %v244_v46 = vpop.permute.xlu0 %243 }
 0x1e3   :  { %5492 = vmatprep.subr.msk.mxu1 %vm247_vm1, %v244_v46  ;;  %5499 = vmatprep.subr.msk.mxu0 %vm247_vm1, %v336_v45 }
 0x1e4   :  { %5493 = vmatpush3.xpose.msk.msra.mxu1 %vm247_vm1, %v244_v46  ;;  %5500 = vmatpush3.xpose.msk.msra.mxu0 %vm247_vm1, %v336_v45 }
 0x1e6   :  { %v334_v47 = vpop.permute.xlu1 %333  ;;  %v332_v48 = vpop.permute.xlu0 %331 }
 0x1e7   :  { %5495 = vmatmul.mubr.msk.f32.vlgmr.msra.gmra.mxu1 %vm247_vm1, %v6273_v29  ;;  %5501 = vmatprep.mubr.msk.f32.mxu0 %vm247_vm1, %v332_v48 }
 0x1e8   :  { %5502 = vmatmul.mubr.msk.f32.vlgmr.msra.gmra.mxu0 %vm247_vm1, %v334_v47  ;;  %5508 = vmatprep.mubr.msk.f32.mxu1 %vm247_vm1, %v6330_v42 }
 0x1ea   :  { %v605_v49 = vpop.permute.xlu1 %604 }
 0x1eb   :  { %671 = vperm.xlu1 %5787, %v605_v49   ;;  %623 = vperm.xlu0 %5786, %v605_v49  }
 0x1ef   :  { %5789 = vset.pattern.permute.xlu1 %v8833_v34  ;;  %5788 = vset.pattern.permute.xlu0 %v8837_v33 }
 0x1f0   :  { %767 = vperm.xlu1 %5789, %v605_v49   ;;  %719 = vperm.xlu0 %5788, %v605_v49  }
 0x1f3   :  { %v6371_v50 = vpop.permute.xlu0 %903 }
 0x1f4   :  { %5791 = vset.pattern.permute.xlu1 %v8849_v36  ;;  %5790 = vset.pattern.permute.xlu0 %v8835_v35 }
 0x1f5   :  { %863 = vperm.xlu1 %5791, %v605_v49   ;;  %815 = vperm.xlu0 %5790, %v605_v49  }
 0x1f7   :  { %v6375_v51 = vpop.permute.xlu1 %615  ;;  %v6377_v52 = vpop.permute.xlu0 %1612 }
 0x1f9   :  { %5792 = vset.pattern.permute.xlu1 %v8847_v21  ;;  %5794 = vset.pattern.permute.xlu0 %v8843_v38 }
 0x1fa   :  { %911 = vperm.xlu1 %5792, %v605_v49   ;;  %1007 = vperm.xlu0 %5794, %v605_v49  }
 0x1fb   :  { %v603_v53 = vpop.permute.xlu0 %602 }
 0x1fc   :  { %v6381_v54 = vpop.permute.xlu1 %663 }
 0x1fe   :  { %5793 = vset.pattern.permute.xlu1 %v8845_v40  ;;  %5797 = vset.pattern.permute.xlu0 %v8833_v34 }
 0x1ff   :  { %959 = vperm.xlu1 %5793, %v605_v49   ;;  %763 = vperm.xlu0 %5797, %v603_v53   ;;  %v6385_v55 = vpop.permute.xlu0 %611 }
 0x201   :  { %v6387_v56 = vpop.permute.xlu1 %711 }
 0x203   :  { %5795 = vset.pattern.permute.xlu1 %v8841_v22  ;;  %5799 = vset.pattern.permute.xlu0 %v8849_v36 }
 0x204   :  { %859 = vperm.xlu0 %5799, %v603_v53   ;;  %619 = vperm.xlu1 %5795, %v603_v53   ;;  %v6391_v57 = vpop.permute.xlu0 %707 }
 0x206   :  { %v6393_v58 = vpop.permute.xlu1 %759 }
 0x208   :  { %5801 = vset.pattern.permute.xlu0 %v8845_v40  ;;  %5796 = vset.pattern.permute.xlu1 %v8837_v33 }
 0x209   :  { %955 = vperm.xlu0 %5801, %v603_v53   ;;  %715 = vperm.xlu1 %5796, %v603_v53   ;;  %v6397_v59 = vpop.permute.xlu0 %803 }
 0x20b   :  { %v6399_v60 = vpop.permute.xlu1 %807 }
 0x20d   :  { %1697 = vrot.lane.b32.xlu0 %v6275_v31, %s6140_s0  ;;  %5798 = vset.pattern.permute.xlu1 %v8835_v35 }
 0x20e   :  { %811 = vperm.xlu1 %5798, %v603_v53   ;;  %v6404_v61 = vpop.permute.xlu0 %899  ;;  %5806 = vset.pattern.permute.xlu0 %v8833_v34 }
 0x210   :  { %v6407_v62 = vpop.permute.xlu1 %855 }
 0x211   :  { %771 = vperm.xlu0 %5806, %v6330_v42  }
 0x212   :  { %5800 = vset.pattern.permute.xlu1 %v8847_v21 }
 0x213   :  { %907 = vperm.xlu1 %5800, %v603_v53   ;;  %v6411_v63 = vpop.permute.xlu0 %995 }
 0x215   :  { %v6413_v0 = vpop.permute.xlu1 %951  ;;  %5807 = vset.pattern.permute.xlu0 %v8839_v32 }
 0x216   :  { %667 = vperm.xlu0 %5807, %v603_v53  }
 0x217   :  { %5802 = vset.pattern.permute.xlu1 %v8843_v38  ;;  %v518_v1 = vpop.permute.xlu0 %517 }
 0x218   :  { %1003 = vperm.xlu1 %5802, %v603_v53   ;;  %5511 = vmatprep.subr.msk.mxu0 %vm247_vm1, %v518_v1 }
 0x219   :  { %5512 = vmatpush3.xpose.msk.msra.mxu0 %vm247_vm1, %v518_v1 }
 0x21a   :  { %v6419_v2 = vpop.permute.xlu1 %999  ;;  %675 = vperm.xlu0 %5807, %v6330_v42  }
 0x21b   :  { %v514_v3 = vpop.permute.xlu0 %513 }
 0x21c   :  { %1610 = vrot.lane.b32.xlu1 %v6275_v31, %s6132_s24 }
 0x21d   :  { %5803 = vset.pattern.permute.xlu1 %v8841_v22 }
 0x21e   :  { %v1700_v4 = vpop.permute.xlu1 %1699 }
 0x21f   :  { %v516_v5 = vpop.permute.xlu0 %515 }
 0x220   :  { %627 = vperm.xlu1 %5803, %v6330_v42   ;;  %5513 = vmatprep.subr.msk.mxu0 %vm247_vm1, %v516_v5 }
 0x221   :  { %5514 = vmatpush3.xpose.msk.msra.mxu0 %vm247_vm1, %v516_v5 }
 0x222   :  { %v6428_v6 = vpop.permute.xlu1 %659  ;;  %5518 = vmatprep.subr.mxu0 %v6377_v52 }
 0x223   :  { %v6461_v26 = vpop.permute.xlu0 %606 }
 0x224   :  { %631 = vperm.xlu1 %5803, %v6319_v39  }
 0x227   :  { %v6432_v7 = vpop.permute.xlu1 %755 }
 0x228   :  { %5804 = vset.pattern.permute.xlu1 %v8839_v32 }
 0x229   :  { %679 = vperm.xlu1 %5804, %v6319_v39  }
 0x22c   :  { %v6436_v8 = vpop.permute.xlu1 %851 }
 0x22d   :  { %5805 = vset.pattern.permute.xlu1 %v8837_v33 }
 0x22e   :  { %723 = vperm.xlu1 %5805, %v6330_v42  }
 0x231   :  { %v6440_v9 = vpop.permute.xlu1 %947 }
 0x232   :  { %727 = vperm.xlu1 %5805, %v6319_v39  }
 0x235   :  { %v427_v13 = vpop.permute.xlu1 %426 }
 0x236   :  { %5808 = vset.pattern.permute.xlu1 %v8833_v34  ;;  %5504 = vmatprep.subr.msk.mxu1 %vm247_vm1, %v427_v13 }
 0x237   :  { %775 = vperm.xlu1 %5808, %v6319_v39   ;;  %5505 = vmatpush3.xpose.msk.msra.mxu1 %vm247_vm1, %v427_v13  ;;  %v6506_v13 = vld [vmem:[%s8826_s3 + $0x8] sm:$0xff] }
 0x239   :  { %v6447_v14 = vpop.permute.xlu1 %608 }
 0x23a   :  { %687 = vperm.xlu0 %5807, %v6447_v14  }
 0x23b   :  { %5809 = vset.pattern.permute.xlu1 %v8835_v35 }
 0x23c   :  { %819 = vperm.xlu1 %5809, %v6330_v42  }
 0x23d   :  { %v425_v18 = vpop.permute.xlu1 %424 }
 0x23e   :  { %5506 = vmatprep.subr.msk.mxu1 %vm247_vm1, %v425_v18  ;;  %5812 = vset.pattern.permute.xlu0 %v8833_v34 }
 0x23f   :  { %5507 = vmatpush3.xpose.msk.msra.mxu1 %vm247_vm1, %v425_v18  ;;  %783 = vperm.xlu0 %5812, %v6447_v14   ;;  %v6511_v18 = vld [vmem:[%s8826_s3 + $0x18] sm:$0xff] }
 0x240   :  { %5525 = vmatprep.subr.mxu1 %v1700_v4  ;;  %5810 = vset.pattern.permute.xlu1 %v8841_v22 }
 0x241   :  { %v512_v23 = vpop.permute.xlu1 %511  ;;  %639 = vperm.xlu1 %5810, %v6447_v14  }
 0x242   :  { %5509 = vmatmul.mubr.msk.f32.vlgmr.msra.gmra.mxu1 %vm247_vm1, %v6319_v39  ;;  %5515 = vmatprep.mubr.msk.f32.mxu0 %vm247_vm1, %v512_v23  ;;  %v6516_v23 = vld [vmem:[%s8826_s3] sm:$0xff] }
 0x243   :  { %5516 = vmatmul.mubr.msk.f32.vlgmr.msra.gmra.mxu0 %vm247_vm1, %v514_v3  ;;  %5526 = vmatpush3.msra.mxu1 %v1700_v4  ;;  %v642_v38 = vmul.f32 %v6385_v55, %v6516_v23 }
 0x244   :  { %5519 = vmatpush3.msra.mxu0 %v6377_v52  ;;  %5813 = vset.pattern.permute.xlu0 %v8841_v22  ;;  %v691_v22 = vmul.f32 %v6381_v54, %v6511_v18 }
 0x245   :  { %5811 = vset.pattern.permute.xlu1 %v8837_v33  ;;  %635 = vperm.xlu0 %5813, %v6461_v26  }
 0x246   :  { %735 = vperm.xlu1 %5811, %v6447_v14  }
 0x249   :  { %5815 = vset.pattern.permute.xlu0 %v8837_v33 }
 0x24a   :  { %5814 = vset.pattern.permute.xlu1 %v8839_v32  ;;  %731 = vperm.xlu0 %5815, %v6461_v26  }
 0x24b   :  { %683 = vperm.xlu1 %5814, %v6461_v26  }
 0x24e   :  { %5817 = vset.pattern.permute.xlu0 %v8835_v35 }
 0x24f   :  { %5816 = vset.pattern.permute.xlu1 %v8833_v34  ;;  %827 = vperm.xlu0 %5817, %v6461_v26   ;;  %v6528_v34 = vld [vmem:[%s8826_s3 + $0x28] sm:$0xff] }
 0x250   :  { %779 = vperm.xlu1 %5816, %v6461_v26  }
 0x253   :  { %5819 = vset.pattern.permute.xlu0 %v8849_v36 }
 0x254   :  { %5818 = vset.pattern.permute.xlu1 %v8835_v35  ;;  %v6533_v35 = vld [vmem:[%s8826_s3 + $0x10] sm:$0xff] }
 0x266   :  { %v672_v27 = vpop.permute.xlu1 %671  ;;  %v624_v28 = vpop.permute.xlu0 %623 }
 0x267   :  { %v645_v33 = vmul.f32 %v624_v28, %v6506_v13  ;;  %v6550_v28 = vld [vmem:[%s8826_s3 + $0x38] sm:$0xff]  ;;  %v693_v54 = vmul.f32 %v672_v27, %v6511_v18  ;;  %v6566_v27 = vld [vmem:[%s8826_s3 + $0x30] sm:$0xff] }
 0x26b   :  { %v768_v29 = vpop.permute.xlu1 %767  ;;  %v720_v30 = vpop.permute.xlu0 %719 }
 0x270   :  { %v6479_v31 = vpop.permute.xlu1 %863  ;;  %v6481_v37 = vpop.permute.xlu0 %815 }
 0x275   :  { %v6483_v41 = vpop.permute.xlu1 %911  ;;  %v6485_v43 = vpop.permute.xlu0 %1007 }
 0x27a   :  { %v6487_v44 = vpop.permute.xlu1 %959  ;;  %v6489_v45 = vpop.permute.xlu0 %763 }
 0x27f   :  { %v620_v46 = vpop.permute.xlu1 %619  ;;  %v6491_v47 = vpop.permute.xlu0 %859 }
 0x280   :  { %v644_v55 = vmul.f32 %v620_v46, %v6516_v23 }
 0x284   :  { %v716_v48 = vpop.permute.xlu1 %715  ;;  %v6493_v49 = vpop.permute.xlu0 %955 }
 0x288   :  { %v1698_v52 = vpop.permute.xlu0 %1697 }
 0x289   :  { %v6495_v53 = vpop.permute.xlu1 %811  ;;  %5527 = vmatprep.subr.mxu1 %v1698_v52 }
 0x28a   :  { %5528 = vmatpush3.msra.mxu1 %v1698_v52  ;;  %v6521_v52 = vld [vmem:[%s8826_s3 + $0x68] sm:$0xff] }
 0x28b   :  { %v931_v36 = vmul.f32 %v6371_v50, %v6521_v52  ;;  %v690_v50 = vmul.f32 %v6428_v6, %v6533_v35 }
 0x28c   :  { %v6501_v5 = vpop.permute.xlu0 %771 }
 0x28e   :  { %v6497_v1 = vpop.permute.xlu1 %907 }
 0x293   :  { %v6499_v3 = vpop.permute.xlu1 %1003 }
 0x297   :  { %v1611_v4 = vpop.permute.xlu1 %1610 }
 0x298   :  { %5520 = vmatprep.subr.mxu0 %v1611_v4 }
 0x299   :  { %5521 = vmatpush3.msra.mxu0 %v1611_v4  ;;  %v643_v4 = vmul.f32 %v6375_v51, %v6506_v13  ;;  %v668_v51 = vpop.permute.xlu0 %667 }
 0x2a7   :  { %v5496_v32 = vpop.f32.mrf.mxu1 }
 0x2a8   :  { %v651_v40 = vadd.f32 %v5496_v32, %v643_v4  ;;  %v5503_v21 = vpop.f32.mrf.mxu0  ;;  %v739_v4 = vmul.f32 %v6387_v56, %v6528_v34 }
 0x2a9   :  { %v653_v11 = vadd.f32 %v5503_v21, %v645_v33  ;;  %v322_v32 = vpop.f32.mrf.mxu1  ;;  %v741_v21 = vmul.f32 %v720_v30, %v6528_v34  ;;  %v692_v33 = vmul.f32 %v668_v51, %v6533_v35  ;;  %v6582_v30 = vld [vmem:[%s8826_s3 + $0x58] sm:$0xff] }
 0x2aa   :  { %v699_v15 = vadd.f32 %v691_v22, %v651_v40  ;;  %v650_v10 = vadd.f32 %v642_v38, %v322_v32  ;;  %v413_v17 = vpop.f32.mrf.mxu0  ;;  %v738_v22 = vmul.f32 %v6391_v57, %v6545_v16  ;;  %v787_v38 = vmul.f32 %v6393_v58, %v6550_v28  ;;  %v6577_v32 = vld [vmem:[%s8826_s3 + $0x40] sm:$0xff] }
 0x2ab   :  { %v701_v56 = vadd.f32 %v693_v54, %v653_v11  ;;  %v652_v46 = vadd.f32 %v644_v55, %v413_v17  ;;  %v789_v11 = vmul.f32 %v768_v29, %v6550_v28  ;;  %v740_v17 = vmul.f32 %v716_v48, %v6545_v16  ;;  %v6593_v55 = vld [vmem:[%s8826_s3 + $0x60] sm:$0xff]  ;;  %v6598_v29 = vld [vmem:[%s8826_s3 + $0x50] sm:$0xff] }
 0x2ac   :  { %v747_v40 = vadd.f32 %v739_v4, %v699_v15  ;;  %v698_v6 = vadd.f32 %v690_v50, %v650_v10  ;;  %v835_v15 = vmul.f32 %v6399_v60, %v6561_v20  ;;  %v786_v10 = vmul.f32 %v6432_v7, %v6566_v27 }
 0x2ad   :  { %v749_v57 = vadd.f32 %v741_v21, %v701_v56  ;;  %v700_v51 = vadd.f32 %v692_v33, %v652_v46  ;;  %v837_v48 = vmul.f32 %v6481_v37, %v6561_v20  ;;  %v788_v60 = vmul.f32 %v6489_v45, %v6566_v27  ;;  %v6611_v46 = vld [vmem:[%s8826_s3 + $0x78] sm:$0xff]  ;;  %v6616_v37 = vld [vmem:[%s8826_s3 + $0x88] sm:$0xff] }
 0x2ae   :  { %v795_v58 = vadd.f32 %v787_v38, %v747_v40  ;;  %v746_v54 = vadd.f32 %v738_v22, %v698_v6  ;;  %v834_v50 = vmul.f32 %v6397_v59, %v6577_v32  ;;  %v883_v21 = vmul.f32 %v6407_v62, %v6582_v30 }
 0x2af   :  { %v797_v4 = vadd.f32 %v789_v11, %v749_v57  ;;  %v748_v7 = vadd.f32 %v740_v17, %v700_v51  ;;  %v885_v45 = vmul.f32 %v6479_v31, %v6582_v30  ;;  %v836_v59 = vmul.f32 %v6495_v53, %v6577_v32  ;;  %v6629_v17 = vld [vmem:[%s8826_s3 + $0x70] sm:$0xff] }
 0x2b0   :  { %v843_v33 = vadd.f32 %v835_v15, %v795_v58  ;;  %v794_v56 = vadd.f32 %v786_v10, %v746_v54  ;;  %v930_v38 = vmul.f32 %v6404_v61, %v6593_v55  ;;  %v882_v40 = vmul.f32 %v6436_v8, %v6598_v29  ;;  %v6638_v61 = vld [vmem:[%s8825_s2 + $0x8] sm:$0xff] }
 0x2b1   :  { %v845_v22 = vadd.f32 %v837_v48, %v797_v4  ;;  %v796_v62 = vadd.f32 %v788_v60, %v748_v7  ;;  %v933_v31 = vmul.f32 %v6483_v41, %v6521_v52  ;;  %v884_v53 = vmul.f32 %v6491_v47, %v6598_v29  ;;  %8915 = vst [vmem:[#allocation23_spill] sm:$0xff] %v6638_v61  ;;  %v6647_v41 = vld [vmem:[%s8826_s3 + $0x80] sm:$0xff] }
 0x2b2   :  { %v842_v6 = vadd.f32 %v834_v50, %v794_v56  ;;  %v891_v11 = vadd.f32 %v883_v21, %v843_v33  ;;  %v979_v51 = vmul.f32 %v6413_v0, %v6611_v46  ;;  %v1027_v15 = vmul.f32 %v6419_v2, %v6616_v37  ;;  %v6656_v0 = vld [vmem:[%s8825_s2 + $0x18] sm:$0xff]  ;;  %v6668_v50 = vld [vmem:[%s8825_s2 + $0x10] sm:$0xff] }
 0x2b3   :  { %v844_v57 = vadd.f32 %v836_v59, %v796_v62  ;;  %v893_v8 = vadd.f32 %v885_v45, %v845_v22  ;;  %v981_v47 = vmul.f32 %v6487_v44, %v6611_v46  ;;  %v932_v54 = vmul.f32 %v6497_v1, %v6593_v55  ;;  %8916 = vst [vmem:[#allocation24_spill] sm:$0xff] %v6656_v0 }
 0x2b4   :  { %v939_v10 = vadd.f32 %v931_v36, %v891_v11  ;;  %v890_v58 = vadd.f32 %v882_v40, %v842_v6  ;;  %v978_v36 = vmul.f32 %v6440_v9, %v6629_v17  ;;  %vm1043_vm2 = vcmp.gt.f32.partialorder %v6638_v61, 0.5  ;;  %8917 = vst [vmem:[#allocation25_spill] sm:$0xff] %v6668_v50  ;;  %v6673_v9 = vld [vmem:[%s8825_s2] sm:$0xff] }
 0x2b5   :  { %v941_v48 = vadd.f32 %v933_v31, %v893_v8  ;;  %v892_v2 = vadd.f32 %v884_v53, %v844_v57  ;;  %v1029_v44 = vmul.f32 %v6485_v43, %v6616_v37  ;;  %v980_v1 = vmul.f32 %v6493_v49, %v6629_v17  ;;  %8918 = vst [vmem:[#allocation26_spill] sm:$0xff] %v6673_v9 }
 0x2b6   :  { %v987_v60 = vadd.f32 %v979_v51, %v939_v10  ;;  %v938_v4 = vadd.f32 %v930_v38, %v890_v58  ;;  %v1026_v33 = vmul.f32 %v6411_v63, %v6647_v41  ;;  %vm1045_vm3 = vcmp.gt.f32.partialorder %v6656_v0, 0.5  ;;  %v6704_v51 = vpop.permute.xlu1 %627 }
 0x2b7   :  { %v989_v7 = vadd.f32 %v981_v47, %v941_v48  ;;  %v940_v21 = vadd.f32 %v932_v54, %v892_v2  ;;  %v1028_v49 = vmul.f32 %v6499_v3, %v6647_v41  ;;  %vm1044_vm4 = vcmp.gt.f32.partialorder %v6668_v50, 0.5  ;;  %v6716_v48 = vpop.permute.xlu0 %675 }
 0x2b8   :  { %v1035_v56 = vadd.f32 %v1027_v15, %v987_v60  ;;  %v986_v43 = vadd.f32 %v978_v36, %v938_v4  ;;  %vm1042_vm5 = vcmp.gt.f32.partialorder %v6673_v9, 0.5  ;;  %v8919_v57 = vmov 101  }
 0x2b9   :  { %v1037_v45 = vadd.f32 %v1029_v44, %v989_v7  ;;  %v988_v59 = vadd.f32 %v980_v1, %v940_v21  ;;  %v8920_v8 = vmov 102  }
 0x2ba   :  { %v1051_v22 = vsel %vm1043_vm2, %v1035_v56, -10000.0  ;;  %v1034_v62 = vadd.f32 %v1026_v33, %v986_v43  ;;  %v6706_v15 = vpop.permute.xlu1 %631 }
 0x2bb   :  { %v1061_v38 = vsel %vm247_vm1, %v1051_v22, -inf  ;;  %v1053_v63 = vsel %vm1045_vm3, %v1037_v45, -10000.0  ;;  %v1036_v40 = vadd.f32 %v1028_v49, %v988_v59  ;;  %v6718_v2 = vpop.permute.xlu0 %687  ;;  %v647_v12 = vmul.f32 %v6706_v15, %v6506_v13 }
 0x2bc   :  { %1062 = vmax.xlane.f32.xlu0 %v1061_v38  ;;  %v1067_v6 = vsel %vm247_vm1, %v1053_v63, -inf  ;;  %v1050_v11 = vsel %vm1042_vm5, %v1034_v62, -10000.0 }
 0x2bd   :  { %1068 = vmax.xlane.f32.xlu1 %v1067_v6  ;;  %v1052_v3 = vsel %vm1044_vm4, %v1036_v40, -10000.0  ;;  %v1058_v53 = vsel %vm247_vm1, %v1050_v11, -inf }
 0x2be   :  { %v1064_v31 = vsel %vm247_vm1, %v1052_v3, -inf  ;;  %v6708_v10 = vpop.permute.xlu1 %679 }
 0x2bf   :  { %v6722_v60 = vpop.permute.xlu0 %783 }
 0x2c0   :  { %1065 = vmax.xlane.f32.xlu0 %v1064_v31 }
 0x2c1   :  { %1059 = vmax.xlane.f32.xlu1 %v1058_v53 }
 0x2c2   :  { %v6710_v58 = vpop.permute.xlu1 %723 }
 0x2c3   :  { %v6726_v44 = vpop.permute.xlu0 %635 }
 0x2c6   :  { %v6712_v47 = vpop.permute.xlu1 %727 }
 0x2c7   :  { %v6730_v7 = vpop.permute.xlu0 %731 }
 0x2ca   :  { %v6714_v54 = vpop.permute.xlu1 %775 }
 0x2cb   :  { %v6734_v33 = vpop.permute.xlu0 %827 }
 0x2ce   :  { %v6720_v36 = vpop.permute.xlu1 %819 }
 0x2d2   :  { %823 = vperm.xlu1 %5818, %v6319_v39   ;;  %v6724_v4 = vpop.permute.xlu1 %639 }
 0x2d6   :  { %867 = vperm.xlu0 %5819, %v6330_v42   ;;  %831 = vperm.xlu1 %5818, %v6447_v14   ;;  %v6728_v1 = vpop.permute.xlu1 %735 }
 0x2da   :  { %879 = vperm.xlu0 %5819, %v6447_v14   ;;  %5820 = vset.pattern.permute.xlu1 %v8919_v57  ;;  %v6732_v21 = vpop.permute.xlu1 %683  ;;  %v648_v57 = vmul.f32 %v6726_v44, %v6516_v23  ;;  %v649_v44 = vmul.f32 %v6724_v4, %v6506_v13  ;;  %v790_v4 = vmul.f32 %v6501_v5, %v6566_v27 }
 0x2db   :  { %875 = vperm.xlu1 %5820, %v6461_v26   ;;  %v838_v5 = vmul.f32 %v6720_v36, %v6577_v32 }
 0x2de   :  { %5822 = vset.pattern.permute.xlu0 %v8920_v8  ;;  %v6736_v56 = vpop.permute.xlu1 %779 }
 0x2df   :  { %871 = vperm.xlu1 %5820, %v6319_v39  }
 0x2e3   :  { %5821 = vset.pattern.permute.xlu1 %v8920_v8 }
 0x2e4   :  { %915 = vperm.xlu1 %5821, %v6330_v42  }
 0x345   :  { %v1063_v43 = vpop.xlane.xlu0 %1062 }
 0x346   :  { %v1083_v49 = vsub.f32 %v1051_v22, %v1063_v43  ;;  %v1069_v45 = vpop.xlane.xlu1 %1068 }
 0x347   :  { %v1085_v59 = vsub.f32 %v1053_v63, %v1069_v45  ;;  %v8923_v45 = vmov 96  }
 0x348   :  { %v1092_v62 = vmul.f32 1.442695, %v1083_v49  ;;  %v8922_v49 = vmov 104  }
 0x349   :  { %v1096_v38 = vmul.f32 1.442695, %v1085_v59  ;;  %v1066_v40 = vpop.xlane.xlu0 %1065 }
 0x34a   :  { %5889 = vpow2.f32 %v1092_v62  ;;  %v1084_v6 = vsub.f32 %v1052_v3, %v1066_v40  ;;  %v1060_v31 = vpop.xlane.xlu1 %1059 }
 0x34b   :  { %5891 = vpow2.f32 %v1096_v38  ;;  %v1082_v53 = vsub.f32 %v1050_v11, %v1060_v31  ;;  %v8921_v11 = vmov 103   ;;  %v5510_v31 = vpop.f32.mrf.mxu1 }
 0x34c   :  { %v1094_v50 = vmul.f32 1.442695, %v1084_v6  ;;  %v655_v24 = vadd.f32 %v5510_v31, %v647_v12  ;;  %v697_v12 = vmul.f32 %v6718_v2, %v6511_v18 }
 0x34d   :  { %v1090_v9 = vmul.f32 1.442695, %v1082_v53 }
 0x34e   :  { %5893 = vpow2.f32 %v1094_v50  ;;  %v6771_v59 = vpop.permute.xlu1 %823 }
 0x34f   :  { %5895 = vpow2.f32 %v1090_v9 }
 0x351   :  { %v868_v40 = vpop.permute.xlu0 %867 }
 0x352   :  { %v6773_v62 = vpop.permute.xlu1 %831 }
 0x356   :  { %v876_v38 = vpop.permute.xlu1 %875 }
 0x357   :  { %v6738_v0 = vpop.eup %5889 }
 0x358   :  { %v6740_v61 = vpop.eup %5891  ;;  %v1109_v22 = vsel %vm247_vm1, %v6738_v0, 0.0 }
 0x359   :  { %1110 = vadd.xlane.f32.xlu0 %v1109_v22  ;;  %v1115_v63 = vsel %vm247_vm1, %v6740_v61, 0.0  ;;  %v5517_v22 = vpop.f32.mrf.mxu0 }
 0x35a   :  { %1116 = vadd.xlane.f32.xlu1 %v1115_v63  ;;  %v6775_v6 = vpop.permute.xlu1 %871  ;;  %v502_v63 = vpop.f32.mrf.mxu1 }
 0x35b   :  { %v6746_v3 = vpop.eup %5893 }
 0x35c   :  { %v6748_v43 = vpop.eup %5895  ;;  %v1112_v50 = vsel %vm247_vm1, %v6746_v3, 0.0 }
 0x35d   :  { %1113 = vadd.xlane.f32.xlu0 %v1112_v50  ;;  %v1106_v9 = vsel %vm247_vm1, %v6748_v43, 0.0 }
 0x35e   :  { %1107 = vadd.xlane.f32.xlu1 %v1106_v9 }
 0x35f   :  { %v916_v53 = vpop.permute.xlu1 %915 }
 0x36f   :  { %919 = vperm.xlu1 %5821, %v6319_v39  }
 0x373   :  { %923 = vperm.xlu0 %5822, %v6461_v26   ;;  %927 = vperm.xlu1 %5821, %v6447_v14  }
 0x377   :  { %5823 = vset.pattern.permute.xlu0 %v8921_v11  ;;  %5824 = vset.pattern.permute.xlu1 %v8921_v11  ;;  %v593_v11 = vpop.f32.mrf.mxu0 }
 0x378   :  { %963 = vperm.xlu0 %5823, %v6330_v42   ;;  %971 = vperm.xlu1 %5824, %v6461_v26   ;;  %v656_v19 = vadd.f32 %v648_v57, %v593_v11  ;;  %v657_v57 = vadd.f32 %v5517_v22, %v649_v44  ;;  %v791_v22 = vmul.f32 %v6714_v54, %v6550_v28 }
 0x379   :  { %v840_v44 = vmul.f32 %v6734_v33, %v6577_v32  ;;  %v888_v54 = vmul.f32 %v876_v38, %v6598_v29 }
 0x37c   :  { %975 = vperm.xlu0 %5823, %v6447_v14   ;;  %967 = vperm.xlu1 %5824, %v6319_v39  }
 0x380   :  { %5826 = vset.pattern.permute.xlu0 %v8922_v49  ;;  %5825 = vset.pattern.permute.xlu1 %v8922_v49 }
 0x381   :  { %1019 = vperm.xlu0 %5826, %v6461_v26   ;;  %1011 = vperm.xlu1 %5825, %v6330_v42   ;;  %v6777_v26 = vpop.permute.xlu0 %879 }
 0x385   :  { %1015 = vperm.xlu1 %5825, %v6319_v39   ;;  %5833 = vset.pattern.permute.xlu0 %v8920_v8 }
 0x389   :  { %1023 = vperm.xlu1 %5825, %v6447_v14   ;;  %v646_v14 = vmul.f32 %v6704_v51, %v6516_v23  ;;  %v696_v51 = vmul.f32 %v6732_v21, %v6533_v35 }
 0x38b   :  { %v654_v49 = vadd.f32 %v646_v14, %v502_v63  ;;  %v695_v63 = vmul.f32 %v6708_v10, %v6511_v18  ;;  %v743_v10 = vmul.f32 %v6712_v47, %v6528_v34 }
 0x38d   :  { %5827 = vset.pattern.permute.xlu1 %v8923_v45  ;;  %v694_v45 = vmul.f32 %v6716_v48, %v6533_v35  ;;  %v742_v48 = vmul.f32 %v6710_v58, %v6545_v16 }
 0x38f   :  { %v702_v42 = vadd.f32 %v694_v45, %v654_v49  ;;  %v792_v45 = vmul.f32 %v6736_v56, %v6566_v27  ;;  %v793_v56 = vmul.f32 %v6722_v60, %v6550_v28 }
 0x391   :  { %v750_v11 = vadd.f32 %v742_v48, %v702_v42  ;;  %v745_v42 = vmul.f32 %v6728_v1, %v6528_v34  ;;  %v886_v1 = vmul.f32 %v868_v40, %v6598_v29  ;;  %v841_v40 = vmul.f32 %v6773_v62, %v6561_v20 }
 0x3e2   :  { %v1111_v50 = vpop.xlane.xlu0 %1110 }
 0x3e3   :  { %v1117_v9 = vpop.xlane.xlu1 %1116  ;;  %5897 = vrcp.f32 %v1111_v50  ;;  %v704_v50 = vadd.f32 %v696_v51, %v656_v19  ;;  %v705_v19 = vadd.f32 %v697_v12, %v657_v57 }
 0x3e4   :  { %5899 = vrcp.f32 %v1117_v9 }
 0x3e6   :  { %v1114_v8 = vpop.xlane.xlu0 %1113 }
 0x3e7   :  { %5901 = vrcp.f32 %v1114_v8  ;;  %v1108_v25 = vpop.xlane.xlu1 %1107  ;;  %v703_v8 = vadd.f32 %v695_v63, %v655_v24  ;;  %v753_v63 = vadd.f32 %v745_v42, %v705_v19  ;;  %v6851_v19 = vld [vmem:[%s8825_s2 + $0x30] sm:$0xff] }
 0x3e8   :  { %5903 = vrcp.f32 %v1108_v25  ;;  %v744_v25 = vmul.f32 %v6730_v7, %v6545_v16  ;;  %v798_v7 = vadd.f32 %v790_v4, %v750_v11  ;;  %8924 = vst [vmem:[#allocation27_spill] sm:$0xff] %v6851_v19  ;;  %vm1048_vm6 = vcmp.gt.f32.partialorder %v6851_v19, 0.5  ;;  %v7227_v19 = vld [vmem:[%s8826_s3 + $0x40] sm:$0xff] }
 0x3e9   :  { %v751_v31 = vadd.f32 %v743_v10, %v703_v8  ;;  %v934_v8 = vmul.f32 %v916_v53, %v6593_v55  ;;  %v801_v4 = vadd.f32 %v793_v56, %v753_v63 }
 0x3ea   :  { %v752_v49 = vadd.f32 %v744_v25, %v704_v50  ;;  %v846_v57 = vadd.f32 %v838_v5, %v798_v7  ;;  %v839_v25 = vmul.f32 %v6771_v59, %v6561_v20  ;;  %v889_v7 = vmul.f32 %v6777_v26, %v6582_v30 }
 0x3eb   :  { %v920_v15 = vpop.permute.xlu1 %919  ;;  %v799_v50 = vadd.f32 %v791_v22, %v751_v31  ;;  %v849_v31 = vadd.f32 %v841_v40, %v801_v4  ;;  %v6893_v4 = vld [vmem:[#allocation5 + $0x18] sm:$0xff] }
 0x3ec   :  { %v800_v47 = vadd.f32 %v792_v45, %v752_v49  ;;  %v894_v12 = vadd.f32 %v886_v1, %v846_v57  ;;  %v935_v49 = vmul.f32 %v920_v15, %v6521_v52  ;;  %v6856_v45 = vld [vmem:[%s8825_s2 + $0x20] sm:$0xff]  ;;  %5532 = vmatprep.subr.mxu0 %v6893_v4 }
 0x3ed   :  { %8925 = vst [vmem:[#allocation28_spill] sm:$0xff] %v6856_v45  ;;  %vm1046_vm7 = vcmp.gt.f32.partialorder %v6856_v45, 0.5  ;;  %v897_v63 = vadd.f32 %v889_v7, %v849_v31 }
 0x3ee   :  { %v924_v21 = vpop.permute.xlu0 %923  ;;  %v848_v11 = vadd.f32 %v840_v44, %v800_v47  ;;  %v942_v10 = vadd.f32 %v934_v8, %v894_v12  ;;  %v6869_v44 = vld [vmem:[%s8825_s2 + $0x28] sm:$0xff] }
 0x3ef   :  { %v928_v58 = vpop.permute.xlu1 %927  ;;  %8926 = vst [vmem:[#allocation29_spill] sm:$0xff] %v6869_v44  ;;  %vm1047_vm8 = vcmp.gt.f32.partialorder %v6869_v44, 0.5 }
 0x3f0   :  { %v5898_v24 = vpop.eup %5897 }
 0x3f1   :  { %v5900_v2 = vpop.eup %5899  ;;  %v6832_v38 = vmul.f32 %v5898_v24, %v6738_v0  ;;  %v896_v0 = vadd.f32 %v888_v54, %v848_v11 }
 0x3f2   :  { %v6824_v60 = vmul.f32 %v5900_v2, %v6740_v61  ;;  %v887_v61 = vmul.f32 %v6775_v6, %v6582_v30 }
 0x3f3   :  { %v964_v14 = vpop.permute.xlu0 %963  ;;  %v972_v9 = vpop.permute.xlu1 %971 }
 0x3f4   :  { %v5902_v51 = vpop.eup %5901  ;;  %v984_v62 = vmul.f32 %v972_v9, %v6629_v17 }
 0x3f5   :  { %v5904_v48 = vpop.eup %5903  ;;  %v6818_v36 = vmul.f32 %v5902_v51, %v6746_v3  ;;  %v936_v3 = vmul.f32 %v924_v21, %v6593_v55  ;;  %v847_v21 = vadd.f32 %v839_v25, %v799_v50  ;;  %v937_v51 = vmul.f32 %v928_v58, %v6521_v52 }
 0x3f6   :  { %v6827_v33 = vmul.f32 %v5904_v48, %v6748_v43  ;;  %v982_v43 = vmul.f32 %v964_v14, %v6629_v17 }
 0x3f7   :  { %5529 = vmatprep.mubr.msk.f32.mxu1 %vm247_vm1, %v6818_v36  ;;  %v976_v59 = vpop.permute.xlu0 %975  ;;  %v968_v53 = vpop.permute.xlu1 %967  ;;  %v944_v6 = vadd.f32 %v936_v3, %v896_v0  ;;  %v895_v24 = vadd.f32 %v887_v61, %v847_v21  ;;  %v945_v40 = vadd.f32 %v937_v51, %v897_v63  ;;  %v6883_v3 = vld [vmem:[%s8825_s2 + $0x38] sm:$0xff] }
 0x3f8   :  { %5522 = vmatprep.mubr.msk.f32.mxu0 %vm247_vm1, %v6827_v33  ;;  %5530 = vmatmul.mubr.msk.f32.vlgmr.msra.gmra.mxu1 %vm247_vm1, %v6824_v60  ;;  %v990_v42 = vadd.f32 %v982_v43, %v942_v10  ;;  %v983_v5 = vmul.f32 %v968_v53, %v6611_v46  ;;  %v985_v1 = vmul.f32 %v976_v59, %v6611_v46  ;;  %vm1049_vm9 = vcmp.gt.f32.partialorder %v6883_v3, 0.5  ;;  %v6897_v10 = vld [vmem:[#allocation5 + $0x10] sm:$0xff] }
 0x3f9   :  { %5523 = vmatmul.mubr.msk.f32.vlgmr.msra.gmra.mxu0 %vm247_vm1, %v6832_v38  ;;  %v992_v15 = vadd.f32 %v984_v62, %v944_v6  ;;  %v943_v9 = vadd.f32 %v935_v49, %v895_v24  ;;  %8927 = vst [vmem:[#allocation30_spill] sm:$0xff] %v6883_v3 }
 0x3fa   :  { %v993_v53 = vadd.f32 %v985_v1, %v945_v40  ;;  %5533 = vmatpush3.msra.mxu0 %v6893_v4 }
 0x3fb   :  { %v991_v50 = vadd.f32 %v983_v5, %v943_v9  ;;  %5534 = vmatprep.subr.mxu0 %v6897_v10 }
 0x3fc   :  { %v1020_v2 = vpop.permute.xlu0 %1019  ;;  %v1012_v22 = vpop.permute.xlu1 %1011  ;;  %5535 = vmatpush3.msra.mxu0 %v6897_v10 }
 0x3fd   :  { %v1032_v47 = vmul.f32 %v1020_v2, %v6647_v41  ;;  %v1030_v14 = vmul.f32 %v1012_v22, %v6647_v41 }
 0x3ff   :  { %v1040_v56 = vadd.f32 %v1032_v47, %v992_v15  ;;  %v1038_v26 = vadd.f32 %v1030_v14, %v990_v42 }
 0x400   :  { %v1016_v48 = vpop.permute.xlu1 %1015 }
 0x401   :  { %v1031_v57 = vmul.f32 %v1016_v48, %v6616_v37  ;;  %v1056_v54 = vsel %vm1048_vm6, %v1040_v56, -10000.0  ;;  %v1054_v58 = vsel %vm1046_vm7, %v1038_v26, -10000.0 }
 0x402   :  { %v1076_v25 = vsel %vm247_vm1, %v1056_v54, -inf  ;;  %v1070_v8 = vsel %vm247_vm1, %v1054_v58, -inf }
 0x403   :  { %1077 = vmax.xlane.f32.xlu1 %v1076_v25  ;;  %1071 = vmax.xlane.f32.xlu0 %v1070_v8  ;;  %v1039_v11 = vadd.f32 %v1031_v57, %v991_v50  ;;  %v1147_v50 = vmul.f32 %v6832_v38, %v6506_v13  ;;  %v1191_v25 = vmul.f32 %v6832_v38, %v6511_v18 }
 0x404   :  { %v1024_v59 = vpop.permute.xlu1 %1023  ;;  %v1149_v8 = vmul.f32 %v6824_v60, %v6506_v13 }
 0x405   :  { %v1033_v12 = vmul.f32 %v1024_v59, %v6616_v37  ;;  %v1055_v61 = vsel %vm1047_vm8, %v1039_v11, -10000.0  ;;  %v1201_v40 = vsel %vm247_vm1, %v1191_v25, 0.0  ;;  %v1243_v59 = vmul.f32 %v6832_v38, %v6528_v34 }
 0x406   :  { %v1073_v43 = vsel %vm247_vm1, %v1055_v61, -inf  ;;  %v1163_v11 = vsel %vm247_vm1, %v1149_v8, 0.0 }
 0x407   :  { %1074 = vmax.xlane.f32.xlu0 %v1073_v43  ;;  %v1041_v0 = vadd.f32 %v1033_v12, %v993_v53  ;;  %v1193_v53 = vmul.f32 %v6824_v60, %v6511_v18  ;;  %v1253_v12 = vsel %vm247_vm1, %v1243_v59, 0.0  ;;  %v1295_v43 = vmul.f32 %v6832_v38, %v6550_v28 }
 0x408   :  { %v1190_v59 = vmul.f32 %v6827_v33, %v6533_v35 }
 0x409   :  { %v1057_v62 = vsel %vm1049_vm9, %v1041_v0, -10000.0  ;;  %v1245_v0 = vmul.f32 %v6824_v60, %v6528_v34 }
 0x40a   :  { %v1079_v21 = vsel %vm247_vm1, %v1057_v62, -inf }
 0x40b   :  { %1080 = vmax.xlane.f32.xlu0 %v1079_v21  ;;  %v1259_v21 = vsel %vm247_vm1, %v1245_v0, 0.0 }
 0x414   :  { %1948 = vrot.lane.b32.xlu1 %v6319_v39, %s6132_s24 }
 0x48c   :  { %v1078_v49 = vpop.xlane.xlu1 %1077  ;;  %v1072_v6 = vpop.xlane.xlu0 %1071 }
 0x48d   :  { %v1086_v31 = vsub.f32 %v1054_v58, %v1072_v6  ;;  %v1088_v2 = vsub.f32 %v1056_v54, %v1078_v49  ;;  %v1157_v54 = vsel %vm247_vm1, %v1147_v50, 0.0  ;;  %v1347_v49 = vmul.f32 %v6832_v38, %v6561_v20 }
 0x48e   :  { %v1297_v6 = vmul.f32 %v6824_v60, %v6550_v28 }
 0x48f   :  { %v1098_v22 = vmul.f32 1.442695, %v1086_v31  ;;  %v1102_v14 = vmul.f32 1.442695, %v1088_v2  ;;  %v1357_v31 = vsel %vm247_vm1, %v1347_v49, 0.0  ;;  %v1349_v2 = vmul.f32 %v6824_v60, %v6561_v20 }
 0x490   :  { %v6903_v7 = vpop.permute.xlu1 %1948  ;;  %v1075_v24 = vpop.xlane.xlu0 %1074 }
 0x491   :  { %v1087_v42 = vsub.f32 %v1055_v61, %v1075_v24  ;;  %5546 = vmatprep.subr.mxu0 %v6903_v7  ;;  %v1207_v61 = vsel %vm247_vm1, %v1193_v53, 0.0  ;;  %v1311_v24 = vsel %vm247_vm1, %v1297_v6, 0.0  ;;  %v1148_v53 = vmul.f32 %v6818_v36, %v6516_v23 }
 0x492   :  { %v1296_v6 = vmul.f32 %v6818_v36, %v6566_v27 }
 0x493   :  { %v1100_v15 = vmul.f32 1.442695, %v1087_v42  ;;  %v1399_v42 = vmul.f32 %v6832_v38, %v6582_v30 }
 0x494   :  { %v1081_v5 = vpop.xlane.xlu0 %1080 }
 0x495   :  { %5905 = vpow2.f32 %v1100_v15  ;;  %v1089_v47 = vsub.f32 %v1057_v62, %v1081_v5  ;;  %v1305_v62 = vsel %vm247_vm1, %v1295_v43, 0.0  ;;  %v1363_v15 = vsel %vm247_vm1, %v1349_v2, 0.0 }
 0x496   :  { %5907 = vpow2.f32 %v1098_v22  ;;  %v1409_v22 = vsel %vm247_vm1, %v1399_v42, 0.0  ;;  %v1451_v5 = vmul.f32 %v6832_v38, %v6521_v52  ;;  %v1348_v42 = vmul.f32 %v6818_v36, %v6577_v32 }
 0x497   :  { %v1104_v9 = vmul.f32 1.442695, %v1089_v47  ;;  %v1401_v47 = vmul.f32 %v6824_v60, %v6582_v30 }
 0x499   :  { %5909 = vpow2.f32 %v1104_v9  ;;  %v1415_v9 = vsel %vm247_vm1, %v1401_v47, 0.0 }
 0x49a   :  { %5911 = vpow2.f32 %v1102_v14  ;;  %v1461_v14 = vsel %vm247_vm1, %v1451_v5, 0.0 }
 0x4a2   :  { %v6906_v51 = vpop.eup %5905 }
 0x4a3   :  { %v1121_v56 = vsel %vm247_vm1, %v6906_v51, 0.0  ;;  %v6910_v26 = vpop.eup %5907 }
 0x4a4   :  { %1122 = vadd.xlane.f32.xlu1 %v1121_v56  ;;  %v1118_v1 = vsel %vm247_vm1, %v6910_v26, 0.0  ;;  %v1503_v56 = vmul.f32 %v6832_v38, %v6611_v46 }
 0x4a6   :  { %v6912_v63 = vpop.eup %5909 }
 0x4a7   :  { %v1127_v48 = vsel %vm247_vm1, %v6912_v63, 0.0  ;;  %v6920_v57 = vpop.eup %5911 }
 0x4a8   :  { %1119 = vadd.xlane.f32.xlu1 %v1118_v1  ;;  %1128 = vadd.xlane.f32.xlu0 %v1127_v48  ;;  %v1124_v58 = vsel %vm247_vm1, %v6920_v57, 0.0  ;;  %v1453_v1 = vmul.f32 %v6824_v60, %v6521_v52  ;;  %v1513_v48 = vsel %vm247_vm1, %v1503_v56, 0.0  ;;  %v1146_v52 = vmul.f32 %v6827_v33, %v6516_v23 }
 0x4a9   :  { %v1294_v23 = vmul.f32 %v6827_v33, %v6566_v27  ;;  %v1450_v27 = vmul.f32 %v6827_v33, %v6593_v55 }
 0x4aa   :  { %v1467_v50 = vsel %vm247_vm1, %v1453_v1, 0.0  ;;  %v1504_v1 = vmul.f32 %v6818_v36, %v6629_v17 }
 0x4ab   :  { %v1458_v5 = vsel %vm247_vm1, %v1450_v27, 0.0 }
 0x4ac   :  { %1158 = vadd.xlane.f32.xlu1 %v1157_v54  ;;  %1125 = vadd.xlane.f32.xlu0 %v1124_v58  ;;  %v1555_v54 = vmul.f32 %v6832_v38, %v6616_v37  ;;  %v1505_v58 = vmul.f32 %v6824_v60, %v6611_v46 }
 0x4ae   :  { %v1565_v25 = vsel %vm247_vm1, %v1555_v54, 0.0  ;;  %v1519_v8 = vsel %vm247_vm1, %v1505_v58, 0.0  ;;  %v7030_v58 = vld [vmem:[#allocation5 + $0x8] sm:$0xff] }
 0x4af   :  { %5539 = vmatprep.subr.mxu1 %v7030_v58 }
 0x4b0   :  { %1202 = vadd.xlane.f32.xlu1 %v1201_v40  ;;  %1164 = vadd.xlane.f32.xlu0 %v1163_v11  ;;  %v1557_v40 = vmul.f32 %v6824_v60, %v6616_v37  ;;  %v1154_v11 = vsel %vm247_vm1, %v1146_v52, 0.0  ;;  %v1242_v37 = vmul.f32 %v6827_v33, %v6545_v16  ;;  %v1192_v60 = vmul.f32 %v6818_v36, %v6533_v35 }
 0x4b1   :  { %v1346_v35 = vmul.f32 %v6827_v33, %v6577_v32  ;;  %v1502_v32 = vmul.f32 %v6827_v33, %v6629_v17  ;;  %5540 = vmatpush3.msra.mxu1 %v7030_v58  ;;  %v8928_v17 = vld [vmem:[#allocation22_spill] sm:$0xff] }
 0x4b2   :  { %v1571_v38 = vsel %vm247_vm1, %v1557_v40, 0.0  ;;  %v1250_v43 = vsel %vm247_vm1, %v1242_v37, 0.0  ;;  %v1204_v0 = vsel %vm247_vm1, %v1192_v60, 0.0 }
 0x4b4   :  { %1254 = vadd.xlane.f32.xlu1 %v1253_v12  ;;  %1208 = vadd.xlane.f32.xlu0 %v1207_v61  ;;  %v1198_v12 = vsel %vm247_vm1, %v1190_v59, 0.0  ;;  %v1160_v61 = vsel %vm247_vm1, %v1148_v53, 0.0 }
 0x4b8   :  { %1306 = vadd.xlane.f32.xlu1 %v1305_v62  ;;  %1260 = vadd.xlane.f32.xlu0 %v1259_v21  ;;  %v1244_v62 = vmul.f32 %v6818_v36, %v6545_v16  ;;  %v1302_v21 = vsel %vm247_vm1, %v1294_v23, 0.0  ;;  %v1398_v16 = vmul.f32 %v6827_v33, %v6598_v29 }
 0x4ba   :  { %v1256_v49 = vsel %vm247_vm1, %v1244_v62, 0.0  ;;  %v1406_v2 = vsel %vm247_vm1, %v1398_v16, 0.0 }
 0x4bc   :  { %1358 = vadd.xlane.f32.xlu1 %v1357_v31  ;;  %1312 = vadd.xlane.f32.xlu0 %v1311_v24  ;;  %v1354_v31 = vsel %vm247_vm1, %v1346_v35, 0.0  ;;  %v1308_v24 = vsel %vm247_vm1, %v1296_v6, 0.0 }
 0x4c0   :  { %1410 = vadd.xlane.f32.xlu1 %v1409_v22  ;;  %1364 = vadd.xlane.f32.xlu0 %v1363_v15  ;;  %v1360_v22 = vsel %vm247_vm1, %v1348_v42, 0.0  ;;  %v1400_v15 = vmul.f32 %v6818_v36, %v6598_v29  ;;  %v1554_v29 = vmul.f32 %v6827_v33, %v6647_v41  ;;  %v7036_v33 = vld [vmem:[#allocation5] sm:$0xff] }
 0x4c1   :  { %5541 = vmatprep.subr.mxu1 %v7036_v33 }
 0x4c2   :  { %v1412_v47 = vsel %vm247_vm1, %v1400_v15, 0.0  ;;  %5542 = vmatpush3.msra.mxu1 %v7036_v33 }
 0x4c4   :  { %1462 = vadd.xlane.f32.xlu1 %v1461_v14  ;;  %1416 = vadd.xlane.f32.xlu0 %v1415_v9  ;;  %v1452_v14 = vmul.f32 %v6818_v36, %v6593_v55  ;;  %v1510_v9 = vsel %vm247_vm1, %v1502_v32, 0.0  ;;  %v1556_v55 = vmul.f32 %v6818_v36, %v6647_v41 }
 0x4c6   :  { %v1464_v56 = vsel %vm247_vm1, %v1452_v14, 0.0  ;;  %v1568_v54 = vsel %vm247_vm1, %v1556_v55, 0.0 }
 0x4c8   :  { %1514 = vadd.xlane.f32.xlu1 %v1513_v48  ;;  %1468 = vadd.xlane.f32.xlu0 %v1467_v50  ;;  %v1562_v48 = vsel %vm247_vm1, %v1554_v29, 0.0  ;;  %v1516_v50 = vsel %vm247_vm1, %v1504_v1, 0.0 }
 0x4cc   :  { %1566 = vadd.xlane.f32.xlu1 %v1565_v25  ;;  %1520 = vadd.xlane.f32.xlu0 %v1519_v8 }
 0x4d0   :  { %1155 = vadd.xlane.f32.xlu1 %v1154_v11  ;;  %1572 = vadd.xlane.f32.xlu0 %v1571_v38 }
 0x4d4   :  { %1199 = vadd.xlane.f32.xlu1 %v1198_v12  ;;  %1161 = vadd.xlane.f32.xlu0 %v1160_v61 }
 0x4d8   :  { %1251 = vadd.xlane.f32.xlu1 %v1250_v43  ;;  %1205 = vadd.xlane.f32.xlu0 %v1204_v0 }
 0x4dc   :  { %1303 = vadd.xlane.f32.xlu1 %v1302_v21  ;;  %1257 = vadd.xlane.f32.xlu0 %v1256_v49 }
 0x4e0   :  { %1355 = vadd.xlane.f32.xlu1 %v1354_v31  ;;  %1309 = vadd.xlane.f32.xlu0 %v1308_v24 }
 0x4e4   :  { %1407 = vadd.xlane.f32.xlu1 %v1406_v2  ;;  %1361 = vadd.xlane.f32.xlu0 %v1360_v22 }
 0x4e8   :  { %1459 = vadd.xlane.f32.xlu1 %v1458_v5  ;;  %1413 = vadd.xlane.f32.xlu0 %v1412_v47 }
 0x4ec   :  { %1511 = vadd.xlane.f32.xlu1 %v1510_v9  ;;  %1465 = vadd.xlane.f32.xlu0 %v1464_v56 }
 0x4f0   :  { %1563 = vadd.xlane.f32.xlu1 %v1562_v48  ;;  %1517 = vadd.xlane.f32.xlu0 %v1516_v50 }
 0x4f4   :  { %1569 = vadd.xlane.f32.xlu0 %v1568_v54 }
 0x501   :  { %1946 = vrot.lane.b32.xlu1 %v8928_v17, %s6132_s24 }
 0x505   :  { %2033 = vrot.lane.b32.xlu1 %v8928_v17, %s6140_s0 }
 0x50a   :  { %2035 = vrot.lane.b32.xlu0 %v6319_v39, %s6140_s0 }
 0x52d   :  { %v1123_v41 = vpop.xlane.xlu1 %1122 }
 0x52e   :  { %5913 = vrcp.f32 %v1123_v41 }
 0x531   :  { %v1120_v36 = vpop.xlane.xlu1 %1119  ;;  %v1129_v25 = vpop.xlane.xlu0 %1128 }
 0x532   :  { %5915 = vrcp.f32 %v1129_v25 }
 0x535   :  { %v7044_v8 = vpop.xlane.xlu1 %1158  ;;  %v1126_v52 = vpop.xlane.xlu0 %1125 }
 0x536   :  { %5917 = vrcp.f32 %v1126_v52 }
 0x537   :  { %5919 = vrcp.f32 %v1120_v36 }
 0x539   :  { %v7046_v40 = vpop.xlane.xlu1 %1202  ;;  %v7048_v11 = vpop.xlane.xlu0 %1164 }
 0x53b   :  { %v5914_v38 = vpop.eup %5913 }
 0x53c   :  { %v7051_v59 = vmul.f32 %v5914_v38, %v6906_v51 }
 0x53d   :  { %v7053_v53 = vpop.xlane.xlu1 %1254  ;;  %v7055_v12 = vpop.xlane.xlu0 %1208 }
 0x53e   :  { %v1151_v39 = vmul.f32 %v7051_v59, %v6506_v13  ;;  %v1195_v60 = vmul.f32 %v7051_v59, %v6511_v18  ;;  %v1247_v21 = vmul.f32 %v7051_v59, %v6528_v34  ;;  %v1351_v22 = vmul.f32 %v7051_v59, %v6561_v20 }
 0x53f   :  { %v5916_v61 = vpop.eup %5915  ;;  %v1403_v32 = vmul.f32 %v7051_v59, %v6582_v30  ;;  %v1507_v25 = vmul.f32 %v7051_v59, %v6611_v46 }
 0x540   :  { %v1169_v37 = vsel %vm247_vm1, %v1151_v39, 0.0  ;;  %v7063_v43 = vmul.f32 %v5916_v61, %v6912_v63  ;;  %v1213_v62 = vsel %vm247_vm1, %v1195_v60, 0.0  ;;  %v1265_v31 = vsel %vm247_vm1, %v1247_v21, 0.0 }
 0x541   :  { %1170 = vadd.xlane.f32.xlu1 %v1169_v37  ;;  %v7065_v0 = vpop.xlane.xlu1 %1306  ;;  %v7067_v51 = vpop.xlane.xlu0 %1260  ;;  %v1421_v1 = vsel %vm247_vm1, %v1403_v32, 0.0 }
 0x542   :  { %v1153_v23 = vmul.f32 %v7063_v43, %v6506_v13  ;;  %v1197_v6 = vmul.f32 %v7063_v43, %v6511_v18  ;;  %v1299_v13 = vmul.f32 %v7051_v59, %v6550_v28  ;;  %v1249_v2 = vmul.f32 %v7063_v43, %v6528_v34 }
 0x543   :  { %v1301_v47 = vmul.f32 %v7063_v43, %v6550_v28  ;;  %v1369_v34 = vsel %vm247_vm1, %v1351_v22, 0.0  ;;  %v1353_v29 = vmul.f32 %v7063_v43, %v6561_v20  ;;  %v5985_v28 = vld [vmem:[%s8826_s3 + $0x68] sm:$0xff]  ;;  %v5918_v50 = vpop.eup %5917  ;;  %v1405_v20 = vmul.f32 %v7063_v43, %v6582_v30 }
 0x544   :  { %v1175_v35 = vsel %vm247_vm1, %v1153_v23, 0.0  ;;  %v1219_v16 = vsel %vm247_vm1, %v1197_v6, 0.0  ;;  %v1317_v18 = vsel %vm247_vm1, %v1299_v13, 0.0  ;;  %v1271_v15 = vsel %vm247_vm1, %v1249_v2, 0.0  ;;  %v5920_v52 = vpop.eup %5919 }
 0x545   :  { %1214 = vadd.xlane.f32.xlu1 %v1213_v62  ;;  %v7074_v49 = vpop.xlane.xlu1 %1358  ;;  %v7077_v63 = vpop.xlane.xlu0 %1312  ;;  %1176 = vadd.xlane.f32.xlu0 %v1175_v35  ;;  %v1323_v9 = vsel %vm247_vm1, %v1301_v47, 0.0  ;;  %v1455_v48 = vmul.f32 %v5985_v28, %v7051_v59  ;;  %v1375_v54 = vsel %vm247_vm1, %v1353_v29, 0.0  ;;  %v7124_v41 = vmul.f32 %v5918_v50, %v6920_v57  ;;  %v8929_v57 = vld [vmem:[#allocation20_spill] sm:$0xff]  ;;  %v8933_v29 = vld [vmem:[#allocation21_spill] sm:$0xff] }
 0x546   :  { %v1427_v39 = vsel %vm247_vm1, %v1405_v20, 0.0  ;;  %v1457_v37 = vmul.f32 %v5985_v28, %v7063_v43  ;;  %v7136_v30 = vmul.f32 %v5920_v52, %v6910_v26  ;;  %v7139_v60 = vsub.s32 1, %v8929_v57  ;;  %v5986_v62 = vld [vmem:[%s8826_s3] sm:$0xff] }
 0x547   :  { %v1473_v36 = vsel %vm247_vm1, %v1455_v48, 0.0  ;;  %v1525_v23 = vsel %vm247_vm1, %v1507_v25, 0.0  ;;  %v1152_v21 = vmul.f32 %v5986_v62, %v7124_v41  ;;  %v1509_v26 = vmul.f32 %v7063_v43, %v6611_v46  ;;  %v7167_v46 = vld [vmem:[%s8826_s3 + $0x20] sm:$0xff]  ;;  %v7194_v25 = vld [vmem:[%s8826_s3 + $0x30] sm:$0xff] }
 0x548   :  { %8930 = vst [vmem:[#allocation22_spill] sm:$0xff] %v7139_v60  ;;  %v1479_v6 = vsel %vm247_vm1, %v1457_v37, 0.0  ;;  %v7152_v13 = vsub.s32 2, %v8929_v57  ;;  %v7180_v48 = vsub.s32 4, %v8929_v57  ;;  %v7183_v50 = vsub.s32 5, %v8929_v57 }
 0x549   :  { %1266 = vadd.xlane.f32.xlu1 %v1265_v31  ;;  %v7084_v24 = vpop.xlane.xlu1 %1410  ;;  %v7087_v42 = vpop.xlane.xlu0 %1364  ;;  %1220 = vadd.xlane.f32.xlu0 %v1219_v16  ;;  %v133_v16 = vld [vmem:[%s8831_s8 + $0x8] sm:$0xff]  ;;  %v1172_v22 = vsel %vm247_vm1, %v1152_v21, 0.0  ;;  %v1298_v52 = vmul.f32 %v7194_v25, %v7136_v30 }
 0x54a   :  { %8931 = vst [vmem:[#allocation20_spill] sm:$0xff] %v7152_v13  ;;  %v7158_v2 = vrot.slane %v133_v16, %v7139_v60  ;;  %v7177_v28 = vrot.slane %v133_v16, %v7152_v13  ;;  %8934 = vst [vmem:[#allocation32_spill] sm:$0xff] %v7180_v48 }
 0x54b   :  { %8935 = vst [vmem:[#allocation33_spill] sm:$0xff] %v7183_v50 }
 0x54d   :  { %1318 = vadd.xlane.f32.xlu1 %v1317_v18  ;;  %v7094_v27 = vpop.xlane.xlu1 %1462  ;;  %v7097_v5 = vpop.xlane.xlu0 %1416  ;;  %1272 = vadd.xlane.f32.xlu0 %v1271_v15  ;;  %v7161_v18 = vsub.s32 3, %v8929_v57  ;;  %v1246_v15 = vmul.f32 %v7167_v46, %v7136_v30 }
 0x54f   :  { %8932 = vst [vmem:[#allocation31_spill] sm:$0xff] %v7161_v18  ;;  %v7188_v20 = vrot.slane %v133_v16, %v7161_v18 }
 0x551   :  { %1370 = vadd.xlane.f32.xlu1 %v1369_v34  ;;  %v7104_v14 = vpop.xlane.xlu1 %1514  ;;  %v7107_v56 = vpop.xlane.xlu0 %1468  ;;  %1324 = vadd.xlane.f32.xlu0 %v1323_v9  ;;  %v1531_v34 = vsel %vm247_vm1, %v1509_v26, 0.0  ;;  %v1150_v9 = vmul.f32 %v5986_v62, %v7136_v30  ;;  %v7208_v26 = vrot.slane %v133_v16, %v7180_v48 }
 0x553   :  { %v1166_v37 = vsel %vm247_vm1, %v1150_v9, 0.0  ;;  %v7219_v9 = vsub.s32 7, %v8929_v57  ;;  %v1383_v45 = vmul.f32 %v7208_v26, %v7074_v49 }
 0x555   :  { %1422 = vadd.xlane.f32.xlu1 %v1421_v1  ;;  %v7116_v55 = vpop.xlane.xlu1 %1566  ;;  %v7119_v17 = vpop.xlane.xlu0 %1520  ;;  %1376 = vadd.xlane.f32.xlu0 %v1375_v54  ;;  %v7174_v1 = vrot.slane %v133_v16, %v8933_v29  ;;  %v1227_v54 = vmul.f32 %v7158_v2, %v7046_v40  ;;  %v5989_v40 = vld [vmem:[%s8826_s3 + $0x10] sm:$0xff]  ;;  %8937 = vst [vmem:[#allocation35_spill] sm:$0xff] %v7219_v9 }
 0x556   :  { %v1194_v62 = vmul.f32 %v5989_v40, %v7136_v30 }
 0x557   :  { %v1183_v21 = vmul.f32 %v7174_v1, %v7044_v8 }
 0x559   :  { %1474 = vadd.xlane.f32.xlu1 %v1473_v36  ;;  %v7129_v38 = vpop.xlane.xlu1 %1155  ;;  %v7132_v61 = vpop.xlane.xlu0 %1572  ;;  %1428 = vadd.xlane.f32.xlu0 %v1427_v39  ;;  %v1262_v36 = vsel %vm247_vm1, %v1246_v15, 0.0  ;;  %v1229_v15 = vmul.f32 %v7158_v2, %v7055_v12  ;;  %v1235_v8 = vadd.f32 %v1227_v54, %v1183_v21  ;;  %v1350_v12 = vmul.f32 %v7227_v19, %v7136_v30 }
 0x55a   :  { %v1210_v21 = vsel %vm247_vm1, %v1194_v62, 0.0  ;;  %v7246_v62 = vrot.slane %v133_v16, %v7219_v9  ;;  %v1248_v9 = vmul.f32 %v7167_v46, %v7124_v41 }
 0x55d   :  { %1526 = vadd.xlane.f32.xlu1 %v1525_v23  ;;  %v1200_v35 = vpop.xlane.xlu1 %1199  ;;  %v7147_v31 = vpop.xlane.xlu0 %1161  ;;  %1480 = vadd.xlane.f32.xlu0 %v1479_v6  ;;  %v1279_v6 = vmul.f32 %v7177_v28, %v7053_v53  ;;  %v1331_v53 = vmul.f32 %v7188_v20, %v7065_v0 }
 0x55e   :  { %v1226_v29 = vmul.f32 %v7158_v2, %v1200_v35  ;;  %v1182_v35 = vmul.f32 %v7174_v1, %v7129_v38  ;;  %v1184_v46 = vmul.f32 %v7174_v1, %v7147_v31 }
 0x55f   :  { %v1287_v3 = vadd.f32 %v1279_v6, %v1235_v8  ;;  %v1366_v8 = vsel %vm247_vm1, %v1350_v12, 0.0 }
 0x561   :  { %v1252_v47 = vpop.xlane.xlu1 %1251  ;;  %1173 = vadd.xlane.f32.xlu1 %v1172_v22  ;;  %v1206_v32 = vpop.xlane.xlu0 %1205  ;;  %1532 = vadd.xlane.f32.xlu0 %v1531_v34  ;;  %v7211_v22 = vsub.s32 6, %v8929_v57  ;;  %v7216_v34 = vrot.slane %v133_v16, %v7183_v50  ;;  %v1281_v57 = vmul.f32 %v7177_v28, %v7067_v51  ;;  %v1333_v51 = vmul.f32 %v7188_v20, %v7077_v63 }
 0x562   :  { %v1339_v6 = vadd.f32 %v1331_v53, %v1287_v3  ;;  %v1234_v53 = vadd.f32 %v1226_v29, %v1182_v35  ;;  %v1228_v38 = vmul.f32 %v7158_v2, %v1206_v32  ;;  %v1300_v35 = vmul.f32 %v7194_v25, %v7124_v41 }
 0x563   :  { %8936 = vst [vmem:[#allocation34_spill] sm:$0xff] %v7211_v22  ;;  %v7240_v44 = vrot.slane %v133_v16, %v7211_v22  ;;  %v1435_v16 = vmul.f32 %v7216_v34, %v7084_v24 }
 0x564   :  { %v1391_v3 = vadd.f32 %v1383_v45, %v1339_v6 }
 0x565   :  { %v1304_v39 = vpop.xlane.xlu1 %1303  ;;  %1263 = vadd.xlane.f32.xlu1 %v1262_v36  ;;  %v1258_v23 = vpop.xlane.xlu0 %1257  ;;  %1167 = vadd.xlane.f32.xlu0 %v1166_v37  ;;  %v1314_v36 = vsel %vm247_vm1, %v1298_v52, 0.0  ;;  %v1185_v37 = vmul.f32 %v7174_v1, %v7048_v11  ;;  %v1196_v52 = vmul.f32 %v5989_v40, %v7124_v41  ;;  %v7251_v40 = vld [vmem:[%s8826_s3 + $0x50] sm:$0xff] }
 0x566   :  { %v1402_v49 = vmul.f32 %v7251_v40, %v7136_v30  ;;  %v1280_v29 = vmul.f32 %v7177_v28, %v1258_v23 }
 0x567   :  { %v1237_v11 = vadd.f32 %v1229_v15, %v1185_v37  ;;  %v1278_v15 = vmul.f32 %v7177_v28, %v1252_v47  ;;  %v1216_v37 = vsel %vm247_vm1, %v1196_v52, 0.0  ;;  %v1330_v47 = vmul.f32 %v7188_v20, %v1304_v39  ;;  %v7272_v52 = vld [vmem:[%s8826_s3 + $0x60] sm:$0xff] }
 0x568   :  { %v1418_v24 = vsel %vm247_vm1, %v1402_v49, 0.0  ;;  %v1454_v45 = vmul.f32 %v7272_v52, %v7136_v30  ;;  %v1268_v49 = vsel %vm247_vm1, %v1248_v9, 0.0  ;;  %v7293_v9 = vld [vmem:[%s8826_s3 + $0x70] sm:$0xff] }
 0x569   :  { %v1356_v54 = vpop.xlane.xlu1 %1355  ;;  %1315 = vadd.xlane.f32.xlu1 %v1314_v36  ;;  %v1310_v0 = vpop.xlane.xlu0 %1309  ;;  %1211 = vadd.xlane.f32.xlu0 %v1210_v21  ;;  %v1289_v63 = vadd.f32 %v1281_v57, %v1237_v11  ;;  %v1385_v57 = vmul.f32 %v7208_v26, %v7087_v42  ;;  %v1286_v32 = vadd.f32 %v1278_v15, %v1234_v53 }
 0x56a   :  { %v1382_v39 = vmul.f32 %v7208_v26, %v1356_v54  ;;  %v1443_v11 = vadd.f32 %v1435_v16, %v1391_v3  ;;  %v1487_v42 = vmul.f32 %v7240_v44, %v7094_v27  ;;  %v1332_v31 = vmul.f32 %v7188_v20, %v1310_v0  ;;  %v7300_v0 = vld [vmem:[%s8831_s8 + $0x10] ss:$0 sm:$0xff] }
 0x56b   :  { %v1341_v12 = vadd.f32 %v1333_v51, %v1289_v63  ;;  %v1338_v63 = vadd.f32 %v1330_v47, %v1286_v32  ;;  %v1437_v15 = vmul.f32 %v7216_v34, %v7097_v5  ;;  %v1470_v27 = vsel %vm247_vm1, %v1454_v45, 0.0 }
 0x56c   :  { %v1506_v25 = vmul.f32 %v7293_v9, %v7136_v30  ;;  %v1495_v3 = vadd.f32 %v1487_v42, %v1443_v11  ;;  %v1539_v53 = vmul.f32 %v7246_v62, %v7104_v14  ;;  %v1320_v47 = vsel %vm247_vm1, %v1300_v35, 0.0  ;;  %v5524_v11 = vpop.f32.mrf.mxu0 }
 0x56d   :  { %v1408_v36 = vpop.xlane.xlu1 %1407  ;;  %1367 = vadd.xlane.f32.xlu1 %v1366_v8  ;;  %v1362_v21 = vpop.xlane.xlu0 %1361  ;;  %1217 = vadd.xlane.f32.xlu0 %v1216_v37  ;;  %v1236_v8 = vadd.f32 %v1228_v38, %v1184_v46  ;;  %v1393_v54 = vadd.f32 %v1385_v57, %v1341_v12  ;;  %v1352_v57 = vmul.f32 %v7227_v19, %v7124_v41 }
 0x56e   :  { %v1434_v23 = vmul.f32 %v7216_v34, %v1408_v36  ;;  %v1390_v36 = vadd.f32 %v1382_v39, %v1338_v63  ;;  %v1384_v37 = vmul.f32 %v7208_v26, %v1362_v21  ;;  %v1591_v14 = vmul.f32 %v7300_v0, %v7116_v55 }
 0x56f   :  { %v1288_v16 = vadd.f32 %v1280_v29, %v1236_v8  ;;  %v1445_v32 = vadd.f32 %v1437_v15, %v1393_v54  ;;  %v1489_v29 = vmul.f32 %v7240_v44, %v7107_v56  ;;  %v1522_v39 = vsel %vm247_vm1, %v1506_v25, 0.0 }
 0x570   :  { %v1442_v45 = vadd.f32 %v1434_v23, %v1390_v36  ;;  %v1547_v35 = vadd.f32 %v1539_v53, %v1495_v3  ;;  %v1541_v56 = vmul.f32 %v7246_v62, %v7119_v17  ;;  %v1372_v55 = vsel %vm247_vm1, %v1352_v57, 0.0  ;;  %v5531_v36 = vpop.f32.mrf.mxu1 }
 0x571   :  { %v1460_v51 = vpop.xlane.xlu1 %1459  ;;  %1419 = vadd.xlane.f32.xlu1 %v1418_v24  ;;  %v1414_v6 = vpop.xlane.xlu0 %1413  ;;  %1269 = vadd.xlane.f32.xlu0 %v1268_v49  ;;  %v1340_v24 = vadd.f32 %v1332_v31, %v1288_v16  ;;  %v5994_v49 = vld [vmem:[%s8826_s3 + $0x80] sm:$0xff]  ;;  %v1404_v31 = vmul.f32 %v7251_v40, %v7124_v41  ;;  %v1497_v25 = vadd.f32 %v1489_v29, %v1445_v32  ;;  %v5995_v40 = vld [vmem:[%s8826_s3 + $0x88] sm:$0xff] }
 0x572   :  { %v1486_v5 = vmul.f32 %v7240_v44, %v1460_v51  ;;  %v1436_v46 = vmul.f32 %v7216_v34, %v1414_v6  ;;  %v1558_v6 = vmul.f32 %v5994_v49, %v7136_v30  ;;  %v1599_v16 = vadd.f32 %v1591_v14, %v1547_v35 }
 0x573   :  { %v1392_v42 = vadd.f32 %v1384_v37, %v1340_v24  ;;  %v1593_v17 = vmul.f32 %v7300_v0, %v7132_v61  ;;  %v1688_v37 = vpop.f32.mrf.mxu0  ;;  %v1424_v57 = vsel %vm247_vm1, %v1404_v31, 0.0  ;;  %v1456_v61 = vmul.f32 %v7272_v52, %v7124_v41 }
 0x574   :  { %v1494_v51 = vadd.f32 %v1486_v5, %v1442_v45  ;;  %v1574_v53 = vsel %vm247_vm1, %v1558_v6, 0.0  ;;  %v1694_v32 = vadd.f32 %v5524_v11, %v1599_v16  ;;  %v1508_v52 = vmul.f32 %v7293_v9, %v7124_v41 }
 0x575   :  { %v1512_v38 = vpop.xlane.xlu1 %1511  ;;  %1471 = vadd.xlane.f32.xlu1 %v1470_v27  ;;  %v1466_v12 = vpop.xlane.xlu0 %1465  ;;  %1321 = vadd.xlane.f32.xlu0 %v1320_v47  ;;  %v1444_v23 = vadd.f32 %v1436_v46, %v1392_v42  ;;  %v1549_v47 = vadd.f32 %v1541_v56, %v1497_v25 }
 0x576   :  { %v1538_v21 = vmul.f32 %v7246_v62, %v1512_v38  ;;  %v1488_v19 = vmul.f32 %v7240_v44, %v1466_v12  ;;  %v1559_v38 = vmul.f32 %v5995_v40, %v7051_v59  ;;  %v1775_v42 = vpop.f32.mrf.mxu1  ;;  %v1528_v56 = vsel %vm247_vm1, %v1508_v52, 0.0 }
 0x577   :  { %v1601_v29 = vadd.f32 %v1593_v17, %v1549_v47 }
 0x578   :  { %v1546_v54 = vadd.f32 %v1538_v21, %v1494_v51  ;;  %v1496_v5 = vadd.f32 %v1488_v19, %v1444_v23  ;;  %v1476_v51 = vsel %vm247_vm1, %v1456_v61, 0.0 }
 0x579   :  { %v1564_v8 = vpop.xlane.xlu1 %1563  ;;  %1523 = vadd.xlane.f32.xlu1 %v1522_v39  ;;  %v1518_v63 = vpop.xlane.xlu0 %1517  ;;  %1373 = vadd.xlane.f32.xlu0 %v1372_v55  ;;  %v1577_v39 = vsel %vm247_vm1, %v1559_v38, 0.0  ;;  %v1781_v11 = vadd.f32 %v5531_v36, %v1601_v29  ;;  %v1561_v55 = vmul.f32 %v5995_v40, %v7063_v43 }
 0x57a   :  { %v1590_v15 = vmul.f32 %v7300_v0, %v1564_v8  ;;  %v1540_v27 = vmul.f32 %v7246_v62, %v1518_v63  ;;  %v1560_v8 = vmul.f32 %v5994_v49, %v7124_v41 }
 0x57c   :  { %v1598_v3 = vadd.f32 %v1590_v15, %v1546_v54  ;;  %v1548_v46 = vadd.f32 %v1540_v27, %v1496_v5  ;;  %v1580_v9 = vsel %vm247_vm1, %v1560_v8, 0.0 }
 0x57d   :  { %v1947_v12 = vpop.permute.xlu1 %1946  ;;  %1575 = vadd.xlane.f32.xlu1 %v1574_v53  ;;  %v1570_v24 = vpop.xlane.xlu0 %1569  ;;  %1425 = vadd.xlane.f32.xlu0 %v1424_v57 }
 0x57e   :  { %v1689_v45 = vadd.f32 %v1688_v37, %v1598_v3  ;;  %v1592_v21 = vmul.f32 %v7300_v0, %v1570_v24 }
 0x580   :  { %v1600_v14 = vadd.f32 %v1592_v21, %v1548_v46  ;;  %5543 = vmatprep.mubr.msk.f32.mxu1 %vm247_vm1, %v1689_v45 }
 0x581   :  { %5544 = vmatmul.mubr.msk.f32.vlgmr.msra.gmra.mxu1 %vm247_vm1, %v1694_v32  ;;  %1578 = vadd.xlane.f32.xlu1 %v1577_v39  ;;  %v2036_v19 = vpop.permute.xlu0 %2035  ;;  %v2034_v35 = vpop.permute.xlu1 %2033 }
 0x582   :  { %v1776_v6 = vadd.f32 %v1775_v42, %v1600_v14  ;;  %1477 = vadd.xlane.f32.xlu0 %v1476_v51  ;;  %5553 = vmatprep.subr.mxu1 %v2036_v19 }
 0x583   :  { %5557 = vmatprep.mubr.msk.f32.mxu1 %vm247_vm1, %v7124_v41  ;;  %5554 = vmatpush3.msra.mxu1 %v2036_v19 }
 0x584   :  { %5536 = vmatprep.mubr.msk.f32.mxu0 %vm247_vm1, %v1776_v6  ;;  %5555 = vmatprep.subr.mxu1 %v2034_v35 }
 0x585   :  { %5537 = vmatmul.mubr.msk.f32.vlgmr.msra.gmra.mxu0 %vm247_vm1, %v1781_v11  ;;  %5556 = vmatpush3.msra.mxu1 %v2034_v35 }
 0x586   :  { %1529 = vadd.xlane.f32.xlu0 %v1528_v56  ;;  %5547 = vmatpush3.msra.mxu0 %v6903_v7  ;;  %v1583_v7 = vsel %vm247_vm1, %v1561_v55, 0.0 }
 0x587   :  { %5548 = vmatprep.subr.mxu0 %v1947_v12  ;;  %5550 = vmatprep.mubr.msk.f32.mxu0 %vm247_vm1, %v7136_v30 }
 0x588   :  { %5558 = vmatmul.mubr.msk.f32.vlgmr.msra.gmra.mxu1 %vm247_vm1, %v7063_v43  ;;  %5549 = vmatpush3.msra.mxu0 %v1947_v12 }
 0x589   :  { %5551 = vmatmul.mubr.msk.f32.vlgmr.msra.gmra.mxu0 %vm247_vm1, %v7051_v59  ;;  %5560 = vmatprep.subr.mxu0 %v6893_v4 }
 0x58a   :  { %1581 = vadd.xlane.f32.xlu0 %v1580_v9  ;;  %5561 = vmatpush3.msra.mxu0 %v6893_v4 }
 0x58b   :  { %5562 = vmatprep.subr.mxu0 %v6897_v10  ;;  %5567 = vmatprep.subr.mxu1 %v7030_v58 }
 0x58c   :  { %5563 = vmatpush3.msra.mxu0 %v6897_v10  ;;  %5568 = vmatpush3.msra.mxu1 %v7030_v58 }
 0x58d   :  { %5569 = vmatprep.subr.mxu1 %v7036_v33 }
 0x58e   :  { %1584 = vadd.xlane.f32.xlu0 %v1583_v7  ;;  %5570 = vmatpush3.msra.mxu1 %v7036_v33 }
 0x5ca   :  { %v1171_v30 = vpop.xlane.xlu1 %1170 }
 0x5cb   :  { %v1187_v56 = vmul.f32 %v7174_v1, %v1171_v30 }
 0x5ce   :  { %v1177_v59 = vpop.xlane.xlu0 %1176  ;;  %v1215_v49 = vpop.xlane.xlu1 %1214 }
 0x5cf   :  { %v1231_v42 = vmul.f32 %v7158_v2, %v1215_v49  ;;  %v1189_v52 = vmul.f32 %v7174_v1, %v1177_v59 }
 0x5d1   :  { %v1239_v49 = vadd.f32 %v1231_v42, %v1187_v56 }
 0x5d2   :  { %v1221_v43 = vpop.xlane.xlu0 %1220  ;;  %v1267_v31 = vpop.xlane.xlu1 %1266 }
 0x5d3   :  { %v1233_v29 = vmul.f32 %v7158_v2, %v1221_v43  ;;  %v1283_v8 = vmul.f32 %v7177_v28, %v1267_v31 }
 0x5d5   :  { %v1241_v55 = vadd.f32 %v1233_v29, %v1189_v52 }
 0x5d6   :  { %v1273_v41 = vpop.xlane.xlu0 %1272  ;;  %v1319_v54 = vpop.xlane.xlu1 %1318 }
 0x5d7   :  { %v1285_v6 = vmul.f32 %v7177_v28, %v1273_v41  ;;  %v1335_v59 = vmul.f32 %v7188_v20, %v1319_v54 }
 0x5da   :  { %v1325_v4 = vpop.xlane.xlu0 %1324  ;;  %v1371_v15 = vpop.xlane.xlu1 %1370 }
 0x5db   :  { %v1337_v7 = vmul.f32 %v7188_v20, %v1325_v4  ;;  %v1387_v31 = vmul.f32 %v7208_v26, %v1371_v15 }
 0x5de   :  { %v1377_v63 = vpop.xlane.xlu0 %1376  ;;  %v1423_v27 = vpop.xlane.xlu1 %1422 }
 0x5e2   :  { %v1429_v23 = vpop.xlane.xlu0 %1428  ;;  %v7371_v16 = vpop.xlane.xlu1 %1474 }
 0x5e6   :  { %v1481_v10 = vpop.xlane.xlu0 %1480  ;;  %v7373_v33 = vpop.xlane.xlu1 %1526 }
 0x5ea   :  { %v7369_v58 = vpop.xlane.xlu0 %1532  ;;  %v1174_v37 = vpop.xlane.xlu1 %1173 }
 0x5eb   :  { %v1188_v11 = vmul.f32 %v7174_v1, %v1174_v37 }
 0x5ee   :  { %v1168_v25 = vpop.xlane.xlu0 %1167  ;;  %v1264_v3 = vpop.xlane.xlu1 %1263 }
 0x5ef   :  { %v1186_v45 = vmul.f32 %v7174_v1, %v1168_v25  ;;  %v1282_v32 = vmul.f32 %v7177_v28, %v1264_v3  ;;  %v1293_v25 = vadd.f32 %v1285_v6, %v1241_v55  ;;  %v1441_v3 = vmul.f32 %v7216_v34, %v1429_v23  ;;  %v7405_v23 = vld [vmem:[%s8831_s8] sm:$0xff] }
 0x5f0   :  { %v1543_v6 = vmul.f32 %v7246_v62, %v7373_v33 }
 0x5f2   :  { %v1212_v17 = vpop.xlane.xlu0 %1211  ;;  %v1316_v40 = vpop.xlane.xlu1 %1315 }
 0x5f3   :  { %v1230_v24 = vmul.f32 %v7158_v2, %v1212_v17  ;;  %v1334_v9 = vmul.f32 %v7188_v20, %v1316_v40  ;;  %v1389_v17 = vmul.f32 %v7208_v26, %v1377_v63  ;;  %v1439_v40 = vmul.f32 %v7216_v34, %v1423_v27 }
 0x5f4   :  { %v7409_v27 = vrot.slane %v7405_v23, %v7139_v60 }
 0x5f5   :  { %v1238_v21 = vadd.f32 %v1230_v24, %v1186_v45  ;;  %v1493_v45 = vmul.f32 %v7240_v44, %v1481_v10 }
 0x5f6   :  { %v1218_v36 = vpop.xlane.xlu0 %1217  ;;  %v1368_v47 = vpop.xlane.xlu1 %1367 }
 0x5f7   :  { %v1232_v14 = vmul.f32 %v7158_v2, %v1218_v36  ;;  %v1290_v51 = vadd.f32 %v1282_v32, %v1238_v21  ;;  %v1386_v37 = vmul.f32 %v7208_v26, %v1368_v47 }
 0x5f9   :  { %v1240_v2 = vadd.f32 %v1232_v14, %v1188_v11  ;;  %v1342_v41 = vadd.f32 %v1334_v9, %v1290_v51 }
 0x5fa   :  { %v1270_v5 = vpop.xlane.xlu0 %1269  ;;  %v1420_v57 = vpop.xlane.xlu1 %1419 }
 0x5fb   :  { %v1284_v35 = vmul.f32 %v7177_v28, %v1270_v5  ;;  %v1291_v28 = vadd.f32 %v1283_v8, %v1239_v49  ;;  %v1345_v5 = vadd.f32 %v1337_v7, %v1293_v25  ;;  %v1394_v63 = vadd.f32 %v1386_v37, %v1342_v41 }
 0x5fc   :  { %v1438_v24 = vmul.f32 %v7216_v34, %v1420_v57 }
 0x5fd   :  { %v1292_v36 = vadd.f32 %v1284_v35, %v1240_v2  ;;  %v1343_v54 = vadd.f32 %v1335_v59, %v1291_v28  ;;  %v8938_v28 = vld [vmem:[#allocation18_spill] sm:$0xff] }
 0x5fe   :  { %v1322_v53 = vpop.xlane.xlu0 %1321  ;;  %v1472_v46 = vpop.xlane.xlu1 %1471  ;;  %v1446_v14 = vadd.f32 %v1438_v24, %v1394_v63 }
 0x5ff   :  { %v1336_v43 = vmul.f32 %v7188_v20, %v1322_v53  ;;  %v1395_v47 = vadd.f32 %v1387_v31, %v1343_v54  ;;  %v1490_v32 = vmul.f32 %v7240_v44, %v1472_v46  ;;  %v1545_v46 = vmul.f32 %v7246_v62, %v7369_v58 }
 0x601   :  { %v1344_v53 = vadd.f32 %v1336_v43, %v1292_v36  ;;  %v1447_v29 = vadd.f32 %v1439_v40, %v1395_v47  ;;  %v1498_v56 = vadd.f32 %v1490_v32, %v1446_v14 }
 0x602   :  { %v1374_v38 = vpop.xlane.xlu0 %1373  ;;  %v1524_v19 = vpop.xlane.xlu1 %1523 }
 0x603   :  { %v1388_v1 = vmul.f32 %v7208_v26, %v1374_v38  ;;  %v1397_v38 = vadd.f32 %v1389_v17, %v1345_v5  ;;  %v1542_v42 = vmul.f32 %v7246_v62, %v1524_v19 }
 0x605   :  { %v1396_v21 = vadd.f32 %v1388_v1, %v1344_v53  ;;  %v1449_v10 = vadd.f32 %v1441_v3, %v1397_v38  ;;  %v1550_v43 = vadd.f32 %v1542_v42, %v1498_v56 }
 0x606   :  { %v1426_v12 = vpop.xlane.xlu0 %1425  ;;  %v1576_v4 = vpop.xlane.xlu1 %1575 }
 0x607   :  { %v1440_v20 = vmul.f32 %v7216_v34, %v1426_v12  ;;  %v1491_v34 = vmul.f32 %v7240_v44, %v7371_v16  ;;  %v1501_v11 = vadd.f32 %v1493_v45, %v1449_v10 }
 0x609   :  { %v1448_v12 = vadd.f32 %v1440_v20, %v1396_v21  ;;  %v1499_v58 = vadd.f32 %v1491_v34, %v1447_v29  ;;  %v1553_v2 = vadd.f32 %v1545_v46, %v1501_v11  ;;  %v8939_v20 = vld [vmem:[#allocation14_spill] sm:$0xff]  ;;  %v2367_v29 = vld [vmem:[#allocation7] sm:$0xff] }
 0x60a   :  { %v1579_v51 = vpop.xlane.xlu1 %1578 }
 0x60b   :  { %v1478_v61 = vpop.xlane.xlu0 %1477  ;;  %v1595_v55 = vmul.f32 %v7300_v0, %v1579_v51  ;;  %v1551_v59 = vadd.f32 %v1543_v6, %v1499_v58 }
 0x60c   :  { %v1492_v15 = vmul.f32 %v7240_v44, %v1478_v61 }
 0x60e   :  { %v1500_v35 = vadd.f32 %v1492_v15, %v1448_v12  ;;  %v2370_v12 = vld [vmem:[#allocation7 + $0x18] sm:$0xff] }
 0x60f   :  { %v1530_v39 = vpop.xlane.xlu0 %1529  ;;  %5574 = vmatprep.subr.mxu0 %v2370_v12 }
 0x610   :  { %v1544_v57 = vmul.f32 %v7246_v62, %v1530_v39  ;;  %v1594_v39 = vmul.f32 %v7300_v0, %v1576_v4 }
 0x612   :  { %v1552_v19 = vadd.f32 %v1544_v57, %v1500_v35  ;;  %v2369_v57 = vld [vmem:[#allocation7 + $0x10] sm:$0xff] }
 0x613   :  { %v1582_v30 = vpop.xlane.xlu0 %1581 }
 0x614   :  { %v1596_v44 = vmul.f32 %v7300_v0, %v1582_v30  ;;  %v1602_v30 = vadd.f32 %v1594_v39, %v1550_v43  ;;  %v8941_v39 = vld [vmem:[#allocation17_spill] sm:$0xff] }
 0x616   :  { %v1604_v41 = vadd.f32 %v1596_v44, %v1552_v19  ;;  %v8940_v44 = vld [vmem:[#allocation19_spill] sm:$0xff] }
 0x617   :  { %v1585_v61 = vpop.xlane.xlu0 %1584 }
 0x618   :  { %v1597_v8 = vmul.f32 %v7300_v0, %v1585_v61  ;;  %v1603_v0 = vadd.f32 %v1595_v55, %v1551_v59  ;;  %v2368_v61 = vld [vmem:[#allocation7 + $0x8] sm:$0xff]  ;;  %v7447_v59 = vrot.slane %v7405_v23, %v7161_v18 }
 0x61a   :  { %v1605_v17 = vadd.f32 %v1597_v8, %v1553_v2 }
 0x641   :  { %v5545_v26 = vpop.f32.mrf.mxu1 }
 0x643   :  { %v1937_v52 = vpop.f32.mrf.mxu1 }
 0x645   :  { %v5538_v16 = vpop.f32.mrf.mxu0 }
 0x646   :  { %v1943_v9 = vadd.f32 %v5545_v26, %v5538_v16 }
 0x647   :  { %v1856_v7 = vpop.f32.mrf.mxu0 }
 0x648   :  { %v2287_v62 = vadd.f32 %v7409_v27, %v1943_v9  ;;  %v5559_v33 = vpop.f32.mrf.mxu1  ;;  %v1938_v49 = vadd.f32 %v1937_v52, %v1856_v7 }
 0x649   :  { %v5552_v25 = vpop.f32.mrf.mxu0  ;;  %v2117_v5 = vadd.f32 %v5559_v33, %v1605_v17 }
 0x64a   :  { %v2286_v36 = vadd.f32 %v7409_v27, %v1938_v49  ;;  %v2111_v1 = vpop.f32.mrf.mxu1  ;;  %v2291_v31 = vadd.f32 %v2287_v62, %v8938_v28  ;;  %v2030_v40 = vadd.f32 %v5552_v25, %v1603_v0 }
 0x64b   :  { %v2112_v37 = vadd.f32 %v2111_v1, %v1604_v41  ;;  %v2024_v4 = vpop.f32.mrf.mxu0 }
 0x64c   :  { %v2025_v3 = vadd.f32 %v2024_v4, %v1602_v30  ;;  %v2297_v53 = vsel %vm143_vm0, %v2291_v31, 0.0  ;;  %v2290_v54 = vadd.f32 %v2286_v36, %v8939_v20  ;;  %v8942_v30 = vld [vmem:[#allocation12_spill] sm:$0xff] }
 0x64d   :  { %5564 = vmatprep.mubr.msk.f32.mxu0 %vm247_vm1, %v2112_v37  ;;  %2298 = vadd.xlane.f32.xlu0 %v2297_v53 }
 0x64e   :  { %5565 = vmatmul.mubr.msk.f32.vlgmr.msra.gmra.mxu0 %vm247_vm1, %v2117_v5  ;;  %5571 = vmatprep.mubr.msk.f32.mxu1 %vm247_vm1, %v2025_v3  ;;  %v2294_v63 = vsel %vm143_vm0, %v2290_v54, 0.0 }
 0x64f   :  { %2295 = vadd.xlane.f32.xlu1 %v2294_v63  ;;  %5572 = vmatmul.mubr.msk.f32.vlgmr.msra.gmra.mxu1 %vm247_vm1, %v2030_v40 }
 0x650   :  { %5575 = vmatpush3.msra.mxu0 %v2370_v12 }
 0x651   :  { %5576 = vmatprep.subr.mxu0 %v2369_v57 }
 0x652   :  { %5577 = vmatpush3.msra.mxu0 %v2369_v57 }
 0x653   :  { %5578 = vmatprep.subr.mxu0 %v2368_v61 }
 0x654   :  { %5579 = vmatpush3.msra.mxu0 %v2368_v61 }
 0x655   :  { %5580 = vmatprep.subr.mxu0 %v2367_v29 }
 0x656   :  { %5581 = vmatpush3.msra.mxu0 %v2367_v29 }
 0x6d6   :  { %v2299_v24 = vpop.xlane.xlu0 %2298 }
 0x6d7   :  { %v2308_v38 = vmul.f32 0.03125, %v2299_v24 }
 0x6d8   :  { %v2296_v45 = vpop.xlane.xlu1 %2295 }
 0x6d9   :  { %v2312_v21 = vsub.f32 %v2291_v31, %v2308_v38  ;;  %v2307_v15 = vmul.f32 0.03125, %v2296_v45  ;;  %v8943_v31 = vld [vmem:[#allocation15_spill] sm:$0xff]  ;;  %v2486_v45 = vld [vmem:[%s8830_s7 + $0x30] sm:$0xff] }
 0x6da   :  { %v2487_v38 = vld [vmem:[%s8830_s7 + $0x38] sm:$0xff] }
 0x6db   :  { %v2311_v26 = vsub.f32 %v2290_v54, %v2307_v15  ;;  %v2316_v47 = vmul.f32 %v2312_v21, %v2312_v21  ;;  %5588 = vmatprep.subr.mxu1 %v2487_v38  ;;  %v2484_v15 = vld [vmem:[%s8830_s7 + $0x20] sm:$0xff] }
 0x6dc   :  { %5589 = vmatpush3.msra.mxu1 %v2487_v38 }
 0x6dd   :  { %v2322_v32 = vsel %vm143_vm0, %v2316_v47, 0.0  ;;  %v2315_v34 = vmul.f32 %v2311_v26, %v2311_v26  ;;  %5590 = vmatprep.subr.mxu1 %v2486_v45  ;;  %v2482_v47 = vld [vmem:[%s8830_s7 + $0x10] sm:$0xff] }
 0x6de   :  { %2323 = vadd.xlane.f32.xlu0 %v2322_v32  ;;  %5591 = vmatpush3.msra.mxu1 %v2486_v45  ;;  %v2481_v32 = vld [vmem:[%s8830_s7 + $0x8] sm:$0xff] }
 0x6df   :  { %v2319_v10 = vsel %vm143_vm0, %v2315_v34, 0.0  ;;  %v2480_v34 = vld [vmem:[%s8830_s7] sm:$0xff] }
 0x6e0   :  { %2320 = vadd.xlane.f32.xlu1 %v2319_v10 }
 0x70e   :  { %v5566_v46 = vpop.f32.mrf.mxu0 }
 0x70f   :  { %v5573_v14 = vpop.f32.mrf.mxu1 }
 0x710   :  { %v2279_v42 = vadd.f32 %v5573_v14, %v5566_v46  ;;  %v2192_v51 = vpop.f32.mrf.mxu0  ;;  %v2374_v14 = vrot.slane %v7405_v23, %v7180_v48 }
 0x711   :  { %v2273_v52 = vpop.f32.mrf.mxu1 }
 0x712   :  { %v2289_v6 = vadd.f32 %v7409_v27, %v2279_v42  ;;  %v2274_v11 = vadd.f32 %v2273_v52, %v2192_v51 }
 0x714   :  { %v2288_v35 = vadd.f32 %v7409_v27, %v2274_v11  ;;  %v2293_v16 = vadd.f32 %v2289_v6, %v8940_v44  ;;  %v7443_v27 = vrot.slane %v7405_v23, %v7152_v13 }
 0x716   :  { %v2303_v56 = vsel %vm143_vm0, %v2293_v16, 0.0  ;;  %v2292_v8 = vadd.f32 %v2288_v35, %v8941_v39 }
 0x717   :  { %2304 = vadd.xlane.f32.xlu0 %v2303_v56 }
 0x718   :  { %v2300_v9 = vsel %vm143_vm0, %v2292_v8, 0.0 }
 0x719   :  { %2301 = vadd.xlane.f32.xlu1 %v2300_v9 }
 0x767   :  { %v2324_v58 = vpop.xlane.xlu0 %2323 }
 0x768   :  { %v2332_v55 = vmul.f32 0.03125, %v2324_v58 }
 0x769   :  { %v2321_v19 = vpop.xlane.xlu1 %2320 }
 0x76a   :  { %v2336_v7 = vadd.f32 1e-05, %v2332_v55  ;;  %v2331_v2 = vmul.f32 0.03125, %v2321_v19 }
 0x76c   :  { %5921 = vrsqrt.f32 %v2336_v7  ;;  %v2335_v43 = vadd.f32 1e-05, %v2331_v2  ;;  %v8944_v7 = vld [vmem:[#allocation13_spill] sm:$0xff] }
 0x76e   :  { %5923 = vrsqrt.f32 %v2335_v43 }
 0x779   :  { %v5922_v62 = vpop.eup %5921 }
 0x77a   :  { %v2344_v33 = vmul.f32 %v5922_v62, %v2312_v21  ;;  %v2485_v21 = vld [vmem:[%s8830_s7 + $0x28] sm:$0xff]  ;;  %v8945_v62 = vld [vmem:[#allocation16_spill] sm:$0xff] }
 0x77b   :  { %v5924_v49 = vpop.eup %5923  ;;  %5592 = vmatprep.subr.mxu1 %v2485_v21 }
 0x77c   :  { %v2343_v41 = vmul.f32 %v5924_v49, %v2311_v26  ;;  %v2352_v25 = vmul.f32 %v7443_v27, %v2344_v33  ;;  %5593 = vmatpush3.msra.mxu1 %v2485_v21  ;;  %v2483_v26 = vld [vmem:[%s8830_s7 + $0x18] sm:$0xff] }
 0x77d   :  { %5594 = vmatprep.subr.mxu1 %v2484_v15 }
 0x77e   :  { %v2351_v17 = vmul.f32 %v7443_v27, %v2343_v41  ;;  %v7452_v36 = vadd.f32 %v7447_v59, %v2352_v25  ;;  %5595 = vmatpush3.msra.mxu1 %v2484_v15 }
 0x77f   :  { %5596 = vmatprep.subr.mxu1 %v2483_v26 }
 0x780   :  { %v7455_v1 = vadd.f32 %v7447_v59, %v2351_v17  ;;  %v2364_v37 = vmul.f32 %v7452_v36, %v8943_v31  ;;  %5597 = vmatpush3.msra.mxu1 %v2483_v26 }
 0x781   :  { %5598 = vmatprep.subr.mxu1 %v2482_v47 }
 0x782   :  { %v2363_v28 = vmul.f32 %v7455_v1, %v8942_v30  ;;  %5599 = vmatpush3.msra.mxu1 %v2482_v47 }
 0x783   :  { %5600 = vmatprep.subr.mxu1 %v2481_v32 }
 0x784   :  { %5582 = vmatprep.mubr.msk.f32.mxu0 %vm143_vm0, %v2363_v28  ;;  %5601 = vmatpush3.msra.mxu1 %v2481_v32 }
 0x785   :  { %5583 = vmatmul.mubr.msk.f32.vlgmr.msra.gmra.mxu0 %vm143_vm0, %v2364_v37  ;;  %5602 = vmatprep.subr.mxu1 %v2480_v34 }
 0x786   :  { %5603 = vmatpush3.msra.mxu1 %v2480_v34 }
 0x7a0   :  { %v2305_v0 = vpop.xlane.xlu0 %2304 }
 0x7a1   :  { %v2310_v4 = vmul.f32 0.03125, %v2305_v0 }
 0x7a2   :  { %v2302_v5 = vpop.xlane.xlu1 %2301 }
 0x7a3   :  { %v2314_v3 = vsub.f32 %v2293_v16, %v2310_v4  ;;  %v2309_v53 = vmul.f32 0.03125, %v2302_v5 }
 0x7a5   :  { %v2313_v20 = vsub.f32 %v2292_v8, %v2309_v53  ;;  %v2318_v54 = vmul.f32 %v2314_v3, %v2314_v3 }
 0x7a7   :  { %v2328_v40 = vsel %vm143_vm0, %v2318_v54, 0.0  ;;  %v2317_v63 = vmul.f32 %v2313_v20, %v2313_v20 }
 0x7a8   :  { %2329 = vadd.xlane.f32.xlu0 %v2328_v40 }
 0x7a9   :  { %v2325_v24 = vsel %vm143_vm0, %v2317_v63, 0.0 }
 0x7aa   :  { %2326 = vadd.xlane.f32.xlu1 %v2325_v24 }
 0x831   :  { %v2330_v10 = vpop.xlane.xlu0 %2329 }
 0x832   :  { %v2334_v12 = vmul.f32 0.03125, %v2330_v10 }
 0x833   :  { %v2327_v57 = vpop.xlane.xlu1 %2326 }
 0x834   :  { %v2338_v61 = vadd.f32 1e-05, %v2334_v12  ;;  %v2333_v29 = vmul.f32 0.03125, %v2327_v57  ;;  %v5270_v12 = vld [vmem:[%s8827_s4 + $0x38] sm:$0xff]  ;;  %v5269_v57 = vld [vmem:[%s8827_s4 + $0x30] sm:$0xff] }
 0x835   :  { %5610 = vmatprep.subr.mxu0 %v5270_v12 }
 0x836   :  { %5925 = vrsqrt.f32 %v2338_v61  ;;  %v2337_v46 = vadd.f32 1e-05, %v2333_v29  ;;  %5611 = vmatpush3.msra.mxu0 %v5270_v12  ;;  %v5268_v61 = vld [vmem:[%s8827_s4 + $0x28] sm:$0xff]  ;;  %v5267_v29 = vld [vmem:[%s8827_s4 + $0x20] sm:$0xff] }
 0x837   :  { %5612 = vmatprep.subr.mxu0 %v5269_v57 }
 0x838   :  { %5927 = vrsqrt.f32 %v2337_v46  ;;  %5613 = vmatpush3.msra.mxu0 %v5269_v57 }
 0x839   :  { %5614 = vmatprep.subr.mxu0 %v5268_v61 }
 0x83a   :  { %5615 = vmatpush3.msra.mxu0 %v5268_v61 }
 0x83b   :  { %5616 = vmatprep.subr.mxu0 %v5267_v29 }
 0x83c   :  { %5617 = vmatpush3.msra.mxu0 %v5267_v29 }
 0x843   :  { %v5926_v42 = vpop.eup %5925 }
 0x844   :  { %v2346_v51 = vmul.f32 %v5926_v42, %v2314_v3 }
 0x845   :  { %v5928_v52 = vpop.eup %5927  ;;  %v5584_v6 = vpop.f32.mrf.mxu0 }
 0x846   :  { %v2459_v11 = vadd.f32 %v5584_v6, %v2374_v14  ;;  %v2345_v35 = vmul.f32 %v5928_v52, %v2313_v20  ;;  %v2354_v44 = vmul.f32 %v7443_v27, %v2346_v51 }
 0x847   :  { %v2453_v16 = vpop.f32.mrf.mxu0 }
 0x848   :  { %v2454_v56 = vadd.f32 %v2453_v16, %v2374_v14  ;;  %v2353_v39 = vmul.f32 %v7443_v27, %v2345_v35  ;;  %v2473_v8 = vmax.f32 %v2459_v11, 0.0  ;;  %v7494_v9 = vadd.f32 %v7447_v59, %v2354_v44 }
 0x849   :  { %v2491_v27 = vrot.slane %v7405_v23, %v7183_v50 }
 0x84a   :  { %v2472_v58 = vmax.f32 %v2454_v56, 0.0  ;;  %v7497_v55 = vadd.f32 %v7447_v59, %v2353_v39  ;;  %v2477_v43 = vmul.f32 %v2473_v8, %v8943_v31  ;;  %v2366_v33 = vmul.f32 %v7494_v9, %v8945_v62 }
 0x84c   :  { %v2476_v19 = vmul.f32 %v2472_v58, %v8942_v30  ;;  %v2365_v2 = vmul.f32 %v7497_v55, %v8944_v7 }
 0x84e   :  { %5585 = vmatprep.mubr.msk.f32.mxu0 %vm143_vm0, %v2365_v2  ;;  %5604 = vmatprep.mubr.msk.f32.mxu1 %vm2492_vm10, %v2476_v19 }
 0x84f   :  { %5586 = vmatmul.mubr.msk.f32.gmra.mxu0 %vm143_vm0, %v2366_v33  ;;  %5605 = vmatmul.mubr.msk.f32.vlgmr.msra.gmra.mxu1 %vm2492_vm10, %v2477_v43 }
 0x90f   :  { %v5587_v49 = vpop.f32.mrf.mxu0  ;;  %v5606_v59 = vpop.f32.mrf.mxu1 }
 0x910   :  { %v2469_v41 = vadd.f32 %v5587_v49, %v2374_v14  ;;  %v2577_v25 = vadd.f32 %v5606_v59, %v2491_v27 }
 0x911   :  { %v2463_v17 = vpop.f32.mrf.mxu0  ;;  %v2571_v28 = vpop.f32.mrf.mxu1 }
 0x912   :  { %v2591_v37 = vmul.f32 %v2577_v25, %v8943_v31  ;;  %v2464_v0 = vadd.f32 %v2463_v17, %v2374_v14  ;;  %v2572_v4 = vadd.f32 %v2571_v28, %v2491_v27  ;;  %v2475_v5 = vmax.f32 %v2469_v41, 0.0 }
 0x914   :  { %v2474_v3 = vmax.f32 %v2464_v0, 0.0  ;;  %v2590_v53 = vmul.f32 %v2572_v4, %v8942_v30  ;;  %v2595_v20 = vadd.f32 %v2591_v37, %v7452_v36  ;;  %v2479_v24 = vmul.f32 %v2475_v5, %v8945_v62 }
 0x916   :  { %v2478_v54 = vmul.f32 %v2474_v3, %v8944_v7  ;;  %v2601_v40 = vsel %vm143_vm0, %v2595_v20, 0.0  ;;  %v2594_v63 = vadd.f32 %v2590_v53, %v7455_v1 }
 0x917   :  { %2602 = vadd.xlane.f32.xlu0 %v2601_v40 }
 0x918   :  { %5607 = vmatprep.mubr.msk.f32.mxu1 %vm2492_vm10, %v2478_v54  ;;  %v2598_v38 = vsel %vm143_vm0, %v2594_v63, 0.0 }
 0x919   :  { %2599 = vadd.xlane.f32.xlu1 %v2598_v38  ;;  %5608 = vmatmul.mubr.msk.f32.gmra.mxu1 %vm2492_vm10, %v2479_v24 }
 0x9a0   :  { %v2603_v45 = vpop.xlane.xlu0 %2602 }
 0x9a1   :  { %v2611_v21 = vmul.f32 0.03125, %v2603_v45 }
 0x9a2   :  { %v2600_v15 = vpop.xlane.xlu1 %2599 }
 0x9a3   :  { %v2615_v36 = vsub.f32 %v2595_v20, %v2611_v21  ;;  %v2610_v26 = vmul.f32 0.03125, %v2600_v15 }
 0x9a5   :  { %v2614_v47 = vsub.f32 %v2594_v63, %v2610_v26  ;;  %v2619_v32 = vmul.f32 %v2615_v36, %v2615_v36  ;;  %v8949_v26 = vld [vmem:[#allocation21_spill] sm:$0xff] }
 0x9a7   :  { %v2625_v34 = vsel %vm143_vm0, %v2619_v32, 0.0  ;;  %v2618_v1 = vmul.f32 %v2614_v47, %v2614_v47 }
 0x9a8   :  { %2626 = vadd.xlane.f32.xlu0 %v2625_v34 }
 0x9a9   :  { %v2622_v10 = vsel %vm143_vm0, %v2618_v1, 0.0 }
 0x9aa   :  { %2623 = vadd.xlane.f32.xlu1 %v2622_v10 }
 0x9d9   :  { %v5609_v46 = vpop.f32.mrf.mxu1 }
 0x9da   :  { %v2587_v14 = vadd.f32 %v5609_v46, %v2491_v27 }
 0x9db   :  { %v2581_v42 = vpop.f32.mrf.mxu1 }
 0x9dc   :  { %v2593_v51 = vmul.f32 %v2587_v14, %v8945_v62  ;;  %v2582_v52 = vadd.f32 %v2581_v42, %v2491_v27 }
 0x9de   :  { %v2592_v6 = vmul.f32 %v2582_v52, %v8944_v7  ;;  %v2597_v11 = vadd.f32 %v2593_v51, %v7494_v9  ;;  %v2653_v9 = vrot.slane %v7405_v23, %v7211_v22  ;;  %v8952_v52 = vmov 96  }
 0x9e0   :  { %v2607_v35 = vsel %vm143_vm0, %v2597_v11, 0.0  ;;  %v2596_v44 = vadd.f32 %v2592_v6, %v7497_v55  ;;  %v8946_v55 = vld [vmem:[#allocation35_spill] sm:$0xff]  ;;  %v8953_v6 = vmov 97  }
 0x9e1   :  { %2608 = vadd.xlane.f32.xlu0 %v2607_v35  ;;  %v2661_v59 = vrot.slane %v7405_v23, %v8946_v55  ;;  %v8955_v35 = vmov 100  }
 0x9e2   :  { %v2604_v16 = vsel %vm143_vm0, %v2596_v44, 0.0 }
 0x9e3   :  { %2605 = vadd.xlane.f32.xlu1 %v2604_v16  ;;  %v8957_v16 = vmov 102  }
 0xa31   :  { %v2627_v56 = vpop.xlane.xlu0 %2626 }
 0xa32   :  { %v2635_v39 = vmul.f32 0.03125, %v2627_v56  ;;  %v8958_v56 = vmov 104  }
 0xa33   :  { %v2624_v8 = vpop.xlane.xlu1 %2623 }
 0xa34   :  { %v2639_v58 = vadd.f32 1e-05, %v2635_v39  ;;  %v2634_v19 = vmul.f32 0.03125, %v2624_v8  ;;  %v8959_v39 = vmov 101   ;;  %v8960_v8 = vmov 103  }
 0xa36   :  { %5929 = vrsqrt.f32 %v2639_v58  ;;  %v2638_v2 = vadd.f32 1e-05, %v2634_v19 }
 0xa38   :  { %5931 = vrsqrt.f32 %v2638_v2 }
 0xa43   :  { %v5930_v43 = vpop.eup %5929 }
 0xa44   :  { %v2647_v33 = vmul.f32 %v5930_v43, %v2615_v36  ;;  %v5264_v36 = vld [vmem:[%s8831_s8 + $0x18] sm:$0xff] }
 0xa45   :  { %v5932_v27 = vpop.eup %5931 }
 0xa46   :  { %v2646_v49 = vmul.f32 %v5932_v27, %v2614_v47  ;;  %v2655_v41 = vmul.f32 %v2653_v9, %v2647_v33  ;;  %v7559_v47 = vrot.slane %v5264_v36, %v8949_v26 }
 0xa48   :  { %v2654_v25 = vmul.f32 %v2653_v9, %v2646_v49  ;;  %v7547_v28 = vadd.f32 %v2661_v59, %v2655_v41 }
 0xa4a   :  { %v7545_v17 = vadd.f32 %v2661_v59, %v2654_v25  ;;  %8948 = vst [vmem:[#allocation14_spill] sm:$0xff] %v7547_v28 }
 0xa4c   :  { %8947 = vst [vmem:[#allocation18_spill] sm:$0xff] %v7545_v17  ;;  %5618 = vmatprep.mubr.msk.f32.mxu0 %vm143_vm0, %v7545_v17 }
 0xa4d   :  { %5619 = vmatmul.mubr.msk.f32.vlgmr.msra.gmra.mxu0 %vm143_vm0, %v7547_v28  ;;  %v7798_v28 = vld [vmem:[%s8826_s3 + $0x8] sm:$0xff] }
 0xa6a   :  { %v2609_v37 = vpop.xlane.xlu0 %2608 }
 0xa6b   :  { %v2613_v0 = vmul.f32 0.03125, %v2609_v37 }
 0xa6c   :  { %v2606_v4 = vpop.xlane.xlu1 %2605 }
 0xa6d   :  { %v2617_v5 = vsub.f32 %v2597_v11, %v2613_v0  ;;  %v2612_v3 = vmul.f32 0.03125, %v2606_v4  ;;  %v8954_v11 = vmov 98  }
 0xa6f   :  { %v2616_v53 = vsub.f32 %v2596_v44, %v2612_v3  ;;  %v2621_v20 = vmul.f32 %v2617_v5, %v2617_v5  ;;  %v8956_v44 = vmov 99  }
 0xa71   :  { %v2631_v23 = vsel %vm143_vm0, %v2621_v20, 0.0  ;;  %v2620_v54 = vmul.f32 %v2616_v53, %v2616_v53 }
 0xa72   :  { %2632 = vadd.xlane.f32.xlu0 %v2631_v23 }
 0xa73   :  { %v2628_v40 = vsel %vm143_vm0, %v2620_v54, 0.0 }
 0xa74   :  { %2629 = vadd.xlane.f32.xlu1 %v2628_v40 }
 0xafb   :  { %v2633_v63 = vpop.xlane.xlu0 %2632 }
 0xafc   :  { %v2637_v24 = vmul.f32 0.03125, %v2633_v63 }
 0xafd   :  { %v2630_v38 = vpop.xlane.xlu1 %2629 }
 0xafe   :  { %v2641_v45 = vadd.f32 1e-05, %v2637_v24  ;;  %v2636_v21 = vmul.f32 0.03125, %v2630_v38 }
 0xb00   :  { %5933 = vrsqrt.f32 %v2641_v45  ;;  %v2640_v15 = vadd.f32 1e-05, %v2636_v21 }
 0xb02   :  { %5935 = vrsqrt.f32 %v2640_v15 }
 0xb0d   :  { %v5934_v32 = vpop.eup %5933  ;;  %v5620_v34 = vpop.f32.mrf.mxu0 }
 0xb0e   :  { %v7562_v1 = vadd.f32 %v5620_v34, %v7559_v47  ;;  %v2649_v10 = vmul.f32 %v5934_v32, %v2617_v5 }
 0xb0f   :  { %v5936_v12 = vpop.eup %5935  ;;  %v2757_v57 = vpop.f32.mrf.mxu0 }
 0xb10   :  { %2780 = vrot.lane.b32.xlu1 %v7562_v1, %s6129_s22  ;;  %2871 = vrot.lane.b32.xlu0 %v7562_v1, %s6128_s21  ;;  %v2648_v61 = vmul.f32 %v5936_v12, %v2616_v53  ;;  %v2657_v29 = vmul.f32 %v2653_v9, %v2649_v10  ;;  %v7569_v46 = vadd.f32 %v2757_v57, %v7559_v47 }
 0xb12   :  { %v2656_v14 = vmul.f32 %v2653_v9, %v2648_v61  ;;  %v7576_v51 = vadd.f32 %v2661_v59, %v2657_v29 }
 0xb14   :  { %2778 = vrot.lane.b32.xlu1 %v7569_v46, %s6129_s22  ;;  %3437 = vperm.xlu0 %5833, %v7562_v1   ;;  %v7574_v42 = vadd.f32 %v2661_v59, %v2656_v14  ;;  %8951 = vst [vmem:[#allocation17_spill] sm:$0xff] %v7576_v51 }
 0xb16   :  { %8950 = vst [vmem:[#allocation19_spill] sm:$0xff] %v7574_v42  ;;  %5621 = vmatprep.mubr.msk.f32.mxu0 %vm143_vm0, %v7574_v42 }
 0xb17   :  { %5622 = vmatmul.mubr.msk.f32.gmra.mxu0 %vm143_vm0, %v7576_v51 }
 0xb18   :  { %2869 = vrot.lane.b32.xlu1 %v7569_v46, %s6128_s21  ;;  %4139 = vrot.lane.b32.xlu0 %v7562_v1, %s6132_s24 }
 0xb19   :  { %5628 = vmatprep.mubr.msk.f32.mxu0 %vm247_vm1, %v7569_v46  ;;  %5836 = vset.pattern.permute.xlu0 %v8952_v52 }
 0xb1c   :  { %2867 = vrot.lane.b32.xlu1 %v7562_v1, %s6130_s23  ;;  %2865 = vrot.lane.b32.xlu0 %v7569_v46, %s6130_s23 }
 0xb20   :  { %3138 = vrot.lane.b32.xlu1 %v7562_v1, %s6131_s5  ;;  %3136 = vrot.lane.b32.xlu0 %v7569_v46, %s6131_s5 }
 0xb24   :  { %3149 = vperm.xlu1 %5827, %v7562_v1   ;;  %3145 = vperm.xlu0 %5836, %v7569_v46  }
 0xb28   :  { %5828 = vset.pattern.permute.xlu1 %v8953_v6  ;;  %5838 = vset.pattern.permute.xlu0 %v8954_v11 }
 0xb29   :  { %3197 = vperm.xlu1 %5828, %v7562_v1   ;;  %3241 = vperm.xlu0 %5838, %v7569_v46  }
 0xb2d   :  { %5829 = vset.pattern.permute.xlu1 %v8954_v11  ;;  %5840 = vset.pattern.permute.xlu0 %v8955_v35 }
 0xb2e   :  { %3245 = vperm.xlu1 %5829, %v7562_v1   ;;  %3337 = vperm.xlu0 %5840, %v7569_v46  }
 0xb32   :  { %5830 = vset.pattern.permute.xlu1 %v8956_v44  ;;  %5842 = vset.pattern.permute.xlu0 %v8957_v16 }
 0xb33   :  { %3293 = vperm.xlu1 %5830, %v7562_v1   ;;  %3433 = vperm.xlu0 %5842, %v7569_v46  }
 0xb37   :  { %5831 = vset.pattern.permute.xlu1 %v8955_v35  ;;  %5844 = vset.pattern.permute.xlu0 %v8958_v56 }
 0xb38   :  { %3341 = vperm.xlu1 %5831, %v7562_v1   ;;  %3529 = vperm.xlu0 %5844, %v7569_v46  }
 0xb3c   :  { %5832 = vset.pattern.permute.xlu1 %v8959_v39  ;;  %5845 = vset.pattern.permute.xlu0 %v8952_v52 }
 0xb3d   :  { %3389 = vperm.xlu1 %5832, %v7562_v1  }
 0xb41   :  { %5834 = vset.pattern.permute.xlu1 %v8960_v8 }
 0xb42   :  { %3485 = vperm.xlu1 %5834, %v7562_v1  }
 0xb46   :  { %5835 = vset.pattern.permute.xlu1 %v8958_v56 }
 0xb47   :  { %3533 = vperm.xlu1 %5835, %v7562_v1  }
 0xb4b   :  { %5837 = vset.pattern.permute.xlu1 %v8953_v6 }
 0xb4c   :  { %3193 = vperm.xlu1 %5837, %v7569_v46  }
 0xb50   :  { %5839 = vset.pattern.permute.xlu1 %v8956_v44 }
 0xb51   :  { %3289 = vperm.xlu1 %5839, %v7569_v46  }
 0xb55   :  { %5841 = vset.pattern.permute.xlu1 %v8959_v39 }
 0xb56   :  { %3385 = vperm.xlu1 %5841, %v7569_v46  }
 0xb5a   :  { %5843 = vset.pattern.permute.xlu1 %v8960_v8 }
 0xb5b   :  { %3481 = vperm.xlu1 %5843, %v7569_v46  }
 0xb5f   :  { %5846 = vset.pattern.permute.xlu1 %v8953_v6 }
 0xb82   :  { %v2781_v58 = vpop.permute.xlu1 %2780  ;;  %v2872_v19 = vpop.permute.xlu0 %2871 }
 0xb83   :  { %5624 = vmatprep.subr.msk.mxu0 %vm247_vm1, %v2781_v58  ;;  %5631 = vmatprep.subr.msk.mxu1 %vm247_vm1, %v2872_v19 }
 0xb84   :  { %5625 = vmatpush3.xpose.msk.msra.mxu0 %vm247_vm1, %v2781_v58  ;;  %5632 = vmatpush3.xpose.msk.msra.mxu1 %vm247_vm1, %v2872_v19 }
 0xb86   :  { %v2779_v2 = vpop.permute.xlu1 %2778 }
 0xb87   :  { %5626 = vmatprep.subr.msk.mxu0 %vm247_vm1, %v2779_v2 }
 0xb88   :  { %5627 = vmatpush3.xpose.msk.msra.mxu0 %vm247_vm1, %v2779_v2 }
 0xb8a   :  { %v2870_v43 = vpop.permute.xlu1 %2869 }
 0xb8b   :  { %5629 = vmatmul.mubr.msk.f32.vlgmr.msra.gmra.mxu0 %vm247_vm1, %v7562_v1  ;;  %5633 = vmatprep.subr.msk.mxu1 %vm247_vm1, %v2870_v43 }
 0xb8c   :  { %5634 = vmatpush3.xpose.msk.msra.mxu1 %vm247_vm1, %v2870_v43 }
 0xb8e   :  { %v2868_v9 = vpop.permute.xlu1 %2867 }
 0xb8f   :  { %v7641_v33 = vpop.permute.xlu0 %3437 }
 0xb92   :  { %v3139_v27 = vpop.permute.xlu1 %3138 }
 0xb93   :  { %3205 = vperm.xlu1 %5846, %v3139_v27   ;;  %3157 = vperm.xlu0 %5845, %v3139_v27   ;;  %v7643_v49 = vpop.permute.xlu0 %4139 }
 0xb97   :  { %5848 = vset.pattern.permute.xlu1 %v8956_v44  ;;  %5847 = vset.pattern.permute.xlu0 %v8954_v11  ;;  %v2866_v59 = vpop.permute.xlu0 %2865 }
 0xb98   :  { %3301 = vperm.xlu1 %5848, %v3139_v27   ;;  %3253 = vperm.xlu0 %5847, %v3139_v27  }
 0xb99   :  { %5635 = vmatprep.mubr.msk.f32.mxu1 %vm247_vm1, %v2866_v59 }
 0xb9a   :  { %5636 = vmatmul.mubr.msk.f32.vlgmr.msra.gmra.mxu1 %vm247_vm1, %v2868_v9 }
 0xb9b   :  { %v3137_v41 = vpop.permute.xlu0 %3136 }
 0xb9c   :  { %5850 = vset.pattern.permute.xlu1 %v8959_v39  ;;  %5849 = vset.pattern.permute.xlu0 %v8955_v35 }
 0xb9d   :  { %3397 = vperm.xlu1 %5850, %v3139_v27   ;;  %3349 = vperm.xlu0 %5849, %v3139_v27  }
 0xb9f   :  { %v7665_v25 = vpop.permute.xlu1 %3149  ;;  %v7724_v38 = vpop.permute.xlu0 %3145 }
 0xba0   :  { %v3177_v55 = vmul.f32 %v7798_v28, %v7665_v25  ;;  %v7812_v25 = vld [vmem:[%s8826_s3 + $0x18] sm:$0xff] }
 0xba1   :  { %5851 = vset.pattern.permute.xlu1 %v8957_v16  ;;  %5853 = vset.pattern.permute.xlu0 %v8958_v56 }
 0xba2   :  { %3445 = vperm.xlu1 %5851, %v3139_v27   ;;  %3541 = vperm.xlu0 %5853, %v3139_v27  }
 0xba4   :  { %v7667_v37 = vpop.permute.xlu1 %3197  ;;  %v7730_v21 = vpop.permute.xlu0 %3241 }
 0xba6   :  { %5852 = vset.pattern.permute.xlu1 %v8960_v8  ;;  %5855 = vset.pattern.permute.xlu0 %v8953_v6 }
 0xba7   :  { %3493 = vperm.xlu1 %5852, %v3139_v27   ;;  %3201 = vperm.xlu0 %5855, %v3137_v41  }
 0xba9   :  { %v7669_v4 = vpop.permute.xlu1 %3245  ;;  %v7736_v36 = vpop.permute.xlu0 %3337 }
 0xbab   :  { %5854 = vset.pattern.permute.xlu1 %v8952_v52  ;;  %5857 = vset.pattern.permute.xlu0 %v8956_v44 }
 0xbac   :  { %3297 = vperm.xlu0 %5857, %v3137_v41   ;;  %3153 = vperm.xlu1 %5854, %v3137_v41  }
 0xbae   :  { %v7683_v20 = vpop.permute.xlu1 %3293  ;;  %v7743_v34 = vpop.permute.xlu0 %3433 }
 0xbb0   :  { %5859 = vset.pattern.permute.xlu0 %v8959_v39  ;;  %5856 = vset.pattern.permute.xlu1 %v8954_v11 }
 0xbb1   :  { %3393 = vperm.xlu0 %5859, %v3137_v41   ;;  %3249 = vperm.xlu1 %5856, %v3137_v41  }
 0xbb3   :  { %v7693_v23 = vpop.permute.xlu1 %3341  ;;  %v7747_v10 = vpop.permute.xlu0 %3529 }
 0xbb5   :  { %5861 = vset.pattern.permute.xlu0 %v8960_v8  ;;  %5858 = vset.pattern.permute.xlu1 %v8955_v35 }
 0xbb6   :  { %3489 = vperm.xlu0 %5861, %v3137_v41   ;;  %3345 = vperm.xlu1 %5858, %v3137_v41  }
 0xbb8   :  { %v7699_v54 = vpop.permute.xlu1 %3389 }
 0xbba   :  { %5860 = vset.pattern.permute.xlu1 %v8957_v16  ;;  %5868 = vset.pattern.permute.xlu0 %v8953_v6 }
 0xbbb   :  { %3441 = vperm.xlu1 %5860, %v3137_v41  }
 0xbbd   :  { %v7708_v40 = vpop.permute.xlu1 %3485 }
 0xbbf   :  { %5862 = vset.pattern.permute.xlu1 %v8958_v56 }
 0xbc0   :  { %3537 = vperm.xlu1 %5862, %v3137_v41  }
 0xbc2   :  { %v7713_v63 = vpop.permute.xlu1 %3533 }
 0xbc4   :  { %5863 = vset.pattern.permute.xlu1 %v8952_v52 }
 0xbc7   :  { %v7719_v24 = vpop.permute.xlu1 %3193 }
 0xbcc   :  { %v7726_v45 = vpop.permute.xlu1 %3289 }
 0xbd1   :  { %v7732_v15 = vpop.permute.xlu1 %3385 }
 0xbd7   :  { %v5623_v0 = vpop.f32.mrf.mxu0 }
 0xbd8   :  { %v7672_v5 = vadd.f32 %v5623_v0, %v7559_v47 }
 0xbd9   :  { %v2767_v3 = vpop.f32.mrf.mxu0 }
 0xbda   :  { %v7675_v53 = vadd.f32 %v2767_v3, %v7559_v47  ;;  %3051 = vrot.lane.b32.xlu0 %v7672_v5, %s6128_s21  ;;  %2960 = vrot.lane.b32.xlu1 %v7672_v5, %s6129_s22  ;;  %v7738_v47 = vpop.permute.xlu1 %3481 }
 0xbdc   :  { %5642 = vmatprep.mubr.msk.f32.mxu0 %vm247_vm1, %v7675_v53 }
 0xbde   :  { %3047 = vrot.lane.b32.xlu0 %v7672_v5, %s6130_s23  ;;  %3142 = vrot.lane.b32.xlu1 %v7672_v5, %s6131_s5 }
 0xbe2   :  { %3049 = vrot.lane.b32.xlu0 %v7675_v53, %s6128_s21  ;;  %2958 = vrot.lane.b32.xlu1 %v7675_v53, %s6129_s22 }
 0xbe6   :  { %4224 = vrot.lane.b32.xlu0 %v7569_v46, %s6140_s0  ;;  %3045 = vrot.lane.b32.xlu1 %v7675_v53, %s6130_s23 }
 0xbea   :  { %3140 = vrot.lane.b32.xlu0 %v7675_v53, %s6131_s5  ;;  %4226 = vrot.lane.b32.xlu1 %v7562_v1, %s6140_s0 }
 0xbee   :  { %3209 = vperm.xlu0 %5868, %v7675_v53   ;;  %4137 = vrot.lane.b32.xlu1 %v7569_v46, %s6132_s24 }
 0xbf2   :  { %5870 = vset.pattern.permute.xlu0 %v8956_v44  ;;  %3165 = vperm.xlu1 %5863, %v7672_v5  }
 0xbf3   :  { %3305 = vperm.xlu0 %5870, %v7675_v53  }
 0xbf6   :  { %5864 = vset.pattern.permute.xlu1 %v8953_v6 }
 0xbf7   :  { %3213 = vperm.xlu1 %5864, %v7672_v5   ;;  %5872 = vset.pattern.permute.xlu0 %v8953_v6 }
 0xbfb   :  { %5865 = vset.pattern.permute.xlu1 %v8954_v11 }
 0xbfc   :  { %3261 = vperm.xlu1 %5865, %v7672_v5  }
 0xc00   :  { %5866 = vset.pattern.permute.xlu1 %v8956_v44 }
 0xc01   :  { %3309 = vperm.xlu1 %5866, %v7672_v5  }
 0xc05   :  { %5867 = vset.pattern.permute.xlu1 %v8952_v52 }
 0xc06   :  { %3161 = vperm.xlu1 %5867, %v7675_v53  }
 0xc0a   :  { %5869 = vset.pattern.permute.xlu1 %v8954_v11 }
 0xc0b   :  { %3257 = vperm.xlu1 %5869, %v7675_v53  }
 0xc0e   :  { %v7741_v32 = vpop.permute.xlu1 %3205  ;;  %v3158_v12 = vpop.permute.xlu0 %3157 }
 0xc0f   :  { %5871 = vset.pattern.permute.xlu1 %v8952_v52 }
 0xc13   :  { %v7745_v1 = vpop.permute.xlu1 %3301  ;;  %v7751_v61 = vpop.permute.xlu0 %3253 }
 0xc18   :  { %v7749_v57 = vpop.permute.xlu1 %3397  ;;  %v7755_v46 = vpop.permute.xlu0 %3349 }
 0xc1d   :  { %v7753_v29 = vpop.permute.xlu1 %3445  ;;  %v7759_v58 = vpop.permute.xlu0 %3541 }
 0xc22   :  { %v7757_v14 = vpop.permute.xlu1 %3493  ;;  %v7763_v2 = vpop.permute.xlu0 %3201 }
 0xc27   :  { %v7761_v19 = vpop.permute.xlu1 %3153  ;;  %v7767_v9 = vpop.permute.xlu0 %3297 }
 0xc2c   :  { %v7765_v43 = vpop.permute.xlu1 %3249  ;;  %v7771_v59 = vpop.permute.xlu0 %3393 }
 0xc31   :  { %v7769_v27 = vpop.permute.xlu1 %3345  ;;  %v7775_v0 = vpop.permute.xlu0 %3489 }
 0xc36   :  { %v7773_v41 = vpop.permute.xlu1 %3441 }
 0xc3b   :  { %v7777_v3 = vpop.permute.xlu1 %3537 }
 0xc4c   :  { %v2961_v62 = vpop.permute.xlu1 %2960  ;;  %v3052_v7 = vpop.permute.xlu0 %3051 }
 0xc4d   :  { %5638 = vmatprep.subr.msk.mxu0 %vm247_vm1, %v2961_v62  ;;  %5645 = vmatprep.subr.msk.mxu1 %vm247_vm1, %v3052_v7 }
 0xc4e   :  { %5639 = vmatpush3.xpose.msk.msra.mxu0 %vm247_vm1, %v2961_v62  ;;  %5646 = vmatpush3.xpose.msk.msra.mxu1 %vm247_vm1, %v3052_v7  ;;  %v5630_v62 = vpop.f32.mrf.mxu0 }
 0xc4f   :  { %v3185_v22 = vadd.f32 %v5630_v62, %v3177_v55  ;;  %v3179_v55 = vmul.f32 %v7798_v28, %v3158_v12  ;;  %v7832_v12 = vld [vmem:[%s8826_s3 + $0x28] sm:$0xff] }
 0xc50   :  { %v7783_v31 = vpop.permute.xlu1 %3142  ;;  %v3048_v30 = vpop.permute.xlu0 %3047 }
 0xc51   :  { %3221 = vperm.xlu0 %5872, %v7783_v31   ;;  %3173 = vperm.xlu1 %5871, %v7783_v31  }
 0xc54   :  { %v2959_v42 = vpop.permute.xlu1 %2958  ;;  %v3050_v51 = vpop.permute.xlu0 %3049 }
 0xc55   :  { %5874 = vset.pattern.permute.xlu0 %v8956_v44  ;;  %5873 = vset.pattern.permute.xlu1 %v8954_v11 }
 0xc56   :  { %5640 = vmatprep.subr.msk.mxu0 %vm247_vm1, %v2959_v42  ;;  %5647 = vmatprep.subr.msk.mxu1 %vm247_vm1, %v3050_v51 }
 0xc57   :  { %3317 = vperm.xlu0 %5874, %v7783_v31   ;;  %3269 = vperm.xlu1 %5873, %v7783_v31  }
 0xc58   :  { %5641 = vmatpush3.xpose.msk.msra.mxu0 %vm247_vm1, %v2959_v42  ;;  %5648 = vmatpush3.xpose.msk.msra.mxu1 %vm247_vm1, %v3050_v51  ;;  %v3046_v7 = vpop.permute.xlu1 %3045  ;;  %v4225_v17 = vpop.permute.xlu0 %4224 }
 0xc59   :  { %5652 = vmatprep.subr.mxu0 %v7643_v49  ;;  %5649 = vmatprep.mubr.msk.f32.mxu1 %vm247_vm1, %v3046_v7  ;;  %v3225_v7 = vmul.f32 %v7812_v25, %v7667_v37  ;;  %v7825_v37 = vld [vmem:[%s8826_s3] sm:$0xff] }
 0xc5a   :  { %v5637_v42 = vpop.f32.mrf.mxu1 }
 0xc5b   :  { %5643 = vmatmul.mubr.msk.f32.vlgmr.msra.gmra.mxu0 %vm247_vm1, %v7672_v5  ;;  %5650 = vmatmul.mubr.msk.f32.vlgmr.msra.gmra.mxu1 %vm247_vm1, %v3048_v30  ;;  %v3233_v30 = vadd.f32 %v3225_v7, %v3185_v22  ;;  %v3273_v22 = vmul.f32 %v7832_v12, %v7669_v4  ;;  %v7845_v4 = vld [vmem:[%s8826_s3 + $0x38] sm:$0xff] }
 0xc5c   :  { %5653 = vmatpush3.msra.mxu0 %v7643_v49  ;;  %5875 = vset.pattern.permute.xlu0 %v8952_v52  ;;  %v4227_v51 = vpop.permute.xlu1 %4226  ;;  %v7818_v62 = vpop.permute.xlu0 %3140  ;;  %v3187_v52 = vadd.f32 %v5637_v42, %v3179_v55  ;;  %v3227_v42 = vmul.f32 %v7812_v25, %v7741_v32 }
 0xc5d   :  { %5876 = vset.pattern.permute.xlu1 %v8953_v6  ;;  %5659 = vmatprep.subr.mxu1 %v4227_v51  ;;  %v2856_v49 = vpop.f32.mrf.mxu0  ;;  %v3176_v6 = vmul.f32 %v7825_v37, %v7724_v38 }
 0xc5e   :  { %3217 = vperm.xlu1 %5876, %v7818_v62   ;;  %3169 = vperm.xlu0 %5875, %v7818_v62   ;;  %v3235_v38 = vadd.f32 %v3227_v42, %v3187_v52  ;;  %v7879_v42 = vld [vmem:[%s8826_s3 + $0x58] sm:$0xff] }
 0xc5f   :  { %5660 = vmatpush3.msra.mxu1 %v4227_v51  ;;  %v3281_v51 = vadd.f32 %v3273_v22, %v3233_v30  ;;  %v3184_v7 = vadd.f32 %v3176_v6, %v2856_v49  ;;  %v3323_v49 = vmul.f32 %v7845_v4, %v7745_v1 }
 0xc60   :  { %5661 = vmatprep.subr.mxu1 %v4225_v17  ;;  %v4138_v50 = vpop.permute.xlu1 %4137 }
 0xc61   :  { %5662 = vmatpush3.msra.mxu1 %v4225_v17  ;;  %5654 = vmatprep.subr.mxu0 %v4138_v50  ;;  %v3321_v17 = vmul.f32 %v7845_v4, %v7683_v20  ;;  %v7863_v20 = vld [vmem:[%s8826_s3 + $0x20] sm:$0xff] }
 0xc62   :  { %5878 = vset.pattern.permute.xlu1 %v8956_v44  ;;  %5877 = vset.pattern.permute.xlu0 %v8954_v11  ;;  %v7852_v11 = vld [vmem:[%s8826_s3 + $0x10] sm:$0xff]  ;;  %v3275_v44 = vmul.f32 %v7832_v12, %v7751_v61  ;;  %v3272_v52 = vmul.f32 %v7863_v20, %v7730_v21  ;;  %v3417_v21 = vmul.f32 %v7879_v42, %v7699_v54 }
 0xc63   :  { %5655 = vmatpush3.msra.mxu0 %v4138_v50  ;;  %3313 = vperm.xlu1 %5878, %v7818_v62   ;;  %v3224_v50 = vmul.f32 %v7852_v11, %v7719_v24  ;;  %v3329_v32 = vadd.f32 %v3321_v17, %v3281_v51  ;;  %v7870_v24 = vld [vmem:[%s8826_s3 + $0x48] sm:$0xff]  ;;  %v7886_v51 = vld [vmem:[%s8826_s3 + $0x30] sm:$0xff] }
 0xc64   :  { %3265 = vperm.xlu0 %5877, %v7818_v62   ;;  %v3283_v30 = vadd.f32 %v3275_v44, %v3235_v38  ;;  %v3369_v61 = vmul.f32 %v7870_v24, %v7693_v23  ;;  %v3320_v23 = vmul.f32 %v7886_v51, %v7726_v45  ;;  %v3371_v1 = vmul.f32 %v7870_v24, %v7755_v46  ;;  %v7902_v44 = vld [vmem:[%s8826_s3 + $0x40] sm:$0xff] }
 0xc65   :  { %v3232_v55 = vadd.f32 %v3224_v50, %v3184_v7  ;;  %v7895_v50 = vld [vmem:[%s8826_s3 + $0x68] sm:$0xff]  ;;  %v3368_v45 = vmul.f32 %v7902_v44, %v7736_v36  ;;  %v3419_v46 = vmul.f32 %v7879_v42, %v7749_v57 }
 0xc66   :  { %v3331_v22 = vadd.f32 %v3323_v49, %v3283_v30  ;;  %v3465_v54 = vmul.f32 %v7895_v50, %v7641_v33  ;;  %v3467_v57 = vmul.f32 %v7895_v50, %v7753_v29 }
 0xc67   :  { %5879 = vset.pattern.permute.xlu1 %v8955_v35  ;;  %v3280_v6 = vadd.f32 %v3272_v52, %v3232_v55  ;;  %v7911_v52 = vld [vmem:[%s8826_s3 + $0x78] sm:$0xff] }
 0xc68   :  { %5880 = vset.pattern.permute.xlu0 %v8955_v35  ;;  %v3377_v35 = vadd.f32 %v3369_v61, %v3329_v32  ;;  %v3379_v17 = vadd.f32 %v3371_v1, %v3331_v22  ;;  %v3513_v33 = vmul.f32 %v7911_v52, %v7708_v40  ;;  %v7918_v61 = vld [vmem:[%s8826_s3 + $0x50] sm:$0xff]  ;;  %v7927_v22 = vld [vmem:[%s8826_s3 + $0x60] sm:$0xff]  ;;  %v3515_v29 = vmul.f32 %v7911_v52, %v7757_v14 }
 0xc69   :  { %v3328_v38 = vadd.f32 %v3320_v23, %v3280_v6  ;;  %v3416_v36 = vmul.f32 %v7918_v61, %v7732_v15  ;;  %v3464_v40 = vmul.f32 %v7927_v22, %v7743_v34 }
 0xc6a   :  { %v3425_v7 = vadd.f32 %v3417_v21, %v3377_v35  ;;  %v3427_v55 = vadd.f32 %v3419_v46, %v3379_v17  ;;  %v7934_v21 = vld [vmem:[%s8826_s3 + $0x88] sm:$0xff]  ;;  %v7956_v46 = vld [vmem:[%s8826_s3 + $0x80] sm:$0xff] }
 0xc6b   :  { %v3376_v32 = vadd.f32 %v3368_v45, %v3328_v38  ;;  %v3561_v15 = vmul.f32 %v7934_v21, %v7713_v63  ;;  %v7943_v38 = vld [vmem:[%s8826_s3 + $0x70] sm:$0xff]  ;;  %v3563_v17 = vmul.f32 %v7934_v21, %v7759_v58 }
 0xc6c   :  { %v3473_v30 = vadd.f32 %v3465_v54, %v3425_v7  ;;  %v3475_v6 = vadd.f32 %v3467_v57, %v3427_v55  ;;  %v3512_v34 = vmul.f32 %v7943_v38, %v7738_v47  ;;  %v8016_v55 = vpop.permute.xlu0 %3209 }
 0xc6d   :  { %v3424_v49 = vadd.f32 %v3416_v36, %v3376_v32  ;;  %v3560_v32 = vmul.f32 %v7956_v46, %v7747_v10 }
 0xc6e   :  { %v3521_v35 = vadd.f32 %v3513_v33, %v3473_v30  ;;  %v3523_v1 = vadd.f32 %v3515_v29, %v3475_v6  ;;  %v3274_v29 = vmul.f32 %v7863_v20, %v7765_v43 }
 0xc6f   :  { %v3472_v7 = vadd.f32 %v3464_v40, %v3424_v49  ;;  %v2947_v49 = vpop.f32.mrf.mxu1  ;;  %v3226_v40 = vmul.f32 %v7852_v11, %v7763_v2  ;;  %v3418_v2 = vmul.f32 %v7918_v61, %v7771_v59  ;;  %v3562_v59 = vmul.f32 %v7956_v46, %v7777_v3 }
 0xc70   :  { %v3569_v23 = vadd.f32 %v3561_v15, %v3521_v35  ;;  %v3571_v45 = vadd.f32 %v3563_v17, %v3523_v1  ;;  %v3178_v35 = vmul.f32 %v7825_v37, %v7761_v19  ;;  %v3322_v1 = vmul.f32 %v7886_v51, %v7767_v9 }
 0xc71   :  { %v3520_v14 = vadd.f32 %v3512_v34, %v3472_v7  ;;  %v3370_v19 = vmul.f32 %v7902_v44, %v7769_v27  ;;  %v3466_v9 = vmul.f32 %v7927_v22, %v7773_v41  ;;  %v3514_v27 = vmul.f32 %v7943_v38, %v7775_v0  ;;  %v8008_v0 = vpop.permute.xlu1 %3165 }
 0xc72   :  { %v7951_v63 = vsel %vm1043_vm2, %v3569_v23, -10000.0  ;;  %v7964_v58 = vsel %vm1045_vm3, %v3571_v45, -10000.0  ;;  %v3186_v6 = vadd.f32 %v3178_v35, %v2947_v49 }
 0xc73   :  { %v3587_v47 = vsel %vm247_vm1, %v7951_v63, -inf  ;;  %v3568_v30 = vadd.f32 %v3560_v32, %v3520_v14  ;;  %v3593_v33 = vsel %vm247_vm1, %v7964_v58, -inf }
 0xc74   :  { %v3234_v15 = vadd.f32 %v3226_v40, %v3186_v6 }
 0xc75   :  { %v7970_v57 = vsel %vm1042_vm5, %v3568_v30, -10000.0  ;;  %v8010_v3 = vpop.permute.xlu1 %3213 }
 0xc76   :  { %v3584_v10 = vsel %vm247_vm1, %v7970_v57, -inf  ;;  %v3282_v23 = vadd.f32 %v3274_v29, %v3234_v15 }
 0xc78   :  { %v3330_v7 = vadd.f32 %v3322_v1, %v3282_v23 }
 0xc79   :  { %v8012_v32 = vpop.permute.xlu1 %3261 }
 0xc7a   :  { %v3378_v34 = vadd.f32 %v3370_v19, %v3330_v7  ;;  %v3277_v18 = vmul.f32 %v7832_v12, %v8012_v32 }
 0xc7c   :  { %v3426_v43 = vadd.f32 %v3418_v2, %v3378_v34 }
 0xc7e   :  { %v3474_v17 = vadd.f32 %v3466_v9, %v3426_v43 }
 0xc80   :  { %v3522_v54 = vadd.f32 %v3514_v27, %v3474_v17 }
 0xc82   :  { %v3570_v45 = vadd.f32 %v3562_v59, %v3522_v54 }
 0xc83   :  { %3588 = vmax.xlane.f32.xlu0 %v3587_v47  ;;  %v8014_v47 = vpop.permute.xlu1 %3309 }
 0xc87   :  { %3594 = vmax.xlane.f32.xlu1 %v3593_v33  ;;  %v8018_v30 = vpop.permute.xlu1 %3161  ;;  %v8020_v33 = vpop.permute.xlu0 %3305 }
 0xc8b   :  { %3585 = vmax.xlane.f32.xlu1 %v3584_v10  ;;  %v8022_v36 = vpop.permute.xlu1 %3257 }
 0xc99   :  { %3361 = vperm.xlu0 %5880, %v7818_v62  }
 0xc9c   :  { %3353 = vperm.xlu1 %5879, %v7675_v53  }
 0xc9d   :  { %5881 = vset.pattern.permute.xlu0 %v8959_v39 }
 0xca0   :  { %3357 = vperm.xlu1 %5879, %v7672_v5  }
 0xca4   :  { %3365 = vperm.xlu1 %5879, %v7783_v31  }
 0xca8   :  { %5882 = vset.pattern.permute.xlu1 %v8959_v39  ;;  %v3578_v39 = vsel %vm1044_vm4, %v3570_v45, -10000.0 }
 0xca9   :  { %3409 = vperm.xlu1 %5882, %v7818_v62   ;;  %v3590_v14 = vsel %vm247_vm1, %v3578_v39, -inf }
 0xcad   :  { %3405 = vperm.xlu1 %5882, %v7672_v5  }
 0xcb1   :  { %5883 = vset.pattern.permute.xlu1 %v8957_v16 }
 0xcb2   :  { %3449 = vperm.xlu1 %5883, %v7675_v53  }
 0xcb8   :  { %3591 = vmax.xlane.f32.xlu0 %v3590_v14 }
 0xccc   :  { %v8024_v10 = vpop.permute.xlu0 %3221  ;;  %v8026_v49 = vpop.permute.xlu1 %3173 }
 0xcce   :  { %3401 = vperm.xlu0 %5881, %v7675_v53  }
 0xcd2   :  { %3413 = vperm.xlu0 %5881, %v7783_v31   ;;  %v8030_v35 = vpop.permute.xlu1 %3269 }
 0xcd6   :  { %5884 = vset.pattern.permute.xlu0 %v8957_v16  ;;  %v8028_v16 = vpop.permute.xlu0 %3317 }
 0xcd9   :  { %v8034_v40 = vpop.permute.xlu1 %3217 }
 0xcda   :  { %v8032_v6 = vpop.permute.xlu0 %3169 }
 0xcde   :  { %v8038_v29 = vpop.permute.xlu1 %3313 }
 0xcdf   :  { %v8036_v15 = vpop.permute.xlu0 %3265 }
 0xd0c   :  { %v3589_v23 = vpop.xlane.xlu0 %3588 }
 0xd0d   :  { %v3609_v1 = vsub.f32 %v7951_v63, %v3589_v23 }
 0xd0f   :  { %v3618_v7 = vmul.f32 1.442695, %v3609_v1  ;;  %v8062_v1 = vld [vmem:[#allocation5 + $0x38] sm:$0xff] }
 0xd10   :  { %v3595_v19 = vpop.xlane.xlu1 %3594  ;;  %5666 = vmatprep.subr.mxu0 %v8062_v1 }
 0xd11   :  { %5937 = vpow2.f32 %v3618_v7  ;;  %v3611_v34 = vsub.f32 %v7964_v58, %v3595_v19 }
 0xd13   :  { %v3622_v2 = vmul.f32 1.442695, %v3611_v34 }
 0xd14   :  { %v3586_v43 = vpop.xlane.xlu1 %3585 }
 0xd15   :  { %5939 = vpow2.f32 %v3622_v2  ;;  %v3608_v9 = vsub.f32 %v7970_v57, %v3586_v43  ;;  %v8053_v57 = vpop.permute.xlu0 %3361 }
 0xd17   :  { %v3616_v17 = vmul.f32 1.442695, %v3608_v9 }
 0xd18   :  { %v8078_v19 = vpop.permute.xlu1 %3353 }
 0xd19   :  { %5941 = vpow2.f32 %v3616_v17 }
 0xd1c   :  { %v3358_v34 = vpop.permute.xlu1 %3357 }
 0xd1e   :  { %v8043_v27 = vpop.eup %5937 }
 0xd1f   :  { %v3635_v54 = vsel %vm247_vm1, %v8043_v27, 0.0 }
 0xd20   :  { %3636 = vadd.xlane.f32.xlu0 %v3635_v54  ;;  %v8080_v2 = vpop.permute.xlu1 %3365 }
 0xd22   :  { %v8047_v59 = vpop.eup %5939 }
 0xd23   :  { %v3641_v63 = vsel %vm247_vm1, %v8047_v59, 0.0 }
 0xd24   :  { %3642 = vadd.xlane.f32.xlu1 %v3641_v63  ;;  %v8082_v43 = vpop.permute.xlu1 %3409 }
 0xd26   :  { %v5942_v58 = vpop.eup %5941 }
 0xd27   :  { %v3632_v45 = vsel %vm247_vm1, %v5942_v58, 0.0 }
 0xd28   :  { %3633 = vadd.xlane.f32.xlu1 %v3632_v45  ;;  %v3406_v9 = vpop.permute.xlu1 %3405  ;;  %v5644_v45 = vpop.f32.mrf.mxu0 }
 0xd29   :  { %v3421_v32 = vmul.f32 %v7879_v42, %v3406_v9 }
 0xd2d   :  { %v8086_v54 = vpop.permute.xlu1 %3449 }
 0xd39   :  { %3453 = vperm.xlu1 %5883, %v7672_v5  }
 0xd3d   :  { %3461 = vperm.xlu1 %5883, %v7783_v31  }
 0xd41   :  { %v3592_v41 = vpop.xlane.xlu0 %3591  ;;  %5886 = vset.pattern.permute.xlu1 %v8960_v8 }
 0xd42   :  { %v3610_v14 = vsub.f32 %v3578_v39, %v3592_v41  ;;  %3505 = vperm.xlu1 %5886, %v7818_v62  }
 0xd44   :  { %v3620_v23 = vmul.f32 1.442695, %v3610_v14 }
 0xd46   :  { %5943 = vpow2.f32 %v3620_v23  ;;  %3501 = vperm.xlu1 %5886, %v7672_v5   ;;  %v3229_v23 = vmul.f32 %v7812_v25, %v8010_v3 }
 0xd49   :  { %v8084_v17 = vpop.permute.xlu0 %3401 }
 0xd4a   :  { %5887 = vset.pattern.permute.xlu1 %v8958_v56 }
 0xd4b   :  { %3545 = vperm.xlu1 %5887, %v7675_v53  }
 0xd4f   :  { %3549 = vperm.xlu1 %5887, %v7672_v5  }
 0xd53   :  { %v8065_v7 = vpop.eup %5943  ;;  %3557 = vperm.xlu1 %5887, %v7783_v31  }
 0xd54   :  { %v3638_v39 = vsel %vm247_vm1, %v8065_v7, 0.0 }
 0xd55   :  { %3639 = vadd.xlane.f32.xlu0 %v3638_v39 }
 0xd57   :  { %4475 = vrot.lane.b32.xlu1 %v7672_v5, %s6132_s24 }
 0xd6b   :  { %3457 = vperm.xlu0 %5884, %v7818_v62  }
 0xd6f   :  { %5885 = vset.pattern.permute.xlu0 %v8960_v8  ;;  %v8088_v8 = vpop.permute.xlu0 %3413 }
 0xd70   :  { %3497 = vperm.xlu0 %5885, %v7675_v53  }
 0xd74   :  { %3509 = vperm.xlu0 %5885, %v7783_v31  }
 0xd78   :  { %5888 = vset.pattern.permute.xlu0 %v8958_v56 }
 0xd79   :  { %3553 = vperm.xlu0 %5888, %v7818_v62   ;;  %v3181_v62 = vmul.f32 %v7798_v28, %v8008_v0 }
 0xd7b   :  { %v3189_v41 = vadd.f32 %v5644_v45, %v3181_v62 }
 0xd7d   :  { %v3237_v39 = vadd.f32 %v3229_v23, %v3189_v41  ;;  %v8109_v41 = vld [vmem:[#allocation5 + $0x30] sm:$0xff] }
 0xd7e   :  { %8965 = vst [vmem:[#allocation23_spill] sm:$0xff] %v8109_v41 }
 0xd7f   :  { %v3285_v13 = vadd.f32 %v3277_v18, %v3237_v39  ;;  %v3373_v18 = vmul.f32 %v7870_v24, %v3358_v34 }
 0xda9   :  { %v3637_v31 = vpop.xlane.xlu0 %3636 }
 0xdaa   :  { %5945 = vrcp.f32 %v3637_v31 }
 0xdad   :  { %v3643_v63 = vpop.xlane.xlu1 %3642 }
 0xdb1   :  { %v3634_v56 = vpop.xlane.xlu1 %3633 }
 0xdb2   :  { %5947 = vrcp.f32 %v3634_v56  ;;  %v3325_v56 = vmul.f32 %v7845_v4, %v8014_v47 }
 0xdb3   :  { %5949 = vrcp.f32 %v3643_v63  ;;  %v3420_v63 = vmul.f32 %v7918_v61, %v8084_v17  ;;  %v3468_v17 = vmul.f32 %v7927_v22, %v8086_v54 }
 0xdb4   :  { %v3333_v45 = vadd.f32 %v3325_v56, %v3285_v13 }
 0xdb5   :  { %v3454_v14 = vpop.permute.xlu1 %3453 }
 0xdb6   :  { %v3469_v13 = vmul.f32 %v7895_v50, %v3454_v14 }
 0xdb7   :  { %v5946_v31 = vpop.eup %5945 }
 0xdb8   :  { %v8105_v62 = vmul.f32 %v5946_v31, %v8043_v27 }
 0xdb9   :  { %v8094_v48 = vpop.permute.xlu1 %3461 }
 0xdbd   :  { %v8098_v26 = vpop.permute.xlu1 %3505 }
 0xdbf   :  { %v5948_v60 = vpop.eup %5947 }
 0xdc0   :  { %v8102_v0 = vmul.f32 %v5948_v60, %v5942_v58  ;;  %v3381_v60 = vadd.f32 %v3373_v18, %v3333_v45 }
 0xdc1   :  { %v3502_v3 = vpop.permute.xlu1 %3501 }
 0xdc2   :  { %5656 = vmatprep.mubr.msk.f32.mxu0 %vm247_vm1, %v8102_v0  ;;  %v3429_v27 = vadd.f32 %v3421_v32, %v3381_v60  ;;  %v3517_v58 = vmul.f32 %v7911_v52, %v3502_v3  ;;  %v3036_v32 = vpop.f32.mrf.mxu0  ;;  %v3180_v3 = vmul.f32 %v7825_v37, %v8018_v30  ;;  %v5651_v60 = vpop.f32.mrf.mxu1  ;;  %v3230_v30 = vmul.f32 %v7852_v11, %v8034_v40 }
 0xdc3   :  { %5657 = vmatmul.mubr.msk.f32.vlgmr.msra.gmra.mxu0 %vm247_vm1, %v8105_v62 }
 0xdc4   :  { %5667 = vmatpush3.msra.mxu0 %v8062_v1  ;;  %v3477_v34 = vadd.f32 %v3469_v13, %v3429_v27  ;;  %v3188_v13 = vadd.f32 %v3180_v3, %v3036_v32  ;;  %v3228_v27 = vmul.f32 %v7852_v11, %v8016_v55 }
 0xdc5   :  { %5668 = vmatprep.subr.mxu0 %v8109_v41 }
 0xdc6   :  { %v8118_v47 = vpop.permute.xlu1 %3545  ;;  %5669 = vmatpush3.msra.mxu0 %v8109_v41  ;;  %v3525_v9 = vadd.f32 %v3517_v58, %v3477_v34  ;;  %v3127_v58 = vpop.f32.mrf.mxu1  ;;  %v3182_v34 = vmul.f32 %v7825_v37, %v8032_v6 }
 0xdca   :  { %v3550_v23 = vpop.permute.xlu1 %3549 }
 0xdcb   :  { %v3565_v39 = vmul.f32 %v7934_v21, %v3550_v23  ;;  %v3183_v23 = vmul.f32 %v7798_v28, %v8026_v49  ;;  %v3324_v49 = vmul.f32 %v7886_v51, %v8020_v33  ;;  %v3327_v33 = vmul.f32 %v7845_v4, %v8028_v16 }
 0xdcc   :  { %v3422_v16 = vmul.f32 %v7918_v61, %v8082_v43  ;;  %v3564_v43 = vmul.f32 %v7956_v46, %v8118_v47 }
 0xdcd   :  { %v3573_v31 = vadd.f32 %v3565_v39, %v3525_v9  ;;  %v3236_v9 = vadd.f32 %v3228_v27, %v3188_v13  ;;  %v3190_v39 = vadd.f32 %v3182_v34, %v3127_v58  ;;  %v3191_v45 = vadd.f32 %v5651_v60, %v3183_v23 }
 0xdce   :  { %v8123_v56 = vpop.permute.xlu1 %3557  ;;  %v3278_v13 = vmul.f32 %v7863_v20, %v8036_v15  ;;  %v3326_v58 = vmul.f32 %v7886_v51, %v8038_v29  ;;  %v3423_v29 = vmul.f32 %v7879_v42, %v8088_v8 }
 0xdcf   :  { %v8127_v14 = vsel %vm1047_vm8, %v3573_v31, -10000.0  ;;  %v3276_v31 = vmul.f32 %v7863_v20, %v8022_v36  ;;  %v3238_v3 = vadd.f32 %v3230_v30, %v3190_v39  ;;  %v3279_v36 = vmul.f32 %v7832_v12, %v8030_v35 }
 0xdd0   :  { %v3599_v18 = vsel %vm247_vm1, %v8127_v14, -inf  ;;  %v3375_v35 = vmul.f32 %v7870_v24, %v8080_v2  ;;  %v3471_v2 = vmul.f32 %v7895_v50, %v8094_v48 }
 0xdd1   :  { %3600 = vmax.xlane.f32.xlu0 %v3599_v18  ;;  %v3231_v18 = vmul.f32 %v7812_v25, %v8024_v10  ;;  %v3284_v55 = vadd.f32 %v3276_v31, %v3236_v9  ;;  %v3286_v40 = vadd.f32 %v3278_v13, %v3238_v3  ;;  %v3372_v10 = vmul.f32 %v7902_v44, %v8078_v19  ;;  %v5950_v31 = vpop.eup %5949 }
 0xdd2   :  { %v8131_v41 = vpop.permute.xlu1 %4475  ;;  %v3374_v19 = vmul.f32 %v7902_v44, %v8053_v57 }
 0xdd3   :  { %5680 = vmatprep.subr.mxu0 %v8131_v41  ;;  %v3239_v6 = vadd.f32 %v3231_v18, %v3191_v45  ;;  %v3332_v60 = vadd.f32 %v3324_v49, %v3284_v55  ;;  %v3334_v23 = vadd.f32 %v3326_v58, %v3286_v40  ;;  %v8180_v49 = vmul.f32 %v5950_v31, %v8047_v59 }
 0xdd4   :  { %v3567_v59 = vmul.f32 %v7934_v21, %v8123_v56  ;;  %v3673_v31 = vmul.f32 %v7798_v28, %v8105_v62 }
 0xdd5   :  { %v3287_v27 = vadd.f32 %v3279_v36, %v3239_v6  ;;  %v3380_v34 = vadd.f32 %v3372_v10, %v3332_v60  ;;  %v3382_v45 = vadd.f32 %v3374_v19, %v3334_v23  ;;  %v3768_v19 = vmul.f32 %v7863_v20, %v8102_v0 }
 0xdd7   :  { %v3335_v9 = vadd.f32 %v3327_v33, %v3287_v27  ;;  %v3428_v39 = vadd.f32 %v3420_v63, %v3380_v34  ;;  %v3430_v13 = vadd.f32 %v3422_v16, %v3382_v45  ;;  %v3518_v63 = vmul.f32 %v7943_v38, %v8098_v26 }
 0xdd8   :  { %v3675_v26 = vmul.f32 %v7798_v28, %v8180_v49  ;;  %v3719_v16 = vmul.f32 %v7812_v25, %v8180_v49  ;;  %v4031_v27 = vmul.f32 %v7911_v52, %v8180_v49 }
 0xdd9   :  { %v3383_v55 = vadd.f32 %v3375_v35, %v3335_v9  ;;  %v3672_v9 = vmul.f32 %v7825_v37, %v8102_v0 }
 0xdda   :  { %v3689_v45 = vsel %vm247_vm1, %v3675_v26, 0.0 }
 0xddb   :  { %v3431_v8 = vadd.f32 %v3423_v29, %v3383_v55  ;;  %v3733_v55 = vsel %vm247_vm1, %v3719_v16, 0.0 }
 0xddd   :  { %v3479_v36 = vadd.f32 %v3471_v2, %v3431_v8  ;;  %v3771_v2 = vmul.f32 %v7832_v12, %v8180_v49  ;;  %v3821_v8 = vmul.f32 %v7845_v4, %v8105_v62 }
 0xdde   :  { %v3640_v32 = vpop.xlane.xlu0 %3639 }
 0xddf   :  { %5951 = vrcp.f32 %v3640_v32  ;;  %v3476_v32 = vadd.f32 %v3468_v17, %v3428_v39 }
 0xde6   :  { %v3458_v15 = vpop.permute.xlu0 %3457 }
 0xde7   :  { %v3470_v54 = vmul.f32 %v7927_v22, %v3458_v15 }
 0xde9   :  { %v3478_v40 = vadd.f32 %v3470_v54, %v3430_v13  ;;  %v3823_v54 = vmul.f32 %v7845_v4, %v8180_v49  ;;  %v3873_v13 = vmul.f32 %v7870_v24, %v8105_v62 }
 0xdeb   :  { %v3498_v30 = vpop.permute.xlu0 %3497  ;;  %v3526_v15 = vadd.f32 %v3518_v63, %v3478_v40  ;;  %v3883_v4 = vsel %vm247_vm1, %v3873_v13, 0.0  ;;  %v3979_v40 = vmul.f32 %v7895_v50, %v8180_v49  ;;  %v4029_v63 = vmul.f32 %v7911_v52, %v8105_v62 }
 0xdec   :  { %v5952_v18 = vpop.eup %5951  ;;  %v3516_v57 = vmul.f32 %v7943_v38, %v3498_v30  ;;  %v3683_v30 = vsel %vm247_vm1, %v3673_v31, 0.0  ;;  %v4080_v13 = vmul.f32 %v7956_v46, %v8102_v0 }
 0xded   :  { %v8176_v3 = vmul.f32 %v5952_v18, %v8065_v7  ;;  %v3717_v18 = vmul.f32 %v7812_v25, %v8105_v62 }
 0xdee   :  { %v3524_v6 = vadd.f32 %v3516_v57, %v3476_v32  ;;  %v3769_v32 = vmul.f32 %v7832_v12, %v8105_v62  ;;  %v3785_v57 = vsel %vm247_vm1, %v3771_v2, 0.0  ;;  %v3831_v12 = vsel %vm247_vm1, %v3821_v8, 0.0 }
 0xdef   :  { %5663 = vmatprep.mubr.msk.f32.mxu1 %vm247_vm1, %v8176_v3  ;;  %v3510_v48 = vpop.permute.xlu0 %3509  ;;  %v3727_v28 = vsel %vm247_vm1, %v3717_v18, 0.0  ;;  %v3770_v26 = vmul.f32 %v7863_v20, %v8176_v3  ;;  %v3822_v31 = vmul.f32 %v7886_v51, %v8176_v3  ;;  %v3872_v18 = vmul.f32 %v7902_v44, %v8102_v0 }
 0xdf0   :  { %v3519_v60 = vmul.f32 %v7911_v52, %v3510_v48  ;;  %5664 = vmatmul.mubr.msk.f32.vlgmr.msra.gmra.mxu1 %vm247_vm1, %v8180_v49  ;;  %v3572_v7 = vadd.f32 %v3564_v43, %v3524_v6  ;;  %v3779_v25 = vsel %vm247_vm1, %v3769_v32, 0.0  ;;  %v3837_v43 = vsel %vm247_vm1, %v3823_v54, 0.0 }
 0xdf1   :  { %v3875_v6 = vmul.f32 %v7870_v24, %v8180_v49  ;;  %v3834_v16 = vsel %vm247_vm1, %v3822_v31, 0.0  ;;  %v3926_v2 = vmul.f32 %v7918_v61, %v8176_v3  ;;  %v3976_v54 = vmul.f32 %v7927_v22, %v8102_v0 }
 0xdf2   :  { %v3527_v10 = vadd.f32 %v3519_v60, %v3479_v36  ;;  %v8193_v47 = vsel %vm1046_vm7, %v3572_v7, -10000.0  ;;  %v3927_v36 = vmul.f32 %v7879_v42, %v8180_v49  ;;  %v3925_v60 = vmul.f32 %v7879_v42, %v8105_v62 }
 0xdf3   :  { %v3596_v58 = vsel %vm247_vm1, %v8193_v47, -inf  ;;  %v3889_v48 = vsel %vm247_vm1, %v3875_v6, 0.0  ;;  %v3938_v32 = vsel %vm247_vm1, %v3926_v2, 0.0  ;;  %v4030_v8 = vmul.f32 %v7943_v38, %v8176_v3 }
 0xdf4   :  { %3597 = vmax.xlane.f32.xlu0 %v3596_v58  ;;  %v3554_v33 = vpop.permute.xlu0 %3553  ;;  %v3575_v34 = vadd.f32 %v3567_v59, %v3527_v10  ;;  %v3941_v7 = vsel %vm247_vm1, %v3927_v36, 0.0  ;;  %v3935_v24 = vsel %vm247_vm1, %v3925_v60, 0.0  ;;  %v3977_v59 = vmul.f32 %v7895_v50, %v8105_v62 }
 0xdf5   :  { %v3566_v23 = vmul.f32 %v7956_v46, %v3554_v33  ;;  %v3993_v10 = vsel %vm247_vm1, %v3979_v40, 0.0  ;;  %v4045_v58 = vsel %vm247_vm1, %v4031_v27, 0.0  ;;  %v4083_v33 = vmul.f32 %v7934_v21, %v8180_v49 }
 0xdf6   :  { %v8202_v56 = vsel %vm1049_vm9, %v3575_v34, -10000.0  ;;  %v3987_v42 = vsel %vm247_vm1, %v3977_v59, 0.0  ;;  %v4039_v50 = vsel %vm247_vm1, %v4029_v63, 0.0  ;;  %v4081_v34 = vmul.f32 %v7934_v21, %v8105_v62 }
 0xdf7   :  { %v3574_v35 = vadd.f32 %v3566_v23, %v3526_v15  ;;  %v3605_v39 = vsel %vm247_vm1, %v8202_v56, -inf  ;;  %v4097_v15 = vsel %vm247_vm1, %v4083_v33, 0.0  ;;  %v3674_v23 = vmul.f32 %v7825_v37, %v8176_v3 }
 0xdf8   :  { %3606 = vmax.xlane.f32.xlu0 %v3605_v39  ;;  %v4091_v52 = vsel %vm247_vm1, %v4081_v34, 0.0  ;;  %v3680_v21 = vsel %vm247_vm1, %v3672_v9, 0.0  ;;  %v3716_v62 = vmul.f32 %v7852_v11, %v8102_v0  ;;  %v4042_v6 = vsel %vm247_vm1, %v4030_v8, 0.0 }
 0xdf9   :  { %v8210_v17 = vsel %vm1048_vm6, %v3574_v35, -10000.0  ;;  %v3686_v49 = vsel %vm247_vm1, %v3674_v23, 0.0  ;;  %v3718_v35 = vmul.f32 %v7852_v11, %v8176_v3  ;;  %v3776_v11 = vsel %vm247_vm1, %v3768_v19, 0.0 }
 0xdfa   :  { %v3602_v29 = vsel %vm247_vm1, %v8210_v17, -inf  ;;  %v3724_v37 = vsel %vm247_vm1, %v3716_v62, 0.0  ;;  %v4088_v36 = vsel %vm247_vm1, %v4080_v13, 0.0 }
 0xdfb   :  { %3603 = vmax.xlane.f32.xlu1 %v3602_v29  ;;  %v3730_v39 = vsel %vm247_vm1, %v3718_v35, 0.0  ;;  %v3782_v29 = vsel %vm247_vm1, %v3770_v26, 0.0 }
 0xdfc   :  { %3690 = vadd.xlane.f32.xlu0 %v3689_v45  ;;  %v3820_v45 = vmul.f32 %v7886_v51, %v8102_v0  ;;  %v3880_v51 = vsel %vm247_vm1, %v3872_v18, 0.0 }
 0xdfe   :  { %v3828_v20 = vsel %vm247_vm1, %v3820_v45, 0.0 }
 0xdff   :  { %3684 = vadd.xlane.f32.xlu1 %v3683_v30  ;;  %v3874_v30 = vmul.f32 %v7902_v44, %v8176_v3 }
 0xe00   :  { %3734 = vadd.xlane.f32.xlu0 %v3733_v55 }
 0xe01   :  { %v3886_v55 = vsel %vm247_vm1, %v3874_v30, 0.0 }
 0xe03   :  { %3728 = vadd.xlane.f32.xlu1 %v3727_v28  ;;  %v3924_v28 = vmul.f32 %v7918_v61, %v8102_v0  ;;  %v3984_v61 = vsel %vm247_vm1, %v3976_v54, 0.0 }
 0xe04   :  { %3786 = vadd.xlane.f32.xlu0 %v3785_v57  ;;  %v3978_v57 = vmul.f32 %v7927_v22, %v8176_v3 }
 0xe05   :  { %v3932_v44 = vsel %vm247_vm1, %v3924_v28, 0.0 }
 0xe07   :  { %3780 = vadd.xlane.f32.xlu1 %v3779_v25  ;;  %v3990_v25 = vsel %vm247_vm1, %v3978_v57, 0.0  ;;  %v5265_v57 = vld [vmem:[%s8831_s8 + $0x20] sm:$0xff] }
 0xe08   :  { %3838 = vadd.xlane.f32.xlu0 %v3837_v43  ;;  %v4028_v43 = vmul.f32 %v7943_v38, %v8102_v0  ;;  %v8320_v38 = vld [vmem:[#allocation5 + $0x28] sm:$0xff] }
 0xe09   :  { %5673 = vmatprep.subr.mxu1 %v8320_v38 }
 0xe0a   :  { %v4036_v22 = vsel %vm247_vm1, %v4028_v43, 0.0  ;;  %5674 = vmatpush3.msra.mxu1 %v8320_v38 }
 0xe0b   :  { %3832 = vadd.xlane.f32.xlu1 %v3831_v12  ;;  %v4082_v12 = vmul.f32 %v7956_v46, %v8176_v3 }
 0xe0c   :  { %3890 = vadd.xlane.f32.xlu0 %v3889_v48 }
 0xe0d   :  { %v4094_v48 = vsel %vm247_vm1, %v4082_v12, 0.0 }
 0xe0f   :  { %3884 = vadd.xlane.f32.xlu1 %v3883_v4  ;;  %v8323_v4 = vld [vmem:[#allocation5 + $0x20] sm:$0xff] }
 0xe10   :  { %3942 = vadd.xlane.f32.xlu0 %v3941_v7  ;;  %5675 = vmatprep.subr.mxu1 %v8323_v4 }
 0xe11   :  { %5676 = vmatpush3.msra.mxu1 %v8323_v4 }
 0xe13   :  { %3936 = vadd.xlane.f32.xlu1 %v3935_v24 }
 0xe14   :  { %3994 = vadd.xlane.f32.xlu0 %v3993_v10 }
 0xe17   :  { %3988 = vadd.xlane.f32.xlu1 %v3987_v42 }
 0xe18   :  { %4046 = vadd.xlane.f32.xlu0 %v4045_v58 }
 0xe1b   :  { %4040 = vadd.xlane.f32.xlu1 %v4039_v50 }
 0xe1c   :  { %4098 = vadd.xlane.f32.xlu0 %v4097_v15 }
 0xe1f   :  { %4092 = vadd.xlane.f32.xlu1 %v4091_v52 }
 0xe20   :  { %3687 = vadd.xlane.f32.xlu0 %v3686_v49 }
 0xe23   :  { %3681 = vadd.xlane.f32.xlu1 %v3680_v21 }
 0xe24   :  { %3731 = vadd.xlane.f32.xlu0 %v3730_v39 }
 0xe27   :  { %3725 = vadd.xlane.f32.xlu1 %v3724_v37 }
 0xe28   :  { %3783 = vadd.xlane.f32.xlu0 %v3782_v29 }
 0xe2b   :  { %3777 = vadd.xlane.f32.xlu1 %v3776_v11 }
 0xe2c   :  { %3835 = vadd.xlane.f32.xlu0 %v3834_v16 }
 0xe2f   :  { %3829 = vadd.xlane.f32.xlu1 %v3828_v20 }
 0xe30   :  { %3887 = vadd.xlane.f32.xlu0 %v3886_v55 }
 0xe33   :  { %3881 = vadd.xlane.f32.xlu1 %v3880_v51 }
 0xe34   :  { %3939 = vadd.xlane.f32.xlu0 %v3938_v32 }
 0xe37   :  { %3933 = vadd.xlane.f32.xlu1 %v3932_v44  ;;  %v8970_v44 = vld [vmem:[#allocation22_spill] sm:$0xff] }
 0xe38   :  { %3991 = vadd.xlane.f32.xlu0 %v3990_v25  ;;  %v8372_v54 = vrot.slane %v5265_v57, %v8970_v44  ;;  %v8971_v25 = vld [vmem:[#allocation21_spill] sm:$0xff] }
 0xe39   :  { %v8375_v8 = vrot.slane %v5265_v57, %v8971_v25 }
 0xe3b   :  { %3985 = vadd.xlane.f32.xlu1 %v3984_v61  ;;  %v8972_v61 = vld [vmem:[#allocation20_spill] sm:$0xff] }
 0xe3c   :  { %4043 = vadd.xlane.f32.xlu0 %v4042_v6  ;;  %v8378_v43 = vrot.slane %v5265_v57, %v8972_v61 }
 0xe3f   :  { %4037 = vadd.xlane.f32.xlu1 %v4036_v22  ;;  %v8973_v22 = vld [vmem:[#allocation31_spill] sm:$0xff] }
 0xe40   :  { %4095 = vadd.xlane.f32.xlu0 %v4094_v48  ;;  %v8383_v13 = vrot.slane %v5265_v57, %v8973_v22  ;;  %v8974_v48 = vld [vmem:[#allocation32_spill] sm:$0xff] }
 0xe43   :  { %4089 = vadd.xlane.f32.xlu1 %v4088_v36  ;;  %v8386_v36 = vrot.slane %v5265_v57, %v8974_v48 }
 0xe5a   :  { %v3601_v46 = vpop.xlane.xlu0 %3600 }
 0xe5b   :  { %v3613_v0 = vsub.f32 %v8127_v14, %v3601_v46  ;;  %v8975_v46 = vld [vmem:[#allocation33_spill] sm:$0xff] }
 0xe5d   :  { %v3626_v3 = vmul.f32 1.442695, %v3613_v0  ;;  %v8389_v0 = vrot.slane %v5265_v57, %v8975_v46 }
 0xe5f   :  { %5953 = vpow2.f32 %v3626_v3 }
 0xe6c   :  { %v8329_v60 = vpop.eup %5953 }
 0xe6d   :  { %v3647_v7 = vsel %vm247_vm1, %v8329_v60, 0.0 }
 0xe6e   :  { %3648 = vadd.xlane.f32.xlu1 %v3647_v7  ;;  %v8976_v7 = vld [vmem:[#allocation34_spill] sm:$0xff] }
 0xe7d   :  { %v3598_v40 = vpop.xlane.xlu0 %3597 }
 0xe7e   :  { %v3612_v24 = vsub.f32 %v8193_v47, %v3598_v40  ;;  %v8393_v40 = vrot.slane %v5265_v57, %v8976_v7 }
 0xe80   :  { %v3624_v59 = vmul.f32 1.442695, %v3612_v24 }
 0xe81   :  { %v3607_v10 = vpop.xlane.xlu0 %3606 }
 0xe82   :  { %5955 = vpow2.f32 %v3624_v59  ;;  %v3615_v27 = vsub.f32 %v8202_v56, %v3607_v10 }
 0xe84   :  { %v3630_v42 = vmul.f32 1.442695, %v3615_v27  ;;  %v3604_v63 = vpop.xlane.xlu1 %3603 }
 0xe85   :  { %v3614_v14 = vsub.f32 %v8210_v17, %v3604_v63  ;;  %v3691_v58 = vpop.xlane.xlu0 %3690  ;;  %v8977_v63 = vld [vmem:[#allocation35_spill] sm:$0xff] }
 0xe86   :  { %5957 = vpow2.f32 %v3630_v42  ;;  %v3711_v27 = vmul.f32 %v8375_v8, %v3691_v58 }
 0xe87   :  { %v3628_v33 = vmul.f32 1.442695, %v3614_v14  ;;  %v8400_v14 = vrot.slane %v5265_v57, %v8977_v63 }
 0xe88   :  { %v3685_v50 = vpop.xlane.xlu1 %3684 }
 0xe89   :  { %5959 = vpow2.f32 %v3628_v33  ;;  %v3735_v34 = vpop.xlane.xlu0 %3734 }
 0xe8a   :  { %v3755_v12 = vmul.f32 %v8372_v54, %v3735_v34 }
 0xe8c   :  { %v3729_v15 = vpop.xlane.xlu1 %3728 }
 0xe8d   :  { %v3787_v23 = vpop.xlane.xlu0 %3786  ;;  %v3753_v3 = vmul.f32 %v8372_v54, %v3729_v15  ;;  %v3709_v15 = vmul.f32 %v8375_v8, %v3685_v50 }
 0xe8e   :  { %v3807_v42 = vmul.f32 %v8378_v43, %v3787_v23 }
 0xe8f   :  { %v8336_v52 = vpop.eup %5955 }
 0xe90   :  { %v3781_v47 = vpop.xlane.xlu1 %3780  ;;  %v3644_v9 = vsel %vm247_vm1, %v8336_v52, 0.0 }
 0xe91   :  { %3645 = vadd.xlane.f32.xlu1 %v3644_v9  ;;  %v3839_v56 = vpop.xlane.xlu0 %3838  ;;  %v3805_v9 = vmul.f32 %v8378_v43, %v3781_v47 }
 0xe93   :  { %v8340_v49 = vpop.eup %5957 }
 0xe94   :  { %v3833_v35 = vpop.xlane.xlu1 %3832  ;;  %v3653_v17 = vsel %vm247_vm1, %v8340_v49, 0.0 }
 0xe95   :  { %3654 = vadd.xlane.f32.xlu0 %v3653_v17  ;;  %v3891_v21 = vpop.xlane.xlu0 %3890  ;;  %v3857_v57 = vmul.f32 %v8383_v13, %v3833_v35 }
 0xe96   :  { %v8344_v62 = vpop.eup %5959  ;;  %v3911_v47 = vmul.f32 %v8386_v36, %v3891_v21 }
 0xe97   :  { %v3650_v39 = vsel %vm247_vm1, %v8344_v62, 0.0 }
 0xe98   :  { %v3885_v26 = vpop.xlane.xlu1 %3884 }
 0xe99   :  { %3651 = vadd.xlane.f32.xlu0 %v3650_v39  ;;  %v3943_v37 = vpop.xlane.xlu0 %3942 }
 0xe9a   :  { %v3963_v35 = vmul.f32 %v8389_v0, %v3943_v37 }
 0xe9c   :  { %v8348_v19 = vpop.xlane.xlu1 %3936 }
 0xe9d   :  { %v8350_v29 = vpop.xlane.xlu0 %3994  ;;  %v3961_v21 = vmul.f32 %v8389_v0, %v8348_v19  ;;  %v8428_v19 = vld [vmem:[%s8831_s8 + $0x28] ss:$0 sm:$0xff] }
 0xea0   :  { %v8352_v31 = vpop.xlane.xlu1 %3988 }
 0xea1   :  { %v8354_v11 = vpop.xlane.xlu0 %4046 }
 0xea2   :  { %4473 = vrot.lane.b32.xlu1 %v7675_v53, %s6132_s24 }
 0xea4   :  { %v8358_v45 = vpop.xlane.xlu1 %4040 }
 0xea5   :  { %v8360_v16 = vpop.xlane.xlu0 %4098 }
 0xea6   :  { %4560 = vrot.lane.b32.xlu1 %v7675_v53, %s6140_s0 }
 0xea8   :  { %v8364_v30 = vpop.xlane.xlu1 %4092 }
 0xea9   :  { %v3688_v20 = vpop.xlane.xlu0 %3687 }
 0xeaa   :  { %v3710_v24 = vmul.f32 %v8375_v8, %v3688_v20  ;;  %v3763_v20 = vadd.f32 %v3755_v12, %v3711_v27 }
 0xeac   :  { %v3682_v18 = vpop.xlane.xlu1 %3681  ;;  %v3815_v50 = vadd.f32 %v3807_v42, %v3763_v20 }
 0xead   :  { %v3732_v55 = vpop.xlane.xlu0 %3731  ;;  %v3708_v58 = vmul.f32 %v8375_v8, %v3682_v18 }
 0xeaf   :  { %4562 = vrot.lane.b32.xlu0 %v7672_v5, %s6140_s0  ;;  %v3754_v5 = vmul.f32 %v8372_v54, %v3732_v55  ;;  %v3859_v55 = vmul.f32 %v8383_v13, %v3839_v56  ;;  %v3909_v56 = vmul.f32 %v8386_v36, %v3885_v26  ;;  %v4015_v26 = vmul.f32 %v8393_v40, %v8350_v29 }
 0xeb0   :  { %v3726_v2 = vpop.xlane.xlu1 %3725  ;;  %v4067_v29 = vmul.f32 %v8400_v14, %v8354_v11  ;;  %v4117_v11 = vmul.f32 %v8428_v19, %v8364_v30 }
 0xeb1   :  { %v3784_v51 = vpop.xlane.xlu0 %3783  ;;  %v3752_v33 = vmul.f32 %v8372_v54, %v3726_v2  ;;  %v3762_v17 = vadd.f32 %v3754_v5, %v3710_v24 }
 0xeb2   :  { %v3806_v59 = vmul.f32 %v8378_v43, %v3784_v51  ;;  %v3761_v51 = vadd.f32 %v3753_v3, %v3709_v15  ;;  %v3867_v3 = vadd.f32 %v3859_v55, %v3815_v50  ;;  %v5665_v50 = vpop.f32.mrf.mxu1 }
 0xeb3   :  { %v3760_v5 = vadd.f32 %v3752_v33, %v3708_v58 }
 0xeb4   :  { %v3778_v28 = vpop.xlane.xlu1 %3777  ;;  %v3814_v25 = vadd.f32 %v3806_v59, %v3762_v17  ;;  %v3813_v24 = vadd.f32 %v3805_v9, %v3761_v51  ;;  %v3919_v15 = vadd.f32 %v3911_v47, %v3867_v3  ;;  %v4065_v51 = vmul.f32 %v8400_v14, %v8358_v45 }
 0xeb5   :  { %v3836_v32 = vpop.xlane.xlu0 %3835  ;;  %v3804_v23 = vmul.f32 %v8378_v43, %v3778_v28 }
 0xeb6   :  { %v3858_v39 = vmul.f32 %v8383_v13, %v3836_v32  ;;  %v3865_v27 = vadd.f32 %v3857_v57, %v3813_v24  ;;  %v3971_v55 = vadd.f32 %v3963_v35, %v3919_v15 }
 0xeb7   :  { %v3812_v59 = vadd.f32 %v3804_v23, %v3760_v5 }
 0xeb8   :  { %v3830_v53 = vpop.xlane.xlu1 %3829  ;;  %v3866_v18 = vadd.f32 %v3858_v39, %v3814_v25  ;;  %v3917_v37 = vadd.f32 %v3909_v56, %v3865_v27  ;;  %v4023_v25 = vadd.f32 %v4015_v26, %v3971_v55 }
 0xeb9   :  { %v3888_v6 = vpop.xlane.xlu0 %3887  ;;  %v3856_v32 = vmul.f32 %v8383_v13, %v3830_v53 }
 0xeba   :  { %v3910_v2 = vmul.f32 %v8386_v36, %v3888_v6  ;;  %v3969_v23 = vadd.f32 %v3961_v21, %v3917_v37 }
 0xebb   :  { %v3864_v9 = vadd.f32 %v3856_v32, %v3812_v59 }
 0xebc   :  { %v3882_v10 = vpop.xlane.xlu1 %3881  ;;  %v3918_v42 = vadd.f32 %v3910_v2, %v3866_v18  ;;  %v4119_v2 = vmul.f32 %v8428_v19, %v8360_v16  ;;  %v4075_v18 = vadd.f32 %v4067_v29, %v4023_v25  ;;  %v4302_v16 = vpop.f32.mrf.mxu1 }
 0xebd   :  { %v3940_v34 = vpop.xlane.xlu0 %3939  ;;  %v3908_v6 = vmul.f32 %v8386_v36, %v3882_v10  ;;  %v4013_v10 = vmul.f32 %v8393_v40, %v8352_v31 }
 0xebe   :  { %v3962_v28 = vmul.f32 %v8389_v0, %v3940_v34 }
 0xebf   :  { %v3916_v58 = vadd.f32 %v3908_v6, %v3864_v9  ;;  %v4127_v6 = vadd.f32 %v4119_v2, %v4075_v18 }
 0xec0   :  { %v3934_v63 = vpop.xlane.xlu1 %3933  ;;  %v3970_v39 = vadd.f32 %v3962_v28, %v3918_v42  ;;  %v5658_v28 = vpop.f32.mrf.mxu0 }
 0xec1   :  { %v3992_v12 = vpop.xlane.xlu0 %3991  ;;  %v3960_v34 = vmul.f32 %v8389_v0, %v3934_v63 }
 0xec2   :  { %v4014_v53 = vmul.f32 %v8393_v40, %v3992_v12  ;;  %v4021_v12 = vadd.f32 %v4013_v10, %v3969_v23  ;;  %v4215_v26 = vpop.f32.mrf.mxu0  ;;  %v6015_v10 = vld [vmem:[%s8826_s3 + $0x8] sm:$0xff]  ;;  %v8472_v23 = vld [vmem:[%s8826_s3 + $0x38] sm:$0xff] }
 0xec3   :  { %v3968_v47 = vadd.f32 %v3960_v34, %v3916_v58 }
 0xec4   :  { %v3986_v33 = vpop.xlane.xlu1 %3985  ;;  %v4022_v31 = vadd.f32 %v4014_v53, %v3970_v39  ;;  %v4073_v3 = vadd.f32 %v4065_v51, %v4021_v12 }
 0xec5   :  { %v4044_v17 = vpop.xlane.xlu0 %4043  ;;  %v4012_v63 = vmul.f32 %v8393_v40, %v3986_v33  ;;  %v4308_v33 = vadd.f32 %v5665_v50, %v4127_v6 }
 0xec6   :  { %v4066_v20 = vmul.f32 %v8400_v14, %v4044_v17  ;;  %v4125_v42 = vadd.f32 %v4117_v11, %v4073_v3 }
 0xec7   :  { %v4020_v45 = vadd.f32 %v4012_v63, %v3968_v47  ;;  %v8488_v47 = vld [vmem:[%s8826_s3 + $0x58] sm:$0xff] }
 0xec8   :  { %v4038_v57 = vpop.xlane.xlu1 %4037  ;;  %v4074_v24 = vadd.f32 %v4066_v20, %v4022_v31  ;;  %v4221_v9 = vadd.f32 %v5658_v28, %v4125_v42  ;;  %v8505_v28 = vld [vmem:[%s8826_s3 + $0x78] sm:$0xff] }
 0xec9   :  { %v4064_v5 = vmul.f32 %v8400_v14, %v4038_v57  ;;  %v4096_v32 = vpop.xlane.xlu0 %4095  ;;  %v8480_v57 = vld [vmem:[%s8826_s3 + $0x48] sm:$0xff] }
 0xeca   :  { %v4118_v56 = vmul.f32 %v8428_v19, %v4096_v32 }
 0xecb   :  { %v4072_v27 = vadd.f32 %v4064_v5, %v4020_v45 }
 0xecc   :  { %v4126_v35 = vadd.f32 %v4118_v56, %v4074_v24  ;;  %v4090_v59 = vpop.xlane.xlu1 %4089  ;;  %v8496_v24 = vld [vmem:[%s8826_s3 + $0x68] sm:$0xff] }
 0xecd   :  { %v4116_v21 = vmul.f32 %v8428_v19, %v4090_v59 }
 0xece   :  { %v4303_v53 = vadd.f32 %v4302_v16, %v4126_v35 }
 0xecf   :  { %v4124_v15 = vadd.f32 %v4116_v21, %v4072_v27 }
 0xed0   :  { %5670 = vmatprep.mubr.msk.f32.mxu0 %vm247_vm1, %v4303_v53  ;;  %v8978_v53 = vld [vmem:[#allocation23_spill] sm:$0xff] }
 0xed1   :  { %v4216_v30 = vadd.f32 %v4215_v26, %v4124_v15  ;;  %5671 = vmatmul.mubr.msk.f32.vlgmr.msra.gmra.mxu0 %vm247_vm1, %v4308_v33 }
 0xed2   :  { %5681 = vmatpush3.msra.mxu0 %v8131_v41  ;;  %v6016_v41 = vld [vmem:[%s8826_s3 + $0x18] sm:$0xff] }
 0xed3   :  { %5677 = vmatprep.mubr.msk.f32.mxu1 %vm247_vm1, %v4216_v30 }
 0xed4   :  { %5678 = vmatmul.mubr.msk.f32.vlgmr.msra.gmra.mxu1 %vm247_vm1, %v4221_v9 }
 0xef7   :  { %v3649_v34 = vpop.xlane.xlu1 %3648 }
 0xef8   :  { %5961 = vrcp.f32 %v3649_v34 }
 0xf05   :  { %v5962_v17 = vpop.eup %5961 }
 0xf06   :  { %v8449_v37 = vmul.f32 %v5962_v17, %v8329_v60  ;;  %v8464_v60 = vld [vmem:[%s8826_s3 + $0x28] sm:$0xff]  ;;  %v8545_v17 = vld [vmem:[%s8826_s3 + $0x20] sm:$0xff] }
 0xf08   :  { %v3677_v39 = vmul.f32 %v6015_v10, %v8449_v37  ;;  %v3721_v55 = vmul.f32 %v6016_v41, %v8449_v37  ;;  %v3773_v58 = vmul.f32 %v8464_v60, %v8449_v37  ;;  %v3825_v51 = vmul.f32 %v8472_v23, %v8449_v37 }
 0xf09   :  { %v3877_v25 = vmul.f32 %v8480_v57, %v8449_v37  ;;  %v3929_v5 = vmul.f32 %v8488_v47, %v8449_v37  ;;  %v3981_v56 = vmul.f32 %v8496_v24, %v8449_v37  ;;  %v4033_v3 = vmul.f32 %v8505_v28, %v8449_v37 }
 0xf0a   :  { %v3695_v20 = vsel %vm247_vm1, %v3677_v39, 0.0  ;;  %v3739_v29 = vsel %vm247_vm1, %v3721_v55, 0.0  ;;  %v3791_v63 = vsel %vm247_vm1, %v3773_v58, 0.0  ;;  %v3843_v31 = vsel %vm247_vm1, %v3825_v51, 0.0  ;;  %v6025_v55 = vld [vmem:[%s8826_s3 + $0x30] sm:$0xff]  ;;  %v6026_v58 = vld [vmem:[%s8826_s3 + $0x40] sm:$0xff] }
 0xf0b   :  { %3696 = vadd.xlane.f32.xlu1 %v3695_v20  ;;  %v3895_v50 = vsel %vm247_vm1, %v3877_v25, 0.0  ;;  %v3947_v11 = vsel %vm247_vm1, %v3929_v5, 0.0  ;;  %v3999_v45 = vsel %vm247_vm1, %v3981_v56, 0.0  ;;  %v4051_v59 = vsel %vm247_vm1, %v4033_v3, 0.0  ;;  %v6027_v25 = vld [vmem:[%s8826_s3 + $0x50] sm:$0xff] }
 0xf0f   :  { %3740 = vadd.xlane.f32.xlu1 %v3739_v29 }
 0xf13   :  { %3792 = vadd.xlane.f32.xlu1 %v3791_v63 }
 0xf17   :  { %3844 = vadd.xlane.f32.xlu1 %v3843_v31 }
 0xf1a   :  { %v3646_v2 = vpop.xlane.xlu1 %3645 }
 0xf1b   :  { %5963 = vrcp.f32 %v3646_v2  ;;  %3896 = vadd.xlane.f32.xlu1 %v3895_v50 }
 0xf1e   :  { %v4474_v32 = vpop.permute.xlu1 %4473  ;;  %v3655_v12 = vpop.xlane.xlu0 %3654 }
 0xf1f   :  { %5965 = vrcp.f32 %v3655_v12  ;;  %5682 = vmatprep.subr.mxu0 %v4474_v32  ;;  %3948 = vadd.xlane.f32.xlu1 %v3947_v11 }
 0xf20   :  { %5683 = vmatpush3.msra.mxu0 %v4474_v32  ;;  %v6028_v32 = vld [vmem:[%s8826_s3 + $0x60] sm:$0xff] }
 0xf21   :  { %5694 = vmatprep.subr.mxu0 %v8062_v1 }
 0xf22   :  { %v3652_v18 = vpop.xlane.xlu0 %3651  ;;  %v4561_v16 = vpop.permute.xlu1 %4560 }
 0xf23   :  { %5967 = vrcp.f32 %v3652_v18  ;;  %4000 = vadd.xlane.f32.xlu1 %v3999_v45  ;;  %v6029_v18 = vld [vmem:[%s8826_s3 + $0x70] sm:$0xff] }
 0xf26   :  { %v4563_v35 = vpop.permute.xlu0 %4562 }
 0xf27   :  { %5687 = vmatprep.subr.mxu1 %v4563_v35  ;;  %4052 = vadd.xlane.f32.xlu1 %v4051_v59  ;;  %v6030_v59 = vld [vmem:[%s8826_s3 + $0x80] sm:$0xff] }
 0xf28   :  { %v5964_v6 = vpop.eup %5963  ;;  %5688 = vmatpush3.msra.mxu1 %v4563_v35 }
 0xf29   :  { %v8511_v27 = vmul.f32 %v5964_v6, %v8336_v52  ;;  %5689 = vmatprep.subr.mxu1 %v4561_v16 }
 0xf2a   :  { %5690 = vmatpush3.msra.mxu1 %v4561_v16 }
 0xf2b   :  { %5684 = vmatprep.mubr.msk.f32.mxu0 %vm247_vm1, %v8511_v27  ;;  %5701 = vmatprep.subr.mxu1 %v8320_v38  ;;  %v3824_v29 = vmul.f32 %v6025_v55, %v8511_v27  ;;  %v3876_v63 = vmul.f32 %v6026_v58, %v8511_v27 }
 0xf2c   :  { %v5966_v21 = vpop.eup %5965  ;;  %5685 = vmatmul.mubr.msk.f32.vlgmr.msra.gmra.mxu0 %vm247_vm1, %v8449_v37 }
 0xf2d   :  { %v8518_v42 = vmul.f32 %v5966_v21, %v8340_v49  ;;  %5695 = vmatpush3.msra.mxu0 %v8062_v1  ;;  %v6023_v1 = vld [vmem:[%s8826_s3] sm:$0xff]  ;;  %v3892_v51 = vsel %vm247_vm1, %v3876_v63, 0.0  ;;  %v6031_v21 = vld [vmem:[%s8826_s3 + $0x10] sm:$0xff] }
 0xf2e   :  { %5696 = vmatprep.subr.mxu0 %v8978_v53  ;;  %v3676_v35 = vmul.f32 %v6023_v1, %v8511_v27 }
 0xf2f   :  { %v3679_v52 = vmul.f32 %v6015_v10, %v8518_v42  ;;  %5697 = vmatpush3.msra.mxu0 %v8978_v53  ;;  %v3723_v30 = vmul.f32 %v6016_v41, %v8518_v42  ;;  %v3775_v34 = vmul.f32 %v8464_v60, %v8518_v42  ;;  %v3772_v10 = vmul.f32 %v8545_v17, %v8511_v27 }
 0xf30   :  { %v5968_v33 = vpop.eup %5967  ;;  %v3827_v41 = vmul.f32 %v8472_v23, %v8518_v42  ;;  %v3840_v60 = vsel %vm247_vm1, %v3824_v29, 0.0  ;;  %v3931_v31 = vmul.f32 %v8488_v47, %v8518_v42  ;;  %v3983_v5 = vmul.f32 %v8496_v24, %v8518_v42 }
 0xf31   :  { %v8526_v15 = vmul.f32 %v5968_v33, %v8344_v62  ;;  %v3701_v26 = vsel %vm247_vm1, %v3679_v52, 0.0  ;;  %v3745_v62 = vsel %vm247_vm1, %v3723_v30, 0.0  ;;  %v3797_v39 = vsel %vm247_vm1, %v3775_v34, 0.0  ;;  %v6032_v52 = vld [vmem:[%s8826_s3 + $0x88] sm:$0xff] }
 0xf32   :  { %3702 = vadd.xlane.f32.xlu0 %v3701_v26  ;;  %v3788_v20 = vsel %vm247_vm1, %v3772_v10, 0.0  ;;  %v3953_v2 = vsel %vm247_vm1, %v3931_v31, 0.0  ;;  %v3980_v47 = vmul.f32 %v6028_v32, %v8511_v27  ;;  %v4005_v12 = vsel %vm247_vm1, %v3983_v5, 0.0 }
 0xf33   :  { %5691 = vmatprep.mubr.msk.f32.mxu1 %vm247_vm1, %v8526_v15  ;;  %v3678_v49 = vmul.f32 %v6023_v1, %v8526_v15  ;;  %v4035_v56 = vmul.f32 %v8505_v28, %v8518_v42  ;;  %v4032_v24 = vmul.f32 %v6029_v18, %v8511_v27  ;;  %v4084_v28 = vmul.f32 %v6030_v59, %v8511_v27 }
 0xf34   :  { %5692 = vmatmul.mubr.msk.f32.vlgmr.msra.gmra.mxu1 %vm247_vm1, %v8518_v42  ;;  %v3996_v11 = vsel %vm247_vm1, %v3980_v47, 0.0  ;;  %v3692_v6 = vsel %vm247_vm1, %v3676_v35, 0.0  ;;  %v3720_v53 = vmul.f32 %v6031_v21, %v8511_v27  ;;  %v4085_v33 = vmul.f32 %v6032_v52, %v8449_v37  ;;  %v8979_v47 = vld [vmem:[#allocation14_spill] sm:$0xff] }
 0xf35   :  { %v3698_v9 = vsel %vm247_vm1, %v3678_v49, 0.0  ;;  %5702 = vmatpush3.msra.mxu1 %v8320_v38  ;;  %v3849_v38 = vsel %vm247_vm1, %v3827_v41, 0.0  ;;  %v4057_v45 = vsel %vm247_vm1, %v4035_v56, 0.0  ;;  %v4048_v3 = vsel %vm247_vm1, %v4032_v24, 0.0  ;;  %v8980_v56 = vld [vmem:[#allocation18_spill] sm:$0xff] }
 0xf36   :  { %3746 = vadd.xlane.f32.xlu0 %v3745_v62  ;;  %3699 = vadd.xlane.f32.xlu1 %v3698_v9  ;;  %v4100_v16 = vsel %vm247_vm1, %v4084_v28, 0.0  ;;  %v3736_v26 = vsel %vm247_vm1, %v3720_v53, 0.0  ;;  %v4103_v30 = vsel %vm247_vm1, %v4085_v33, 0.0  ;;  %v3722_v1 = vmul.f32 %v6031_v21, %v8526_v15 }
 0xf37   :  { %5703 = vmatprep.subr.mxu1 %v8323_v4  ;;  %v3826_v37 = vmul.f32 %v6025_v55, %v8526_v15  ;;  %v3878_v34 = vmul.f32 %v6026_v58, %v8526_v15  ;;  %v4034_v55 = vmul.f32 %v6029_v18, %v8526_v15 }
 0xf38   :  { %5704 = vmatpush3.msra.mxu1 %v8323_v4  ;;  %v3879_v4 = vmul.f32 %v8480_v57, %v8518_v42  ;;  %v3928_v57 = vmul.f32 %v6027_v25, %v8511_v27  ;;  %v3742_v49 = vsel %vm247_vm1, %v3722_v1, 0.0  ;;  %v3774_v27 = vmul.f32 %v8545_v17, %v8526_v15 }
 0xf39   :  { %v3846_v9 = vsel %vm247_vm1, %v3826_v37, 0.0  ;;  %v3898_v10 = vsel %vm247_vm1, %v3878_v34, 0.0  ;;  %v3982_v17 = vmul.f32 %v6028_v32, %v8526_v15  ;;  %v4054_v29 = vsel %vm247_vm1, %v4034_v55, 0.0 }
 0xf3a   :  { %3798 = vadd.xlane.f32.xlu0 %v3797_v39  ;;  %3789 = vadd.xlane.f32.xlu1 %v3788_v20  ;;  %v3901_v23 = vsel %vm247_vm1, %v3879_v4, 0.0  ;;  %v3944_v50 = vsel %vm247_vm1, %v3928_v57, 0.0  ;;  %v3794_v62 = vsel %vm247_vm1, %v3774_v27, 0.0  ;;  %v3930_v39 = vmul.f32 %v6027_v25, %v8526_v15 }
 0xf3b   :  { %v4002_v41 = vsel %vm247_vm1, %v3982_v17, 0.0  ;;  %v4087_v4 = vmul.f32 %v6032_v52, %v8518_v42 }
 0xf3c   :  { %v3950_v20 = vsel %vm247_vm1, %v3930_v39, 0.0 }
 0xf3d   :  { %v4109_v58 = vsel %vm247_vm1, %v4087_v4, 0.0 }
 0xf3e   :  { %3850 = vadd.xlane.f32.xlu0 %v3849_v38  ;;  %3841 = vadd.xlane.f32.xlu1 %v3840_v60  ;;  %v4086_v38 = vmul.f32 %v6030_v59, %v8526_v15 }
 0xf40   :  { %v4106_v60 = vsel %vm247_vm1, %v4086_v38, 0.0 }
 0xf42   :  { %3902 = vadd.xlane.f32.xlu0 %v3901_v23  ;;  %3893 = vadd.xlane.f32.xlu1 %v3892_v51  ;;  %v8633_v23 = vld [vmem:[%s8831_s8 + $0x18] sm:$0xff] }
 0xf43   :  { %v8637_v51 = vrot.slane %v8633_v23, %v8970_v44 }
 0xf46   :  { %3954 = vadd.xlane.f32.xlu0 %v3953_v2  ;;  %3945 = vadd.xlane.f32.xlu1 %v3944_v50 }
 0xf4a   :  { %4006 = vadd.xlane.f32.xlu0 %v4005_v12  ;;  %3997 = vadd.xlane.f32.xlu1 %v3996_v11 }
 0xf4e   :  { %4058 = vadd.xlane.f32.xlu0 %v4057_v45  ;;  %4049 = vadd.xlane.f32.xlu1 %v4048_v3 }
 0xf52   :  { %3693 = vadd.xlane.f32.xlu0 %v3692_v6  ;;  %4101 = vadd.xlane.f32.xlu1 %v4100_v16 }
 0xf56   :  { %3737 = vadd.xlane.f32.xlu0 %v3736_v26  ;;  %4104 = vadd.xlane.f32.xlu1 %v4103_v30 }
 0xf5a   :  { %3743 = vadd.xlane.f32.xlu0 %v3742_v49 }
 0xf5e   :  { %3795 = vadd.xlane.f32.xlu0 %v3794_v62 }
 0xf62   :  { %3847 = vadd.xlane.f32.xlu0 %v3846_v9 }
 0xf66   :  { %3899 = vadd.xlane.f32.xlu0 %v3898_v10 }
 0xf6a   :  { %3951 = vadd.xlane.f32.xlu0 %v3950_v20 }
 0xf6e   :  { %4003 = vadd.xlane.f32.xlu0 %v4002_v41 }
 0xf72   :  { %4055 = vadd.xlane.f32.xlu0 %v4054_v29 }
 0xf76   :  { %4107 = vadd.xlane.f32.xlu0 %v4106_v60 }
 0xf7a   :  { %4110 = vadd.xlane.f32.xlu0 %v4109_v58 }
 0xf91   :  { %v5672_v63 = vpop.f32.mrf.mxu0 }
 0xf93   :  { %v4383_v57 = vpop.f32.mrf.mxu0 }
 0xf94   :  { %v5679_v15 = vpop.f32.mrf.mxu1  ;;  %v3697_v31 = vpop.xlane.xlu1 %3696 }
 0xf95   :  { %v4470_v25 = vadd.f32 %v5679_v15, %v5672_v63  ;;  %v3713_v55 = vmul.f32 %v8375_v8, %v3697_v31 }
 0xf96   :  { %v4464_v2 = vpop.f32.mrf.mxu1 }
 0xf97   :  { %v4814_v42 = vadd.f32 %v8637_v51, %v4470_v25  ;;  %v4465_v50 = vadd.f32 %v4464_v2, %v4383_v57 }
 0xf98   :  { %v3741_v5 = vpop.xlane.xlu1 %3740 }
 0xf99   :  { %v4813_v32 = vadd.f32 %v8637_v51, %v4465_v50  ;;  %v8642_v12 = vadd.f32 %v4814_v42, %v8979_v47  ;;  %v3757_v39 = vmul.f32 %v8372_v54, %v3741_v5 }
 0xf9b   :  { %v4824_v11 = vsel %vm143_vm0, %v8642_v12, 0.0  ;;  %v8647_v44 = vadd.f32 %v4813_v32, %v8980_v56  ;;  %v3765_v4 = vadd.f32 %v3757_v39, %v3713_v55 }
 0xf9c   :  { %4825 = vadd.xlane.f32.xlu0 %v4824_v11  ;;  %v3793_v18 = vpop.xlane.xlu1 %3792 }
 0xf9d   :  { %v4821_v24 = vsel %vm143_vm0, %v8647_v44, 0.0  ;;  %v3809_v29 = vmul.f32 %v8378_v43, %v3793_v18 }
 0xf9e   :  { %4822 = vadd.xlane.f32.xlu1 %v4821_v24 }
 0xf9f   :  { %v3817_v2 = vadd.f32 %v3809_v29, %v3765_v4 }
 0xfa0   :  { %v3845_v45 = vpop.xlane.xlu1 %3844 }
 0xfa1   :  { %v3861_v58 = vmul.f32 %v8383_v13, %v3845_v45 }
 0xfa3   :  { %v3869_v31 = vadd.f32 %v3861_v58, %v3817_v2 }
 0xfa4   :  { %v3897_v3 = vpop.xlane.xlu1 %3896 }
 0xfa5   :  { %v3913_v42 = vmul.f32 %v8386_v36, %v3897_v3 }
 0xfa7   :  { %v3921_v18 = vadd.f32 %v3913_v42, %v3869_v31 }
 0xfa8   :  { %v3949_v35 = vpop.xlane.xlu1 %3948 }
 0xfa9   :  { %v3965_v32 = vmul.f32 %v8389_v0, %v3949_v35 }
 0xfac   :  { %v4001_v59 = vpop.xlane.xlu1 %4000 }
 0xfad   :  { %v4017_v24 = vmul.f32 %v8393_v40, %v4001_v59 }
 0xfb0   :  { %v4053_v28 = vpop.xlane.xlu1 %4052 }
 0xfb1   :  { %v4069_v3 = vmul.f32 %v8400_v14, %v4053_v28 }
 0xfbb   :  { %v8651_v6 = vpop.xlane.xlu0 %3702 }
 0xfbf   :  { %v3700_v16 = vpop.xlane.xlu1 %3699  ;;  %v8653_v21 = vpop.xlane.xlu0 %3746 }
 0xfc0   :  { %v3714_v28 = vmul.f32 %v8375_v8, %v3700_v16  ;;  %v3759_v2 = vmul.f32 %v8372_v54, %v8653_v21 }
 0xfc3   :  { %v3790_v53 = vpop.xlane.xlu1 %3789  ;;  %v8655_v52 = vpop.xlane.xlu0 %3798 }
 0xfc4   :  { %v3808_v38 = vmul.f32 %v8378_v43, %v3790_v53  ;;  %v3811_v16 = vmul.f32 %v8378_v43, %v8655_v52 }
 0xfc7   :  { %v3842_v33 = vpop.xlane.xlu1 %3841  ;;  %v8657_v26 = vpop.xlane.xlu0 %3850 }
 0xfc8   :  { %v3860_v15 = vmul.f32 %v8383_v13, %v3842_v33 }
 0xfcb   :  { %v8659_v30 = vpop.xlane.xlu0 %3902  ;;  %v3894_v1 = vpop.xlane.xlu1 %3893 }
 0xfcc   :  { %v3912_v50 = vmul.f32 %v8386_v36, %v3894_v1 }
 0xfcf   :  { %v8661_v49 = vpop.xlane.xlu0 %3954  ;;  %v3946_v27 = vpop.xlane.xlu1 %3945 }
 0xfd0   :  { %v3964_v11 = vmul.f32 %v8389_v0, %v3946_v27  ;;  %v3967_v52 = vmul.f32 %v8389_v0, %v8661_v49 }
 0xfd3   :  { %v8663_v62 = vpop.xlane.xlu0 %4006  ;;  %v3998_v9 = vpop.xlane.xlu1 %3997 }
 0xfd4   :  { %v4016_v45 = vmul.f32 %v8393_v40, %v3998_v9 }
 0xfd7   :  { %v8665_v37 = vpop.xlane.xlu0 %4058  ;;  %v4050_v10 = vpop.xlane.xlu1 %4049 }
 0xfd8   :  { %v4068_v1 = vmul.f32 %v8400_v14, %v4050_v10 }
 0xfdb   :  { %v3694_v34 = vpop.xlane.xlu0 %3693  ;;  %v4102_v25 = vpop.xlane.xlu1 %4101 }
 0xfdc   :  { %v3712_v17 = vmul.f32 %v8375_v8, %v3694_v34  ;;  %v3973_v34 = vadd.f32 %v3965_v32, %v3921_v18  ;;  %v4120_v27 = vmul.f32 %v8428_v19, %v4102_v25 }
 0xfdf   :  { %v3738_v20 = vpop.xlane.xlu0 %3737  ;;  %v4105_v53 = vpop.xlane.xlu1 %4104 }
 0xfe0   :  { %v3756_v41 = vmul.f32 %v8372_v54, %v3738_v20  ;;  %v4121_v35 = vmul.f32 %v8428_v19, %v4105_v53 }
 0xfe2   :  { %v3764_v60 = vadd.f32 %v3756_v41, %v3712_v17  ;;  %v4025_v17 = vadd.f32 %v4017_v24, %v3973_v34 }
 0xfe3   :  { %v3744_v63 = vpop.xlane.xlu0 %3743 }
 0xfe4   :  { %v3816_v57 = vadd.f32 %v3808_v38, %v3764_v60  ;;  %v4077_v29 = vadd.f32 %v4069_v3, %v4025_v17  ;;  %v3758_v9 = vmul.f32 %v8372_v54, %v3744_v63  ;;  %v3715_v63 = vmul.f32 %v8375_v8, %v8651_v6 }
 0xfe5   :  { %v3863_v54 = vmul.f32 %v8383_v13, %v8657_v26 }
 0xfe6   :  { %v3868_v5 = vadd.f32 %v3860_v15, %v3816_v57  ;;  %v4129_v60 = vadd.f32 %v4121_v35, %v4077_v29  ;;  %v3766_v42 = vadd.f32 %v3758_v9, %v3714_v28  ;;  %v3767_v32 = vadd.f32 %v3759_v2, %v3715_v63 }
 0xfe7   :  { %v3796_v47 = vpop.xlane.xlu0 %3795 }
 0xfe8   :  { %v3920_v56 = vadd.f32 %v3912_v50, %v3868_v5  ;;  %v3810_v58 = vmul.f32 %v8378_v43, %v3796_v47 }
 0xfea   :  { %v3972_v33 = vadd.f32 %v3964_v11, %v3920_v56  ;;  %v3818_v50 = vadd.f32 %v3810_v58, %v3766_v42  ;;  %v3819_v11 = vadd.f32 %v3811_v16, %v3767_v32  ;;  %v3915_v56 = vmul.f32 %v8386_v36, %v8659_v30  ;;  %v8982_v42 = vld [vmem:[#allocation19_spill] sm:$0xff]  ;;  %v4894_v32 = vld [vmem:[#allocation7 + $0x20] sm:$0xff] }
 0xfeb   :  { %v3848_v39 = vpop.xlane.xlu0 %3847 }
 0xfec   :  { %v4024_v20 = vadd.f32 %v4016_v45, %v3972_v33  ;;  %v5686_v41 = vpop.f32.mrf.mxu0  ;;  %v3862_v25 = vmul.f32 %v8383_v13, %v3848_v39  ;;  %v3871_v43 = vadd.f32 %v3863_v54, %v3819_v11  ;;  %v4019_v13 = vmul.f32 %v8393_v40, %v8663_v62 }
 0xfed   :  { %v4557_v15 = vadd.f32 %v5686_v41, %v4129_v60 }
 0xfee   :  { %v4076_v55 = vadd.f32 %v4068_v1, %v4024_v20  ;;  %v4551_v4 = vpop.f32.mrf.mxu0  ;;  %v3870_v21 = vadd.f32 %v3862_v25, %v3818_v50  ;;  %v3923_v53 = vadd.f32 %v3915_v56, %v3871_v43 }
 0xfef   :  { %v3900_v59 = vpop.xlane.xlu0 %3899 }
 0xff0   :  { %v4128_v38 = vadd.f32 %v4120_v27, %v4076_v55  ;;  %v3914_v5 = vmul.f32 %v8386_v36, %v3900_v59  ;;  %v3975_v3 = vadd.f32 %v3967_v52, %v3923_v53  ;;  %v4071_v36 = vmul.f32 %v8400_v14, %v8665_v37 }
 0xff2   :  { %v4552_v10 = vadd.f32 %v4551_v4, %v4128_v38  ;;  %v3922_v18 = vadd.f32 %v3914_v5, %v3870_v21  ;;  %v4027_v1 = vadd.f32 %v4019_v13, %v3975_v3 }
 0xff3   :  { %v3952_v57 = vpop.xlane.xlu0 %3951 }
 0xff4   :  { %5705 = vmatprep.mubr.msk.f32.mxu1 %vm247_vm1, %v4552_v10  ;;  %v3966_v47 = vmul.f32 %v8389_v0, %v3952_v57  ;;  %v5693_v33 = vpop.f32.mrf.mxu1  ;;  %v4079_v17 = vadd.f32 %v4071_v36, %v4027_v1 }
 0xff5   :  { %5706 = vmatmul.mubr.msk.f32.vlgmr.msra.gmra.mxu1 %vm247_vm1, %v4557_v15  ;;  %v8981_v15 = vld [vmem:[#allocation17_spill] sm:$0xff] }
 0xff6   :  { %v3974_v24 = vadd.f32 %v3966_v47, %v3922_v18  ;;  %v4638_v0 = vpop.f32.mrf.mxu1 }
 0xff7   :  { %v4004_v31 = vpop.xlane.xlu0 %4003 }
 0xff8   :  { %v4018_v8 = vmul.f32 %v8393_v40, %v4004_v31  ;;  %v4895_v31 = vld [vmem:[#allocation7 + $0x28] sm:$0xff] }
 0xffa   :  { %v4026_v26 = vadd.f32 %v4018_v8, %v3974_v24 }
 0xffb   :  { %v4056_v6 = vpop.xlane.xlu0 %4055 }
 0xffc   :  { %v4070_v45 = vmul.f32 %v8400_v14, %v4056_v6 }
 0xffe   :  { %v4078_v30 = vadd.f32 %v4070_v45, %v4026_v26 }
 0xfff   :  { %v4108_v34 = vpop.xlane.xlu0 %4107 }
0x1000   :  { %v4122_v39 = vmul.f32 %v8428_v19, %v4108_v34  ;;  %v4876_v34 = vrot.slane %v8633_v23, %v8972_v61  ;;  %v5319_v61 = vld [vmem:[%s8830_s7 + $0x78] sm:$0xff] }
0x1001   :  { %5722 = vmatprep.subr.mxu1 %v5319_v61 }
0x1002   :  { %v4130_v20 = vadd.f32 %v4122_v39, %v4078_v30  ;;  %v4884_v39 = vrot.slane %v8633_v23, %v8973_v22  ;;  %v5318_v22 = vld [vmem:[%s8830_s7 + $0x70] sm:$0xff]  ;;  %5723 = vmatpush3.msra.mxu1 %v5319_v61 }
0x1003   :  { %v4111_v49 = vpop.xlane.xlu0 %4110  ;;  %5724 = vmatprep.subr.mxu1 %v5318_v22 }
0x1004   :  { %v4639_v35 = vadd.f32 %v4638_v0, %v4130_v20  ;;  %v4123_v41 = vmul.f32 %v8428_v19, %v4111_v49  ;;  %5725 = vmatpush3.msra.mxu1 %v5318_v22 }
0x1006   :  { %v4131_v27 = vadd.f32 %v4123_v41, %v4079_v17  ;;  %5698 = vmatprep.mubr.msk.f32.mxu0 %vm247_vm1, %v4639_v35  ;;  %v8983_v35 = vld [vmem:[#allocation12_spill] sm:$0xff] }
0x1008   :  { %v4644_v40 = vadd.f32 %v5693_v33, %v4131_v27  ;;  %v8984_v27 = vld [vmem:[#allocation15_spill] sm:$0xff] }
0x100a   :  { %5699 = vmatmul.mubr.msk.f32.vlgmr.msra.gmra.mxu0 %vm247_vm1, %v4644_v40 }
0x1025   :  { %v4826_v62 = vpop.xlane.xlu0 %4825 }
0x1026   :  { %v4834_v37 = vmul.f32 0.03125, %v4826_v62  ;;  %v5317_v62 = vld [vmem:[%s8830_s7 + $0x68] sm:$0xff] }
0x1027   :  { %v4823_v55 = vpop.xlane.xlu1 %4822  ;;  %5726 = vmatprep.subr.mxu1 %v5317_v62 }
0x1028   :  { %v4833_v59 = vmul.f32 0.03125, %v4823_v55  ;;  %v4838_v4 = vsub.f32 %v8642_v12, %v4834_v37  ;;  %5727 = vmatpush3.msra.mxu1 %v5317_v62  ;;  %v5316_v55 = vld [vmem:[%s8830_s7 + $0x60] sm:$0xff]  ;;  %v5314_v37 = vld [vmem:[%s8830_s7 + $0x50] sm:$0xff] }
0x1029   :  { %5728 = vmatprep.subr.mxu1 %v5316_v55 }
0x102a   :  { %v4837_v58 = vsub.f32 %v8647_v44, %v4833_v59  ;;  %v4842_v63 = vmul.f32 %v4838_v4, %v4838_v4  ;;  %v4897_v44 = vld [vmem:[#allocation7 + $0x38] sm:$0xff]  ;;  %5729 = vmatpush3.msra.mxu1 %v5316_v55  ;;  %v5312_v59 = vld [vmem:[%s8830_s7 + $0x40] sm:$0xff] }
0x102b   :  { %5708 = vmatprep.subr.mxu0 %v4897_v44 }
0x102c   :  { %v4841_v50 = vmul.f32 %v4837_v58, %v4837_v58  ;;  %v4848_v12 = vsel %vm143_vm0, %v4842_v63, 0.0  ;;  %5709 = vmatpush3.msra.mxu0 %v4897_v44  ;;  %v4901_v44 = vrot.slane %v8633_v23, %v8974_v48 }
0x102e   :  { %v4845_v5 = vsel %vm143_vm0, %v4841_v50, 0.0 }
0x10b5   :  { %v5707_v14 = vpop.f32.mrf.mxu1 }
0x10b7   :  { %v4800_v38 = vpop.f32.mrf.mxu1 }
0x10ca   :  { %v5700_v29 = vpop.f32.mrf.mxu0 }
0x10cb   :  { %v4806_v9 = vadd.f32 %v5707_v14, %v5700_v29  ;;  %v5315_v14 = vld [vmem:[%s8830_s7 + $0x58] sm:$0xff]  ;;  %v5313_v29 = vld [vmem:[%s8830_s7 + $0x48] sm:$0xff]  ;;  %s6141_s7 = smov [#allocation8]  }
0x10cc   :  { %v4719_v60 = vpop.f32.mrf.mxu0  ;;  %5730 = vmatprep.subr.mxu1 %v5315_v14  ;;  %s5206_s17 = sshll.u32 %s6141_s7, 4  ;;  %s5207_s17 = int_to_ptr.vmem [resolvable:$true] %s5206_s17 }
0x10cd   :  { %v4816_v28 = vadd.f32 %v8637_v51, %v4806_v9  ;;  %v4801_v19 = vadd.f32 %v4800_v38, %v4719_v60  ;;  %5731 = vmatpush3.msra.mxu1 %v5315_v14  ;;  %s6094_s18 = scalar_lea.vmem %s5207_s17, 512  ;;  %p6099_p2 = scmp.lt.s32.totalorder %s5207_s17, %s5207_s17 }
0x10ce   :  { %5732 = vmatprep.subr.mxu1 %v5314_v37  ;;  %p6095_p1 = scmp.ne.s32.totalorder %s5207_s17, %s6094_s18  ;;  %p6100_p3 = scmp.lt.s32.totalorder %s6094_s18, %s6094_s18 }
0x10cf   :  { %v4815_v10 = vadd.f32 %v8637_v51, %v4801_v19  ;;  %v4820_v57 = vadd.f32 %v4816_v28, %v8981_v15  ;;  %v4896_v51 = vld [vmem:[#allocation7 + $0x30] sm:$0xff]  ;;  %5733 = vmatpush3.msra.mxu1 %v5314_v37 }
0x10d0   :  { %5710 = vmatprep.subr.mxu0 %v4896_v51  ;;  %5734 = vmatprep.subr.mxu1 %v5313_v29  ;;  %p6101_p4 = por %p6100_p3, %p6099_p2 }
0x10d1   :  { %v4830_v2 = vsel %vm143_vm0, %v4820_v57, 0.0  ;;  %v4819_v25 = vadd.f32 %v4815_v10, %v8982_v42  ;;  %5711 = vmatpush3.msra.mxu0 %v4896_v51  ;;  %5735 = vmatpush3.msra.mxu1 %v5313_v29 }
0x10d2   :  { %4831 = vadd.xlane.f32.xlu0 %v4830_v2  ;;  %5712 = vmatprep.subr.mxu0 %v4895_v31  ;;  %p6102_p5 = pnand %p6101_p4, %p6095_p1 }
0x10d3   :  { %v4827_v16 = vsel %vm143_vm0, %v4819_v25, 0.0  ;;  %5713 = vmatpush3.msra.mxu0 %v4895_v31  ;;  %5736 = vmatprep.subr.mxu1 %v5312_v59 }
0x10d4   :  { %4828 = vadd.xlane.f32.xlu1 %v4827_v16  ;;  %5714 = vmatprep.subr.mxu0 %v4894_v32  ;;  %v8985_v16 = vld [vmem:[#allocation13_spill] sm:$0xff] }
0x10d5   :  { %5715 = vmatpush3.msra.mxu0 %v4894_v32  ;;  %5737 = vmatpush3.msra.mxu1 %v5312_v59 }
0x10d6   :  { %4849 = vadd.xlane.f32.xlu0 %v4848_v12  ;;  %v8986_v12 = vld [vmem:[#allocation16_spill] sm:$0xff] }
0x10d8   :  { %4846 = vadd.xlane.f32.xlu1 %v4845_v5 }
0x115b   :  { %v4832_v54 = vpop.xlane.xlu0 %4831 }
0x115c   :  { %v4836_v21 = vmul.f32 0.03125, %v4832_v54 }
0x115d   :  { %v4829_v47 = vpop.xlane.xlu1 %4828 }
0x115e   :  { %v8725_v11 = vsub.f32 %v4820_v57, %v4836_v21  ;;  %v4835_v56 = vmul.f32 0.03125, %v4829_v47 }
0x115f   :  { %v4850_v18 = vpop.xlane.xlu0 %4849 }
0x1160   :  { %v8727_v8 = vsub.f32 %v4819_v25, %v4835_v56  ;;  %v4858_v6 = vmul.f32 0.03125, %v4850_v18  ;;  %v4844_v43 = vmul.f32 %v8725_v11, %v8725_v11 }
0x1161   :  { %v4847_v52 = vpop.xlane.xlu1 %4846 }
0x1162   :  { %v4862_v24 = vadd.f32 1e-05, %v4858_v6  ;;  %v4857_v45 = vmul.f32 0.03125, %v4847_v52  ;;  %v4854_v53 = vsel %vm143_vm0, %v4844_v43, 0.0  ;;  %v4843_v13 = vmul.f32 %v8727_v8, %v8727_v8 }
0x1163   :  { %4855 = vadd.xlane.f32.xlu0 %v4854_v53  ;;  %v5019_v53 = vrot.slane %v8633_v23, %v8975_v46 }
0x1164   :  { %5969 = vrsqrt.f32 %v4862_v24  ;;  %v4861_v26 = vadd.f32 1e-05, %v4857_v45  ;;  %v4851_v33 = vsel %vm143_vm0, %v4843_v13, 0.0 }
0x1165   :  { %4852 = vadd.xlane.f32.xlu1 %v4851_v33 }
0x1166   :  { %5971 = vrsqrt.f32 %v4861_v26 }
0x1171   :  { %v5970_v3 = vpop.eup %5969 }
0x1172   :  { %v4870_v36 = vmul.f32 %v5970_v3, %v4838_v4 }
0x1173   :  { %v5972_v30 = vpop.eup %5971 }
0x1174   :  { %v4869_v1 = vmul.f32 %v5972_v30, %v4837_v58  ;;  %v4878_v20 = vmul.f32 %v4876_v34, %v4870_v36 }
0x1176   :  { %v4877_v0 = vmul.f32 %v4876_v34, %v4869_v1  ;;  %v8739_v49 = vadd.f32 %v4884_v39, %v4878_v20 }
0x1178   :  { %v8741_v17 = vadd.f32 %v4884_v39, %v4877_v0  ;;  %v4890_v40 = vmul.f32 %v8739_v49, %v8984_v27 }
0x117a   :  { %v4889_v41 = vmul.f32 %v8741_v17, %v8983_v35 }
0x117c   :  { %5716 = vmatprep.mubr.msk.f32.mxu0 %vm143_vm0, %v4889_v41 }
0x117d   :  { %5717 = vmatmul.mubr.msk.f32.vlgmr.msra.gmra.mxu0 %vm143_vm0, %v4890_v40 }
0x11ec   :  { %v4856_v9 = vpop.xlane.xlu0 %4855 }
0x11ed   :  { %v4860_v38 = vmul.f32 0.03125, %v4856_v9 }
0x11ee   :  { %v4853_v60 = vpop.xlane.xlu1 %4852 }
0x11ef   :  { %v4864_v4 = vadd.f32 1e-05, %v4860_v38  ;;  %v4859_v28 = vmul.f32 0.03125, %v4853_v60 }
0x11f1   :  { %5973 = vrsqrt.f32 %v4864_v4  ;;  %v4863_v19 = vadd.f32 1e-05, %v4859_v28 }
0x11f3   :  { %5975 = vrsqrt.f32 %v4863_v19 }
0x11fe   :  { %v5974_v58 = vpop.eup %5973 }
0x11ff   :  { %v4872_v10 = vmul.f32 %v5974_v58, %v8725_v11 }
0x1200   :  { %v5976_v15 = vpop.eup %5975 }
0x1201   :  { %v4871_v57 = vmul.f32 %v5976_v15, %v8727_v8  ;;  %v4880_v2 = vmul.f32 %v4876_v34, %v4872_v10 }
0x1203   :  { %v4879_v42 = vmul.f32 %v4876_v34, %v4871_v57  ;;  %v4888_v25 = vadd.f32 %v4884_v39, %v4880_v2 }
0x1205   :  { %v4887_v63 = vadd.f32 %v4884_v39, %v4879_v42  ;;  %v4892_v5 = vmul.f32 %v4888_v25, %v8986_v12 }
0x1207   :  { %v4891_v50 = vmul.f32 %v4887_v63, %v8985_v16 }
0x1209   :  { %5719 = vmatprep.mubr.msk.f32.mxu0 %vm143_vm0, %v4891_v50 }
0x120a   :  { %5720 = vmatmul.mubr.msk.f32.gmra.mxu0 %vm143_vm0, %v4892_v5 }
0x123d   :  { %v5718_v51 = vpop.f32.mrf.mxu0 }
0x123e   :  { %v4986_v31 = vadd.f32 %v5718_v51, %v4901_v44 }
0x123f   :  { %v4980_v32 = vpop.f32.mrf.mxu0 }
0x1240   :  { %v4981_v54 = vadd.f32 %v4980_v32, %v4901_v44  ;;  %v5000_v21 = vmax.f32 %v4986_v31, 0.0 }
0x1242   :  { %v4999_v47 = vmax.f32 %v4981_v54, 0.0  ;;  %v5004_v56 = vmul.f32 %v5000_v21, %v8984_v27 }
0x1244   :  { %v5003_v11 = vmul.f32 %v4999_v47, %v8983_v35  ;;  %v5180_v47 = vrot.slane %v8633_v23, %v8976_v7 }
0x1246   :  { %5738 = vmatprep.mubr.msk.f32.mxu1 %vm2492_vm10, %v5003_v11 }
0x1247   :  { %5739 = vmatmul.mubr.msk.f32.vlgmr.msra.gmra.mxu1 %vm2492_vm10, %v5004_v56 }
0x12ca   :  { %v5721_v18 = vpop.f32.mrf.mxu0 }
0x12cb   :  { %v4996_v8 = vadd.f32 %v5721_v18, %v4901_v44  ;;  %v8987_v18 = vld [vmem:[#allocation35_spill] sm:$0xff] }
0x12cc   :  { %v4990_v6 = vpop.f32.mrf.mxu0 }
0x12cd   :  { %v4991_v43 = vadd.f32 %v4990_v6, %v4901_v44  ;;  %v5002_v52 = vmax.f32 %v4996_v8, 0.0  ;;  %v5188_v8 = vrot.slane %v8633_v23, %v8987_v18 }
0x12cf   :  { %v5001_v48 = vmax.f32 %v4991_v43, 0.0  ;;  %v5006_v45 = vmul.f32 %v5002_v52, %v8986_v12 }
0x12d1   :  { %v5005_v24 = vmul.f32 %v5001_v48, %v8985_v16 }
0x12d3   :  { %5741 = vmatprep.mubr.msk.f32.mxu1 %vm2492_vm10, %v5005_v24 }
0x12d4   :  { %5742 = vmatmul.mubr.msk.f32.gmra.mxu1 %vm2492_vm10, %v5006_v45 }
0x1307   :  { %v5740_v13 = vpop.f32.mrf.mxu1 }
0x1308   :  { %v5104_v26 = vadd.f32 %v5740_v13, %v5019_v53 }
0x1309   :  { %v5098_v33 = vpop.f32.mrf.mxu1 }
0x130a   :  { %v5118_v34 = vmul.f32 %v5104_v26, %v8984_v27  ;;  %v5099_v3 = vadd.f32 %v5098_v33, %v5019_v53 }
0x130c   :  { %v5117_v36 = vmul.f32 %v5099_v3, %v8983_v35  ;;  %v5122_v30 = vadd.f32 %v5118_v34, %v8739_v49 }
0x130e   :  { %v5128_v39 = vsel %vm143_vm0, %v5122_v30, 0.0  ;;  %v5121_v1 = vadd.f32 %v5117_v36, %v8741_v17 }
0x130f   :  { %5129 = vadd.xlane.f32.xlu0 %v5128_v39 }
0x1310   :  { %v5125_v20 = vsel %vm143_vm0, %v5121_v1, 0.0 }
0x1311   :  { %5126 = vadd.xlane.f32.xlu1 %v5125_v20 }
0x1394   :  { %v5743_v0 = vpop.f32.mrf.mxu1 }
0x1395   :  { %v5114_v46 = vadd.f32 %v5743_v0, %v5019_v53 }
0x1396   :  { %v5108_v41 = vpop.f32.mrf.mxu1 }
0x1397   :  { %v5120_v40 = vmul.f32 %v5114_v46, %v8986_v12  ;;  %v5109_v61 = vadd.f32 %v5108_v41, %v5019_v53 }
0x1398   :  { %v5130_v22 = vpop.xlane.xlu0 %5129 }
0x1399   :  { %v5119_v62 = vmul.f32 %v5109_v61, %v8985_v16  ;;  %v5138_v55 = vmul.f32 0.03125, %v5130_v22  ;;  %v5124_v14 = vadd.f32 %v5120_v40, %v4888_v25 }
0x139a   :  { %v5127_v49 = vpop.xlane.xlu1 %5126 }
0x139b   :  { %v5142_v37 = vsub.f32 %v5122_v30, %v5138_v55  ;;  %v5137_v29 = vmul.f32 0.03125, %v5127_v49  ;;  %v5134_v17 = vsel %vm143_vm0, %v5124_v14, 0.0  ;;  %v5123_v59 = vadd.f32 %v5119_v62, %v4887_v63 }
0x139c   :  { %5135 = vadd.xlane.f32.xlu0 %v5134_v17 }
0x139d   :  { %v5141_v9 = vsub.f32 %v5121_v1, %v5137_v29  ;;  %v5131_v38 = vsel %vm143_vm0, %v5123_v59, 0.0  ;;  %v5146_v60 = vmul.f32 %v5142_v37, %v5142_v37 }
0x139e   :  { %5132 = vadd.xlane.f32.xlu1 %v5131_v38 }
0x139f   :  { %v5152_v4 = vsel %vm143_vm0, %v5146_v60, 0.0  ;;  %v5145_v28 = vmul.f32 %v5141_v9, %v5141_v9 }
0x13a0   :  { %5153 = vadd.xlane.f32.xlu0 %v5152_v4 }
0x13a1   :  { %v5149_v19 = vsel %vm143_vm0, %v5145_v28, 0.0 }
0x13a2   :  { %5150 = vadd.xlane.f32.xlu1 %v5149_v19 }
0x1425   :  { %v5136_v58 = vpop.xlane.xlu0 %5135 }
0x1426   :  { %v5140_v10 = vmul.f32 0.03125, %v5136_v58 }
0x1427   :  { %v5133_v15 = vpop.xlane.xlu1 %5132 }
0x1428   :  { %v5144_v57 = vsub.f32 %v5124_v14, %v5140_v10  ;;  %v5139_v2 = vmul.f32 0.03125, %v5133_v15 }
0x1429   :  { %v5154_v42 = vpop.xlane.xlu0 %5153 }
0x142a   :  { %v5143_v25 = vsub.f32 %v5123_v59, %v5139_v2  ;;  %v5162_v63 = vmul.f32 0.03125, %v5154_v42  ;;  %v5148_v50 = vmul.f32 %v5144_v57, %v5144_v57 }
0x142b   :  { %v5151_v5 = vpop.xlane.xlu1 %5150 }
0x142c   :  { %v5166_v44 = vadd.f32 1e-05, %v5162_v63  ;;  %v5161_v51 = vmul.f32 0.03125, %v5151_v5  ;;  %v5158_v31 = vsel %vm143_vm0, %v5148_v50, 0.0  ;;  %v5147_v32 = vmul.f32 %v5143_v25, %v5143_v25 }
0x142d   :  { %5159 = vadd.xlane.f32.xlu0 %v5158_v31 }
0x142e   :  { %5977 = vrsqrt.f32 %v5166_v44  ;;  %v5165_v54 = vadd.f32 1e-05, %v5161_v51  ;;  %v5155_v21 = vsel %vm143_vm0, %v5147_v32, 0.0 }
0x142f   :  { %5156 = vadd.xlane.f32.xlu1 %v5155_v21 }
0x1430   :  { %5979 = vrsqrt.f32 %v5165_v54 }
0x143b   :  { %v5978_v11 = vpop.eup %5977 }
0x143c   :  { %v5174_v56 = vmul.f32 %v5978_v11, %v5142_v37 }
0x143d   :  { %v5980_v6 = vpop.eup %5979 }
0x143e   :  { %v5173_v43 = vmul.f32 %v5980_v6, %v5141_v9  ;;  %v5182_v52 = vmul.f32 %v5180_v47, %v5174_v56 }
0x1440   :  { %v5181_v48 = vmul.f32 %v5180_v47, %v5173_v43  ;;  %v5190_v24 = vadd.f32 %v5188_v8, %v5182_v52 }
0x1442   :  { %v5189_v45 = vadd.f32 %v5188_v8, %v5181_v48  ;;  %v5194_v53 = vmul.f32 %v5190_v24, %v8984_v27 }
0x1444   :  { %v5193_v13 = vmul.f32 %v5189_v45, %v8983_v35  ;;  %5198 = vst.msk [vmem:[#allocation8 + $0x8] sm:$0xff] %vm143_vm0, %v5194_v53 }
0x1446   :  { %5197 = vst.msk [vmem:[#allocation8] sm:$0xff] %vm143_vm0, %v5193_v13 }
0x14b6   :  { %v5160_v7 = vpop.xlane.xlu0 %5159 }
0x14b7   :  { %v5164_v26 = vmul.f32 0.03125, %v5160_v7 }
0x14b8   :  { %v5157_v33 = vpop.xlane.xlu1 %5156 }
0x14b9   :  { %v5168_v34 = vadd.f32 1e-05, %v5164_v26  ;;  %v5163_v3 = vmul.f32 0.03125, %v5157_v33 }
0x14bb   :  { %5981 = vrsqrt.f32 %v5168_v34  ;;  %v5167_v23 = vadd.f32 1e-05, %v5163_v3 }
0x14bd   :  { %5983 = vrsqrt.f32 %v5167_v23 }
0x14c8   :  { %v5982_v36 = vpop.eup %5981 }
0x14c9   :  { %v5176_v30 = vmul.f32 %v5982_v36, %v5144_v57 }
0x14ca   :  { %v5984_v39 = vpop.eup %5983 }
0x14cb   :  { %v5184_v1 = vmul.f32 %v5180_v47, %v5176_v30  ;;  %v5175_v20 = vmul.f32 %v5984_v39, %v5143_v25 }
0x14cd   :  { %v5183_v27 = vmul.f32 %v5180_v47, %v5175_v20  ;;  %v5192_v0 = vadd.f32 %v5188_v8, %v5184_v1 }
0x14cf   :  { %v5191_v35 = vadd.f32 %v5188_v8, %v5183_v27  ;;  %v5196_v46 = vmul.f32 %v5192_v0, %v8986_v12 }
0x14d1   :  { %v5195_v41 = vmul.f32 %v5191_v35, %v8985_v16  ;;  %5200 = vst.msk [vmem:[#allocation8 + $0x18] sm:$0xff] %vm143_vm0, %v5196_v46 }
0x14d3   :  { %5199 = vst.msk [vmem:[#allocation8 + $0x10] sm:$0xff] %vm143_vm0, %v5195_v41 }
0x14d4   :  { %6105 = shalt.err (!%p6102_p5)
}
0x14d5   :  { %5212 = dma.vmem_to_hbm [thread:$0]  %s5207_s17, 512, %s8832_s9, [#allocation4], %s6122_s14, %s6122_s14, %s6123_s15  }
0x14d6   :  { %6118 = dma.done.wait [#allocation4], 512  }
0x14d7   :  { %6119 = vsyncadd [#allocation4], 4294966784 }
0x14d8   :  { %5216 = vsyncpa [#allocation3], 1 }
0x14d9   :  { %5217 = vsyncpa [#allocation6], 1 }
0x14da   :  { %5218 = vsyncpa [#allocation4], 1 }

</bundles_post_ra>
